<compile_context>
chip_gen: v7x
topology: tpu7x:2x2x1
jax: 0.10.0
libtpu: 0.0.40
codegen_flags: <defaults>
</compile_context>

<pallas_src>
import jax
import jax.numpy as jnp
from jax.experimental import pallas as pl
from jax.experimental.pallas import tpu as pltpu

EPS = 1e-5
C_IN = 24
C_OUT = 144


def _choose_tile_hw(hw, *, max_tile=2048, align=128, n_cores=2):
    """128-aligned HW tile, <= max_tile, tile count a multiple of the TC count
    so v7x's two TensorCores get near-equal work (e.g. HW=3136 -> 1664/1472)."""
    if hw <= align:
        return hw                              # tiny spatial: full-extent block
    n_tiles = n_cores
    while pl.cdiv(hw, n_tiles) > max_tile:
        n_tiles += n_cores
    t = pl.cdiv(hw, n_tiles)
    t = pl.cdiv(t, align) * align              # round up to a lane multiple
    return min(t, hw)


def _make_kernel(inv_count):
    def kernel(x23_all_ref, x23_ref, x16_ref, gamma_ref, beta_ref, w_ref, out_ref):
        # x23_all_ref : (N, C_IN, HW)  full array, VMEM-resident (constant block)
        # x23_ref     : (C_IN, T)      this tile of x23
        # x16_ref     : (C_IN, T)      this tile of the residual
        # gamma/beta  : (C_IN, 1)
        # w_ref       : (C_OUT, C_IN)
        # out_ref     : (C_OUT, T)

        # ---- global batch statistics (single fused sum / sumsq reduction) ----
        x_all = x23_all_ref[...].astype(jnp.float32)               # (N, C, HW)
        s1 = jnp.sum(jnp.sum(x_all, axis=2, keepdims=True), axis=0)          # (C,1)
        s2 = jnp.sum(jnp.sum(x_all * x_all, axis=2, keepdims=True), axis=0)  # (C,1)
        mean = s1 * inv_count
        var = jnp.maximum(s2 * inv_count - mean * mean, 0.0)        # biased var
        inv_std = jax.lax.rsqrt(var + EPS)
        scale = gamma_ref[...] * inv_std                            # (C_IN, 1)
        shift = beta_ref[...] - mean * scale                        # (C_IN, 1)

        # ---- folded BN + residual add + 1x1 conv (MXU matmul) on this tile ----
        x23 = x23_ref[...].astype(jnp.float32)
        x16 = x16_ref[...].astype(jnp.float32)
        x25 = x16 + x23 * scale + shift                             # (C_IN, T)
        out_ref[...] = jnp.dot(
            w_ref[...], x25, preferred_element_type=jnp.float32
        ).astype(out_ref.dtype)

    return kernel


def bn_add_conv(x23_nchw, x16_nchw, gamma, beta, conv_w, *, max_tile_hw=2048):
    """x23_nchw, x16_nchw: (N, 24, H, W); conv_w: (144, 24, 1, 1) torch layout."""
    n, c, h, w = x23_nchw.shape
    assert c == C_IN
    hw = h * w

    # NCHW -> (N, C, HW): pure reshape, no transpose / extra HBM traffic.
    x23_f = x23_nchw.reshape(n, C_IN, hw).astype(jnp.float32)
    x16_f = x16_nchw.reshape(n, C_IN, hw).astype(jnp.float32)
    gamma_c = gamma.reshape(C_IN, 1).astype(jnp.float32)
    beta_c = beta.reshape(C_IN, 1).astype(jnp.float32)
    w_mat = conv_w.reshape(C_OUT, C_IN).astype(jnp.float32)         # W @ X, no transpose

    t = _choose_tile_hw(hw, max_tile=max_tile_hw)
    grid = (n, pl.cdiv(hw, t))

    kernel = _make_kernel(1.0 / float(n * hw))

    out_flat = pl.pallas_call(
        kernel,
        out_shape=jax.ShapeDtypeStruct((n, C_OUT, hw), jnp.float32),
        grid=grid,
        in_specs=[
            # Full x23 for in-kernel batch stats; constant block index -> DMA'd once.
            pl.BlockSpec((n, C_IN, hw), lambda i, j: (0, 0, 0)),
            # Tiled x23 / x16 for the fused normalize + add + matmul.
            pl.BlockSpec((None, C_IN, t), lambda i, j: (i, 0, j)),
            pl.BlockSpec((None, C_IN, t), lambda i, j: (i, 0, j)),
            pl.BlockSpec((C_IN, 1), lambda i, j: (0, 0)),
            pl.BlockSpec((C_IN, 1), lambda i, j: (0, 0)),
            pl.BlockSpec((C_OUT, C_IN), lambda i, j: (0, 0)),
        ],
        out_specs=pl.BlockSpec((None, C_OUT, t), lambda i, j: (i, 0, j)),
        compiler_params=pltpu.CompilerParams(
            dimension_semantics=("parallel", "parallel"),
        ),
    )(x23_f, x23_f, x16_f, gamma_c, beta_c, w_mat)

    return out_flat.reshape(n, C_OUT, h, w)


def _reference(x23_nchw, x16_nchw, gamma, beta, conv_w):
    x = x23_nchw.astype(jnp.float32)
    mean = jnp.mean(x, axis=(0, 2, 3), keepdims=True)
    var = jnp.mean((x - mean) ** 2, axis=(0, 2, 3), keepdims=True)
    x24 = (x - mean) / jnp.sqrt(var + EPS)
    x24 = x24 * gamma.reshape(1, C_IN, 1, 1) + beta.reshape(1, C_IN, 1, 1)
    x25 = x16_nchw + x24
    return jnp.einsum("nchw,oc->nohw", x25, conv_w.reshape(C_OUT, C_IN))


if __name__ == "__main__":
    key = jax.random.PRNGKey(0)
    k1, k2, k3, k4, k5 = jax.random.split(key, 5)

    # Shapes implied by the module: (1, 24, 56, 56) -> (1, 144, 56, 56).
    N, H, W = 1, 56, 56
    x23 = jax.random.normal(k1, (N, C_IN, H, W), dtype=jnp.float32)
    x16 = jax.random.normal(k2, (N, C_IN, H, W), dtype=jnp.float32)
    gamma = 1.0 + 0.1 * jax.random.normal(k3, (C_IN,), dtype=jnp.float32)
    beta = 0.1 * jax.random.normal(k4, (C_IN,), dtype=jnp.float32)
    conv_w = 0.1 * jax.random.normal(k5, (C_OUT, C_IN, 1, 1), dtype=jnp.float32)

    run = jax.jit(bn_add_conv)
    out = jax.block_until_ready(run(x23, x16, gamma, beta, conv_w))

    ref = _reference(x23, x16, gamma, beta, conv_w)
    assert out.shape == (N, C_OUT, H, W), out.shape
    max_err = float(jnp.max(jnp.abs(out - ref)))
    assert max_err < 1e-3, max_err
    print("KERNEL_OK")
</pallas_src>

<mosaic_0001>
module attributes {stable_mosaic.version = 11 : i64} {
  func.func @kernel(%arg0: i32, %arg1: i32, %arg2: memref<1x24x3136xf32, #tpu.memory_space<vmem>>, %arg3: memref<1x24x1664xf32, #tpu.memory_space<vmem>>, %arg4: memref<1x24x1664xf32, #tpu.memory_space<vmem>>, %arg5: memref<24x1xf32, #tpu.memory_space<vmem>>, %arg6: memref<24x1xf32, #tpu.memory_space<vmem>>, %arg7: memref<144x24xf32, #tpu.memory_space<vmem>>, %arg8: memref<1x144x1664xf32, #tpu.memory_space<vmem>>) attributes {dimension_semantics = [#tpu.dimension_semantics<parallel>, #tpu.dimension_semantics<parallel>], iteration_bounds = array<i64: 1, 2>, scalar_prefetch = 0 : i64, scratch_operands = 0 : i64, tpu.core_type = #tpu.core_type<tc>, window_params = [{pipeline_mode = #tpu.pipeline_mode<synchronous>, transform_indices = @transform_0, window_bounds = array<i64: 1, 24, 3136>}, {transform_indices = @transform_1, window_bounds = array<i64: 1, 24, 1664>}, {transform_indices = @transform_2, window_bounds = array<i64: 1, 24, 1664>}, {pipeline_mode = #tpu.pipeline_mode<synchronous>, transform_indices = @transform_3, window_bounds = array<i64: 24, 1>}, {pipeline_mode = #tpu.pipeline_mode<synchronous>, transform_indices = @transform_4, window_bounds = array<i64: 24, 1>}, {pipeline_mode = #tpu.pipeline_mode<synchronous>, transform_indices = @transform_5, window_bounds = array<i64: 144, 24>}, {transform_indices = @transform_6, window_bounds = array<i64: 1, 144, 1664>}]} {
    %c0 = arith.constant 0 : index
    %c0_0 = arith.constant 0 : index
    %c0_1 = arith.constant 0 : index
    %0 = vector.load %arg2[%c0, %c0_0, %c0_1] : memref<1x24x3136xf32, #tpu.memory_space<vmem>>, vector<1x24x3136xf32>
    %cst = arith.constant dense<0.000000e+00> : vector<1x24xf32>
    %1 = vector.multi_reduction <add>, %0, %cst [2] : vector<1x24x3136xf32> to vector<1x24xf32>
    %2 = vector.shape_cast %1 : vector<1x24xf32> to vector<1x24x1xf32>
    %cst_2 = arith.constant dense<0.000000e+00> : vector<24x1xf32>
    %3 = vector.multi_reduction <add>, %2, %cst_2 [0] : vector<1x24x1xf32> to vector<24x1xf32>
    %4 = arith.mulf %0, %0 : vector<1x24x3136xf32>
    %cst_3 = arith.constant dense<0.000000e+00> : vector<1x24xf32>
    %5 = vector.multi_reduction <add>, %4, %cst_3 [2] : vector<1x24x3136xf32> to vector<1x24xf32>
    %6 = vector.shape_cast %5 : vector<1x24xf32> to vector<1x24x1xf32>
    %cst_4 = arith.constant dense<0.000000e+00> : vector<24x1xf32>
    %7 = vector.multi_reduction <add>, %6, %cst_4 [0] : vector<1x24x1xf32> to vector<24x1xf32>
    %cst_5 = arith.constant 3.18877544E-4 : f32
    %8 = vector.broadcast %cst_5 : f32 to vector<24x1xf32>
    %9 = arith.mulf %3, %8 : vector<24x1xf32>
    %cst_6 = arith.constant 3.18877544E-4 : f32
    %10 = vector.broadcast %cst_6 : f32 to vector<24x1xf32>
    %11 = arith.mulf %7, %10 : vector<24x1xf32>
    %12 = arith.mulf %9, %9 : vector<24x1xf32>
    %13 = arith.subf %11, %12 : vector<24x1xf32>
    %cst_7 = arith.constant 0.000000e+00 : f32
    %14 = vector.broadcast %cst_7 : f32 to vector<24x1xf32>
    %15 = arith.maximumf %13, %14 : vector<24x1xf32>
    %cst_8 = arith.constant 9.99999974E-6 : f32
    %16 = vector.broadcast %cst_8 : f32 to vector<24x1xf32>
    %17 = arith.addf %15, %16 : vector<24x1xf32>
    %18 = math.rsqrt %17 : vector<24x1xf32>
    %c0_9 = arith.constant 0 : index
    %c0_10 = arith.constant 0 : index
    %19 = vector.load %arg5[%c0_9, %c0_10] : memref<24x1xf32, #tpu.memory_space<vmem>>, vector<24x1xf32>
    %20 = arith.mulf %19, %18 : vector<24x1xf32>
    %c0_11 = arith.constant 0 : index
    %c0_12 = arith.constant 0 : index
    %21 = vector.load %arg6[%c0_11, %c0_12] : memref<24x1xf32, #tpu.memory_space<vmem>>, vector<24x1xf32>
    %22 = arith.mulf %9, %20 : vector<24x1xf32>
    %23 = arith.subf %21, %22 : vector<24x1xf32>
    %c0_13 = arith.constant 0 : index
    %c0_14 = arith.constant 0 : index
    %c0_15 = arith.constant 0 : index
    %24 = vector.load %arg3[%c0_13, %c0_14, %c0_15] : memref<1x24x1664xf32, #tpu.memory_space<vmem>>, vector<1x24x1664xf32>
    %25 = vector.shape_cast %24 : vector<1x24x1664xf32> to vector<24x1664xf32>
    %c0_16 = arith.constant 0 : index
    %c0_17 = arith.constant 0 : index
    %c0_18 = arith.constant 0 : index
    %26 = vector.load %arg4[%c0_16, %c0_17, %c0_18] : memref<1x24x1664xf32, #tpu.memory_space<vmem>>, vector<1x24x1664xf32>
    %27 = vector.shape_cast %26 : vector<1x24x1664xf32> to vector<24x1664xf32>
    %28 = vector.broadcast %20 : vector<24x1xf32> to vector<24x1664xf32>
    %29 = arith.mulf %25, %28 : vector<24x1664xf32>
    %30 = arith.addf %27, %29 : vector<24x1664xf32>
    %31 = vector.broadcast %23 : vector<24x1xf32> to vector<24x1664xf32>
    %32 = arith.addf %30, %31 : vector<24x1664xf32>
    %c0_19 = arith.constant 0 : index
    %c0_20 = arith.constant 0 : index
    %33 = vector.load %arg7[%c0_19, %c0_20] : memref<144x24xf32, #tpu.memory_space<vmem>>, vector<144x24xf32>
    %cst_21 = arith.constant dense<0.000000e+00> : vector<144x1664xf32>
    %34 = tpu.matmul %33, %32, %cst_21 {dimension_numbers = #tpu.dot_dimension_numbers<[1], [0], [0], [1], [0, 0, 1, 1], [], []>} : vector<144x24xf32>, vector<24x1664xf32>, vector<144x1664xf32> -> vector<144x1664xf32>
    %c0_22 = arith.constant 0 : index
    %c0_23 = arith.constant 0 : index
    %c0_24 = arith.constant 0 : index
    %35 = vector.load %arg8[%c0_22, %c0_23, %c0_24] : memref<1x144x1664xf32, #tpu.memory_space<vmem>>, vector<1x144x1664xf32>
    %36 = vector.shape_cast %35 : vector<1x144x1664xf32> to vector<144x1664xf32>
    %37 = vector.shape_cast %34 : vector<144x1664xf32> to vector<1x144x1664xf32>
    tpu.vector_store %arg8[%c0_22, %c0_23, %c0_24], %37 {strides = array<i32>} : memref<1x144x1664xf32, #tpu.memory_space<vmem>>, vector<1x144x1664xf32>,
    return
  }
  func.func @transform_0(%arg0: i32, %arg1: i32) -> (i32, i32, i32) {
    %c0_i32 = arith.constant 0 : i32
    %c0_i32_0 = arith.constant 0 : i32
    %c0_i32_1 = arith.constant 0 : i32
    %c0_i32_2 = arith.constant 0 : i32
    return %c0_i32, %c0_i32_0, %c0_i32_1 : i32, i32, i32
  }
  func.func @transform_1(%arg0: i32, %arg1: i32) -> (i32, i32, i32) {
    %c0_i32 = arith.constant 0 : i32
    %c0_i32_0 = arith.constant 0 : i32
    return %arg0, %c0_i32, %arg1 : i32, i32, i32
  }
  func.func @transform_2(%arg0: i32, %arg1: i32) -> (i32, i32, i32) {
    %c0_i32 = arith.constant 0 : i32
    %c0_i32_0 = arith.constant 0 : i32
    return %arg0, %c0_i32, %arg1 : i32, i32, i32
  }
  func.func @transform_3(%arg0: i32, %arg1: i32) -> (i32, i32) {
    %c0_i32 = arith.constant 0 : i32
    %c0_i32_0 = arith.constant 0 : i32
    %c0_i32_1 = arith.constant 0 : i32
    return %c0_i32, %c0_i32_0 : i32, i32
  }
  func.func @transform_4(%arg0: i32, %arg1: i32) -> (i32, i32) {
    %c0_i32 = arith.constant 0 : i32
    %c0_i32_0 = arith.constant 0 : i32
    %c0_i32_1 = arith.constant 0 : i32
    return %c0_i32, %c0_i32_0 : i32, i32
  }
  func.func @transform_5(%arg0: i32, %arg1: i32) -> (i32, i32) {
    %c0_i32 = arith.constant 0 : i32
    %c0_i32_0 = arith.constant 0 : i32
    %c0_i32_1 = arith.constant 0 : i32
    return %c0_i32, %c0_i32_0 : i32, i32
  }
  func.func @transform_6(%arg0: i32, %arg1: i32) -> (i32, i32, i32) {
    %c0_i32 = arith.constant 0 : i32
    %c0_i32_0 = arith.constant 0 : i32
    return %arg0, %c0_i32, %arg1 : i32, i32, i32
  }
}

</mosaic_0001>

<bundles_post_ra>
// kernel: bn_add_conv.1
= control target key start
LH: loop header
LB: loop body
LE: loop exit
PB: predicated region body
PF: predicated region fallthrough
CT: control target
= control target key end

     0   :  { %s8332_s0 = inlined_call_operand.vmem [shape: f32[1,24,3136], index: 0, kind: input, shape index: {}, may-alias: {0,1}]   ;;  %s8333_s1 = inlined_call_operand.vmem [shape: f32[1,24,3136], index: 1, kind: input, shape index: {}, may-alias: {0,1}]   ;;  %s8334_s2 = inlined_call_operand.vmem [shape: f32[1,24,3136], index: 2, kind: input, shape index: {}]   ;;  %s8335_s3 = inlined_call_operand.vmem [shape: f32[24,1], index: 3, kind: input, shape index: {}]   ;;  %s8336_s4 = inlined_call_operand.vmem [shape: f32[24,1], index: 4, kind: input, shape index: {}]   ;;  %s8337_s5 = inlined_call_operand.vmem [shape: f32[144,24], index: 5, kind: input, shape index: {}]   ;;  %s8338_s6 = inlined_call_operand.vmem [shape: f32[1,144,3136], index: 6, kind: output, shape index: {}]  }
   0x1   :  { %8340 = sst [smem:[#allocation7_spill]] %s8333_s1 }
   0x2   :  { %8341 = sst [smem:[#allocation8_spill]] %s8338_s6 }
   0x3   :  { %s5442_s21 = smov 0   ;;  %s5444_s22 = smov 0  }
   0x4   :  { %s5446_s23 = smov 0   ;;  %s5448_s24 = smov 0  }
   0x5   :  { %s5450_s25 = smov 0  }
   0x6 LB: > { %s25_s26 = sadd.s32 1, %s5201_s24  ;;  %s4225_s27 = sadd.s32 4294967295, %s5205_s25   ;;  %s5205_s25 = sphi %s5450_s25, %s16_s25   ;;  %s5201_s24 = sphi %s5448_s24, %s8393_s24   ;;  %s5197_s23 = sphi %s5446_s23, %s8392_s23   ;;  %s5193_s22 = sphi %s5444_s22, %s8391_s22   ;;  %s5189_s21 = sphi %s5442_s21, %s8390_s21  }
   0x7   : > { %p26_p0 = scmp.ge.s32.totalorder %s25_s26, 2  ;;  %p65_p1 = scmp.ne.s32.totalorder %s5193_s22, %s5189_s21 }
   0x8   : > { %p66_p2 = scmp.eq.s32.totalorder %s5205_s25, 0  ;;  %p188_p4 = scmp.eq.s32.totalorder %s4225_s27, 1 }
   0x9   : > { %s8395_s26 = smov (%p26_p0, %s25_s26), 0  ;;  %s58_s30 = sadd.s32 1, %s5193_s22 }
   0xa   : > { %8342 = sst [smem:[#allocation5_spill]] %s8395_s26  ;;  %p5474_p3 = por %p66_p2, %p65_p1 }
   0xb   : > { %s54_s29 = ssub.s32 %s5201_s24, %s8395_s26  ;;  %p5481_p6 = por %p188_p4, %p65_p1 }
   0xc   : > { %p56_p5 = scmp.eq.s32.totalorder %s54_s29, 0  ;;  %p4228_p7 = scmp.ge.s32.totalorder %s5205_s25, 2 }
   0xe   : > { %s5486_s8 = scalar_select %p56_p5, %s5193_s22, %s58_s30  }
   0xf   : > { %222 = sbr.rel (%p4228_p7) target bundleno = 406 (0x196), region = 32 }
  0x10   : > { %8345 = sst [smem:[#allocation6_spill]] %s5486_s8 }
  0x16   : > { %225 = sbr.rel (!%p5474_p3) target bundleno = 214 (0xd6), region = 36  ;;  %s227_s9 = sand.u32 (%p5474_p3), 1, %s5193_s22  }
  0x17   : > { %s230_s10 = smul.u32 (%p5474_p3), 13, %s5201_s24  ;;  %s8346_s1 = sld [smem:[#allocation7_spill]] (%p5474_p3) }
  0x18   : > { %s4511_s11 = smul.u32 (%p5474_p3), 312, %s227_s9 }
  0x19   : > { %s231_s12 = ssub.s32 (%p5474_p3), 25, %s230_s10  ;;  %s4418_s13 = smul.u32 (%p5474_p3), 104, %s5201_s24 }
  0x1a   : > { %p232_p8 = scmp.lt.s32.totalorder (%p5474_p3), %s231_s12, 13  ;;  %s5501_s19 = scalar_lea.vmem (%p5474_p3), [#allocation2], %s4511_s11  }
  0x1d   : > { %s5497_s16 = scalar_lea.vmem %s8346_s1, %s4418_s13   ;;  %s8397_s12 = smov (!%p232_p8, %s231_s12), 13 }
  0x1e   : > { %s234_s17 = smul.u32 384, %s8397_s12  ;;  %s5499_s18 = sshll.u32 %s8397_s12, 3 }
  0x20   : > { %p4232_p9 = scmp.eq.s32.totalorder %s234_s17, 0 }
  0x21   : > { %p244_p10 = scmp.lt.u32.totalorder (!%p4232_p9), %s5499_s18, 8 }
  0x22   : > { %243 = sbr.rel (%p4232_p9) target bundleno = 214 (0xd6), region = 40 }
  0x29   : > { %247 = sbr.rel (%p244_p10) target bundleno = 205 (0xcd), region = 44  ;;  %s5505_s20 = sand.u32 (!%p244_p10), 7, %s5499_s18  }
  0x2a   : > { %p267_p11 = scmp.eq.s32.totalorder (!%p244_p10), %s5505_s20, 0  ;;  %p4233_p12 = scmp.ne.s32.totalorder (!%p244_p10), %s5505_s20, 0 }
  0x30   : > { %270 = sbr.rel (%p4233_p12) target bundleno = 123 (0x7b), region = 59  ;;  %s271_s27 = sshrl.u32 (!%p4233_p12), %s5499_s18, 3 }
  0x31   : > { %4951 = sdivrem.u32 (!%p4233_p12), %s271_s27, 24 }
  0x3a   : > { %s5512_s29 = spop.drf %4951 }
  0x3b   : > { %p4234_p13 = scmp.le.s32.totalorder %s5512_s29, 0 }
  0x3c   : > { %s8347_s30 = smov (!%p4234_p13), %s5501_s19  ;;  %s8348_s9 = smov (!%p4234_p13), %s5497_s16 }
  0x3d   : > { %4027 = sbr.rel (%p4234_p13) target bundleno = 94 (0x5e), region = 333  ;;  %s5521_s10 = smov (!%p4234_p13), 0  }
  0x3e   : > { %s5523_s11 = smov (!%p4234_p13), 0  }
  0x44 LB: >> { %v285_v0 = vld [vmem:[%s5213_s9] sm:$0xff]  ;;  %v287_v1 = vld [vmem:[%s5213_s9 + $0x8] sm:$0xff]  ;;  %v289_v2 = vld [vmem:[%s5213_s9 + $0x10] sm:$0xff]  ;;  %s429_s12 = sadd.s32 1, %s5217_s10  ;;  %s279_s11 = sadd.s32 1, %s5221_s11   ;;  %s5221_s11 = sphi %s5523_s11, %s279_s11   ;;  %s5217_s10 = sphi %s5521_s10, %s8351_s10   ;;  %s5213_s9 = sphi %s8348_s9, %s8350_s9   ;;  %s5209_s30 = sphi %s8347_s30, %s8349_s30  }
  0x45   : >> { %286 = vst [vmem:[%s5209_s30] sm:$0xff] %v285_v0  ;;  %288 = vst [vmem:[%s5209_s30 + $0x8] sm:$0xff] %v287_v1  ;;  %v291_v3 = vld [vmem:[%s5213_s9 + $0x18] sm:$0xff]  ;;  %v293_v4 = vld [vmem:[%s5213_s9 + $0x20] sm:$0xff]  ;;  %p430_p0 = scmp.ge.s32.totalorder %s429_s12, %s5512_s29  ;;  %p278_p1 = scmp.ge.s32.totalorder %s279_s11, %s5512_s29 }
  0x46   : >> { %290 = vst [vmem:[%s5209_s30 + $0x10] sm:$0xff] %v289_v2  ;;  %v295_v5 = vld [vmem:[%s5213_s9 + $0x28] sm:$0xff]  ;;  %292 = vst [vmem:[%s5209_s30 + $0x18] sm:$0xff] %v291_v3  ;;  %v297_v6 = vld [vmem:[%s5213_s9 + $0x30] sm:$0xff] }
  0x47   : >> { %294 = vst [vmem:[%s5209_s30 + $0x20] sm:$0xff] %v293_v4  ;;  %296 = vst [vmem:[%s5209_s30 + $0x28] sm:$0xff] %v295_v5  ;;  %v299_v7 = vld [vmem:[%s5213_s9 + $0x38] sm:$0xff]  ;;  %v301_v8 = vld [vmem:[%s5213_s9 + $0x40] sm:$0xff]  ;;  %s8399_s12 = smov (%p430_p0, %s429_s12), 0 }
  0x48   : >> { %298 = vst [vmem:[%s5209_s30 + $0x30] sm:$0xff] %v297_v6  ;;  %300 = vst [vmem:[%s5209_s30 + $0x38] sm:$0xff] %v299_v7  ;;  %v303_v9 = vld [vmem:[%s5213_s9 + $0x48] sm:$0xff]  ;;  %v305_v10 = vld [vmem:[%s5213_s9 + $0x50] sm:$0xff]  ;;  %s432_s13 = smul.u32 192, %s8399_s12  ;;  %s8351_s10 = smov %s8399_s12 }
  0x49   : >> { %302 = vst [vmem:[%s5209_s30 + $0x40] sm:$0xff] %v301_v8  ;;  %v307_v11 = vld [vmem:[%s5213_s9 + $0x58] sm:$0xff]  ;;  %304 = vst [vmem:[%s5209_s30 + $0x48] sm:$0xff] %v303_v9  ;;  %v309_v12 = vld [vmem:[%s5213_s9 + $0x60] sm:$0xff] }
  0x4a   : >> { %306 = vst [vmem:[%s5209_s30 + $0x50] sm:$0xff] %v305_v10  ;;  %308 = vst [vmem:[%s5209_s30 + $0x58] sm:$0xff] %v307_v11  ;;  %v333_v13 = vld [vmem:[%s5213_s9 + $0xc8] sm:$0xff]  ;;  %v335_v14 = vld [vmem:[%s5213_s9 + $0xd0] sm:$0xff]  ;;  %s5600_s14 = scalar_lea.vmem %s5497_s16, %s432_s13   ;;  %s5603_s15 = scalar_lea.vmem %s5501_s19, %s432_s13 [#allocation2]  }
  0x4b   : >> { %310 = vst [vmem:[%s5209_s30 + $0x60] sm:$0xff] %v309_v12  ;;  %334 = vst [vmem:[%s5209_s30 + $0x68] sm:$0xff] %v333_v13  ;;  %v337_v15 = vld [vmem:[%s5213_s9 + $0xd8] sm:$0xff]  ;;  %v339_v16 = vld [vmem:[%s5213_s9 + $0xe0] sm:$0xff] }
  0x4c   : >> { %336 = vst [vmem:[%s5209_s30 + $0x70] sm:$0xff] %v335_v14  ;;  %v341_v17 = vld [vmem:[%s5213_s9 + $0xe8] sm:$0xff]  ;;  %338 = vst [vmem:[%s5209_s30 + $0x78] sm:$0xff] %v337_v15  ;;  %v343_v18 = vld [vmem:[%s5213_s9 + $0xf0] sm:$0xff] }
  0x4d   : >> { %340 = vst [vmem:[%s5209_s30 + $0x80] sm:$0xff] %v339_v16  ;;  %342 = vst [vmem:[%s5209_s30 + $0x88] sm:$0xff] %v341_v17  ;;  %v345_v19 = vld [vmem:[%s5213_s9 + $0xf8] sm:$0xff]  ;;  %v347_v20 = vld [vmem:[%s5213_s9 + $0x100] sm:$0xff] }
  0x4e   : >> { %344 = vst [vmem:[%s5209_s30 + $0x90] sm:$0xff] %v343_v18  ;;  %346 = vst [vmem:[%s5209_s30 + $0x98] sm:$0xff] %v345_v19  ;;  %v349_v21 = vld [vmem:[%s5213_s9 + $0x108] sm:$0xff]  ;;  %v351_v22 = vld [vmem:[%s5213_s9 + $0x110] sm:$0xff] }
  0x4f   : >> { %348 = vst [vmem:[%s5209_s30 + $0xa0] sm:$0xff] %v347_v20  ;;  %v353_v23 = vld [vmem:[%s5213_s9 + $0x118] sm:$0xff]  ;;  %350 = vst [vmem:[%s5209_s30 + $0xa8] sm:$0xff] %v349_v21  ;;  %v355_v24 = vld [vmem:[%s5213_s9 + $0x120] sm:$0xff] }
  0x50   : >> { %352 = vst [vmem:[%s5209_s30 + $0xb0] sm:$0xff] %v351_v22  ;;  %354 = vst [vmem:[%s5209_s30 + $0xb8] sm:$0xff] %v353_v23  ;;  %v357_v25 = vld [vmem:[%s5213_s9 + $0x128] sm:$0xff]  ;;  %v381_v26 = vld [vmem:[%s5213_s9 + $0x190] sm:$0xff] }
  0x51   : >> { %356 = vst [vmem:[%s5209_s30 + $0xc0] sm:$0xff] %v355_v24  ;;  %358 = vst [vmem:[%s5209_s30 + $0xc8] sm:$0xff] %v357_v25  ;;  %v383_v27 = vld [vmem:[%s5213_s9 + $0x198] sm:$0xff]  ;;  %v385_v28 = vld [vmem:[%s5213_s9 + $0x1a0] sm:$0xff] }
  0x52   : >> { %382 = vst [vmem:[%s5209_s30 + $0xd0] sm:$0xff] %v381_v26  ;;  %v387_v29 = vld [vmem:[%s5213_s9 + $0x1a8] sm:$0xff]  ;;  %384 = vst [vmem:[%s5209_s30 + $0xd8] sm:$0xff] %v383_v27  ;;  %v389_v30 = vld [vmem:[%s5213_s9 + $0x1b0] sm:$0xff] }
  0x53   : >> { %386 = vst [vmem:[%s5209_s30 + $0xe0] sm:$0xff] %v385_v28  ;;  %388 = vst [vmem:[%s5209_s30 + $0xe8] sm:$0xff] %v387_v29  ;;  %v391_v31 = vld [vmem:[%s5213_s9 + $0x1b8] sm:$0xff]  ;;  %v393_v32 = vld [vmem:[%s5213_s9 + $0x1c0] sm:$0xff] }
  0x54   : >> { %390 = vst [vmem:[%s5209_s30 + $0xf0] sm:$0xff] %v389_v30  ;;  %392 = vst [vmem:[%s5209_s30 + $0xf8] sm:$0xff] %v391_v31  ;;  %v395_v33 = vld [vmem:[%s5213_s9 + $0x1c8] sm:$0xff]  ;;  %v397_v34 = vld [vmem:[%s5213_s9 + $0x1d0] sm:$0xff] }
  0x55   : >> { %394 = vst [vmem:[%s5209_s30 + $0x100] sm:$0xff] %v393_v32  ;;  %v399_v35 = vld [vmem:[%s5213_s9 + $0x1d8] sm:$0xff]  ;;  %396 = vst [vmem:[%s5209_s30 + $0x108] sm:$0xff] %v395_v33  ;;  %v401_v36 = vld [vmem:[%s5213_s9 + $0x1e0] sm:$0xff] }
  0x56   : >> { %398 = vst [vmem:[%s5209_s30 + $0x110] sm:$0xff] %v397_v34  ;;  %400 = vst [vmem:[%s5209_s30 + $0x118] sm:$0xff] %v399_v35  ;;  %v403_v37 = vld [vmem:[%s5213_s9 + $0x1e8] sm:$0xff]  ;;  %v405_v38 = vld [vmem:[%s5213_s9 + $0x1f0] sm:$0xff] }
  0x57   : >> { %402 = vst [vmem:[%s5209_s30 + $0x120] sm:$0xff] %v401_v36  ;;  %404 = vst [vmem:[%s5209_s30 + $0x128] sm:$0xff] %v403_v37  ;;  %v407_v39 = vld [vmem:[%s5213_s9 + $0x1f8] sm:$0xff]  ;;  %v409_v40 = vld [vmem:[%s5213_s9 + $0x200] sm:$0xff]  ;;  %281 = sbr.rel (!%p278_p1) target bundleno = 68 (0x44), region = 339 }
  0x58   : >> { %406 = vst [vmem:[%s5209_s30 + $0x130] sm:$0xff] %v405_v38  ;;  %v411_v41 = vld [vmem:[%s5213_s9 + $0x208] sm:$0xff]  ;;  %408 = vst [vmem:[%s5209_s30 + $0x138] sm:$0xff] %v407_v39  ;;  %v413_v42 = vld [vmem:[%s5213_s9 + $0x210] sm:$0xff] }
  0x59   : >> { %410 = vst [vmem:[%s5209_s30 + $0x140] sm:$0xff] %v409_v40  ;;  %412 = vst [vmem:[%s5209_s30 + $0x148] sm:$0xff] %v411_v41  ;;  %v415_v43 = vld [vmem:[%s5213_s9 + $0x218] sm:$0xff]  ;;  %v417_v44 = vld [vmem:[%s5213_s9 + $0x220] sm:$0xff] }
  0x5a   : >> { %414 = vst [vmem:[%s5209_s30 + $0x150] sm:$0xff] %v413_v42  ;;  %416 = vst [vmem:[%s5209_s30 + $0x158] sm:$0xff] %v415_v43  ;;  %v419_v45 = vld [vmem:[%s5213_s9 + $0x228] sm:$0xff]  ;;  %v421_v46 = vld [vmem:[%s5213_s9 + $0x230] sm:$0xff] }
  0x5b   : >> { %418 = vst [vmem:[%s5209_s30 + $0x160] sm:$0xff] %v417_v44  ;;  %v423_v47 = vld [vmem:[%s5213_s9 + $0x238] sm:$0xff]  ;;  %420 = vst [vmem:[%s5209_s30 + $0x168] sm:$0xff] %v419_v45  ;;  %v425_v48 = vld [vmem:[%s5213_s9 + $0x240] sm:$0xff] }
  0x5c   : >> { %422 = vst [vmem:[%s5209_s30 + $0x170] sm:$0xff] %v421_v46  ;;  %424 = vst [vmem:[%s5209_s30 + $0x178] sm:$0xff] %v423_v47  ;;  %v427_v49 = vld [vmem:[%s5213_s9 + $0x248] sm:$0xff]  ;;  %s8350_s9 = smov %s5600_s14 }
  0x5d   : >> { %426 = vst [vmem:[%s5209_s30 + $0x180] sm:$0xff] %v425_v48  ;;  %428 = vst [vmem:[%s5209_s30 + $0x188] sm:$0xff] %v427_v49  ;;  %s8349_s30 = smov %s5603_s15 }
  0x5e PF: > { %4953 = sdivrem.u32 %s271_s27, 24 }
  0x5f   : > { %s4235_s17 = smul.u32 3072, %s5512_s29 }
  0x61   : > { %s440_s13 = sshra.s32 %s4235_s17, 4 }
  0x62   : > { %s5665_s1 = scalar_lea.vmem %s5497_s16, %s440_s13   ;;  %s5668_s26 = scalar_lea.vmem %s5501_s19, %s440_s13 [#allocation2]  }
  0x67   : > { %s5670_s15 = spop.drf %4953 }
  0x68   : > { %p4237_p2 = scmp.le.s32.totalorder %s5670_s15, 0 }
  0x69   : > { %s8352_s30 = smov (!%p4237_p2), %s5668_s26  ;;  %s5227_s9 = smov (!%p4237_p2), %s5665_s1  }
  0x6a   : > { %4041 = sbr.rel (%p4237_p2) target bundleno = 123 (0x7b), region = 344  ;;  %s5231_s10 = smov (!%p4237_p2), 0  }
  0x6b   : > { %s5235_s11 = smov (!%p4237_p2), 0  }
  0x71 LB: >> { %v456_v50 = vld [vmem:[%s5229_s9] sm:$0xff]  ;;  %v458_v51 = vld [vmem:[%s5229_s9 + $0xc8] sm:$0xff]  ;;  %v460_v52 = vld [vmem:[%s5229_s9 + $0x190] sm:$0xff]  ;;  %s462_s27 = sadd.s32 1, %s5233_s10  ;;  %s450_s11 = sadd.s32 1, %s5237_s11   ;;  %s5237_s11 = sphi %s5235_s11, %s450_s11   ;;  %s5233_s10 = sphi %s5231_s10, %s5232_s10   ;;  %s5229_s9 = sphi %s5227_s9, %s467_s9   ;;  %s5225_s30 = sphi %s8352_s30, %s468_s30  }
  0x72   : >> { %457 = vst [vmem:[%s5225_s30] sm:$0xff] %v456_v50  ;;  %459 = vst [vmem:[%s5225_s30 + $0x68] sm:$0xff] %v458_v51  ;;  %p463_p4 = scmp.ge.s32.totalorder %s462_s27, %s5670_s15  ;;  %p449_p5 = scmp.ge.s32.totalorder %s450_s11, %s5670_s15 }
  0x73   : >> { %461 = vst [vmem:[%s5225_s30 + $0xd0] sm:$0xff] %v460_v52 }
  0x74   : >> { %s8401_s27 = smov (%p463_p4, %s462_s27), 0  ;;  %452 = sbr.rel (!%p449_p5) target bundleno = 113 (0x71), region = 350 }
  0x75   : >> { %s4238_s29 = sshll.u32 %s8401_s27, 3  ;;  %s5232_s10 = smov %s8401_s27  }
  0x76   : >> { %s467_s9 = scalar_lea.vmem %s5665_s1, %s4238_s29   ;;  %s468_s30 = scalar_lea.vmem %s5668_s26, %s4238_s29 [#allocation2]  }
  0x7b PF: > { %471 = sbr.rel (%p267_p11) target bundleno = 205 (0xcd), region = 77  ;;  %s473_s12 = ssub.s32 (!%p267_p11), %s5499_s18, %s5505_s20 }
  0x7c   : > { %s477_s14 = sshrl.u32 (!%p267_p11), %s5499_s18, 3  ;;  %s5690_s17 = scalar_lea.vmem (!%p267_p11), %s5497_s16, %s473_s12 }
  0x7d   : > { %s5693_s13 = scalar_lea.vmem (!%p267_p11), %s5501_s19, %s473_s12 [#allocation2]  ;;  %4955 = sdivrem.u32 (!%p267_p11), %s477_s14, 24 }
  0x86   : > { %s5697_s30 = spop.drf %4955 }
  0x87   : > { %p4240_p7 = scmp.le.s32.totalorder %s5697_s30, 0 }
  0x88   : > { %s8353_s1 = smov (!%p4240_p7), %s5501_s19  ;;  %s8354_s26 = smov (!%p4240_p7), %s5497_s16 }
  0x89   : > { %4055 = sbr.rel (%p4240_p7) target bundleno = 170 (0xaa), region = 355  ;;  %s5706_s15 = smov (!%p4240_p7), 0  }
  0x8a   : > { %s5708_s9 = smov (!%p4240_p7), 0  }
  0x90 LB: >> { %v491_v53 = vld [vmem:[%s5245_s26] sm:$0xff]  ;;  %v493_v54 = vld [vmem:[%s5245_s26 + $0x8] sm:$0xff]  ;;  %v495_v55 = vld [vmem:[%s5245_s26 + $0x10] sm:$0xff]  ;;  %s635_s10 = sadd.s32 1, %s5249_s15  ;;  %s485_s9 = sadd.s32 1, %s5253_s9   ;;  %s5253_s9 = sphi %s5708_s9, %s485_s9   ;;  %s5249_s15 = sphi %s5706_s15, %s8357_s15   ;;  %s5245_s26 = sphi %s8354_s26, %s8356_s26   ;;  %s5241_s1 = sphi %s8353_s1, %s8355_s1  }
  0x91   : >> { %492 = vst [vmem:[%s5241_s1] sm:$0xff] %v491_v53  ;;  %494 = vst [vmem:[%s5241_s1 + $0x8] sm:$0xff] %v493_v54  ;;  %v497_v56 = vld [vmem:[%s5245_s26 + $0x18] sm:$0xff]  ;;  %v499_v57 = vld [vmem:[%s5245_s26 + $0x20] sm:$0xff]  ;;  %p636_p8 = scmp.ge.s32.totalorder %s635_s10, %s5697_s30  ;;  %p484_p9 = scmp.ge.s32.totalorder %s485_s9, %s5697_s30 }
  0x92   : >> { %496 = vst [vmem:[%s5241_s1 + $0x10] sm:$0xff] %v495_v55  ;;  %v501_v58 = vld [vmem:[%s5245_s26 + $0x28] sm:$0xff]  ;;  %498 = vst [vmem:[%s5241_s1 + $0x18] sm:$0xff] %v497_v56  ;;  %v503_v59 = vld [vmem:[%s5245_s26 + $0x30] sm:$0xff] }
  0x93   : >> { %500 = vst [vmem:[%s5241_s1 + $0x20] sm:$0xff] %v499_v57  ;;  %502 = vst [vmem:[%s5241_s1 + $0x28] sm:$0xff] %v501_v58  ;;  %v505_v60 = vld [vmem:[%s5245_s26 + $0x38] sm:$0xff]  ;;  %v507_v61 = vld [vmem:[%s5245_s26 + $0x40] sm:$0xff]  ;;  %s8403_s10 = smov (%p636_p8, %s635_s10), 0 }
  0x94   : >> { %504 = vst [vmem:[%s5241_s1 + $0x30] sm:$0xff] %v503_v59  ;;  %506 = vst [vmem:[%s5241_s1 + $0x38] sm:$0xff] %v505_v60  ;;  %v509_v62 = vld [vmem:[%s5245_s26 + $0x48] sm:$0xff]  ;;  %v511_v63 = vld [vmem:[%s5245_s26 + $0x50] sm:$0xff]  ;;  %s638_s11 = smul.u32 192, %s8403_s10  ;;  %s8357_s15 = smov %s8403_s10 }
  0x95   : >> { %508 = vst [vmem:[%s5241_s1 + $0x40] sm:$0xff] %v507_v61  ;;  %v513_v0 = vld [vmem:[%s5245_s26 + $0x58] sm:$0xff]  ;;  %510 = vst [vmem:[%s5241_s1 + $0x48] sm:$0xff] %v509_v62  ;;  %v515_v1 = vld [vmem:[%s5245_s26 + $0x60] sm:$0xff] }
  0x96   : >> { %512 = vst [vmem:[%s5241_s1 + $0x50] sm:$0xff] %v511_v63  ;;  %514 = vst [vmem:[%s5241_s1 + $0x58] sm:$0xff] %v513_v0  ;;  %v539_v2 = vld [vmem:[%s5245_s26 + $0xc8] sm:$0xff]  ;;  %v541_v3 = vld [vmem:[%s5245_s26 + $0xd0] sm:$0xff]  ;;  %s5785_s27 = scalar_lea.vmem %s5497_s16, %s638_s11   ;;  %s5788_s29 = scalar_lea.vmem %s5501_s19, %s638_s11 [#allocation2]  }
  0x97   : >> { %516 = vst [vmem:[%s5241_s1 + $0x60] sm:$0xff] %v515_v1  ;;  %540 = vst [vmem:[%s5241_s1 + $0x68] sm:$0xff] %v539_v2  ;;  %v543_v4 = vld [vmem:[%s5245_s26 + $0xd8] sm:$0xff]  ;;  %v545_v5 = vld [vmem:[%s5245_s26 + $0xe0] sm:$0xff] }
  0x98   : >> { %542 = vst [vmem:[%s5241_s1 + $0x70] sm:$0xff] %v541_v3  ;;  %v547_v6 = vld [vmem:[%s5245_s26 + $0xe8] sm:$0xff]  ;;  %544 = vst [vmem:[%s5241_s1 + $0x78] sm:$0xff] %v543_v4  ;;  %v549_v7 = vld [vmem:[%s5245_s26 + $0xf0] sm:$0xff] }
  0x99   : >> { %546 = vst [vmem:[%s5241_s1 + $0x80] sm:$0xff] %v545_v5  ;;  %548 = vst [vmem:[%s5241_s1 + $0x88] sm:$0xff] %v547_v6  ;;  %v551_v8 = vld [vmem:[%s5245_s26 + $0xf8] sm:$0xff]  ;;  %v553_v9 = vld [vmem:[%s5245_s26 + $0x100] sm:$0xff] }
  0x9a   : >> { %550 = vst [vmem:[%s5241_s1 + $0x90] sm:$0xff] %v549_v7  ;;  %552 = vst [vmem:[%s5241_s1 + $0x98] sm:$0xff] %v551_v8  ;;  %v555_v10 = vld [vmem:[%s5245_s26 + $0x108] sm:$0xff]  ;;  %v557_v11 = vld [vmem:[%s5245_s26 + $0x110] sm:$0xff] }
  0x9b   : >> { %554 = vst [vmem:[%s5241_s1 + $0xa0] sm:$0xff] %v553_v9  ;;  %v559_v12 = vld [vmem:[%s5245_s26 + $0x118] sm:$0xff]  ;;  %556 = vst [vmem:[%s5241_s1 + $0xa8] sm:$0xff] %v555_v10  ;;  %v561_v13 = vld [vmem:[%s5245_s26 + $0x120] sm:$0xff] }
  0x9c   : >> { %558 = vst [vmem:[%s5241_s1 + $0xb0] sm:$0xff] %v557_v11  ;;  %560 = vst [vmem:[%s5241_s1 + $0xb8] sm:$0xff] %v559_v12  ;;  %v563_v14 = vld [vmem:[%s5245_s26 + $0x128] sm:$0xff]  ;;  %v587_v15 = vld [vmem:[%s5245_s26 + $0x190] sm:$0xff] }
  0x9d   : >> { %562 = vst [vmem:[%s5241_s1 + $0xc0] sm:$0xff] %v561_v13  ;;  %564 = vst [vmem:[%s5241_s1 + $0xc8] sm:$0xff] %v563_v14  ;;  %v589_v16 = vld [vmem:[%s5245_s26 + $0x198] sm:$0xff]  ;;  %v591_v17 = vld [vmem:[%s5245_s26 + $0x1a0] sm:$0xff] }
  0x9e   : >> { %588 = vst [vmem:[%s5241_s1 + $0xd0] sm:$0xff] %v587_v15  ;;  %v593_v18 = vld [vmem:[%s5245_s26 + $0x1a8] sm:$0xff]  ;;  %590 = vst [vmem:[%s5241_s1 + $0xd8] sm:$0xff] %v589_v16  ;;  %v595_v19 = vld [vmem:[%s5245_s26 + $0x1b0] sm:$0xff] }
  0x9f   : >> { %592 = vst [vmem:[%s5241_s1 + $0xe0] sm:$0xff] %v591_v17  ;;  %594 = vst [vmem:[%s5241_s1 + $0xe8] sm:$0xff] %v593_v18  ;;  %v597_v20 = vld [vmem:[%s5245_s26 + $0x1b8] sm:$0xff]  ;;  %v599_v21 = vld [vmem:[%s5245_s26 + $0x1c0] sm:$0xff] }
  0xa0   : >> { %596 = vst [vmem:[%s5241_s1 + $0xf0] sm:$0xff] %v595_v19  ;;  %598 = vst [vmem:[%s5241_s1 + $0xf8] sm:$0xff] %v597_v20  ;;  %v601_v22 = vld [vmem:[%s5245_s26 + $0x1c8] sm:$0xff]  ;;  %v603_v23 = vld [vmem:[%s5245_s26 + $0x1d0] sm:$0xff] }
  0xa1   : >> { %600 = vst [vmem:[%s5241_s1 + $0x100] sm:$0xff] %v599_v21  ;;  %v605_v24 = vld [vmem:[%s5245_s26 + $0x1d8] sm:$0xff]  ;;  %602 = vst [vmem:[%s5241_s1 + $0x108] sm:$0xff] %v601_v22  ;;  %v607_v25 = vld [vmem:[%s5245_s26 + $0x1e0] sm:$0xff] }
  0xa2   : >> { %604 = vst [vmem:[%s5241_s1 + $0x110] sm:$0xff] %v603_v23  ;;  %606 = vst [vmem:[%s5241_s1 + $0x118] sm:$0xff] %v605_v24  ;;  %v609_v26 = vld [vmem:[%s5245_s26 + $0x1e8] sm:$0xff]  ;;  %v611_v27 = vld [vmem:[%s5245_s26 + $0x1f0] sm:$0xff] }
  0xa3   : >> { %608 = vst [vmem:[%s5241_s1 + $0x120] sm:$0xff] %v607_v25  ;;  %610 = vst [vmem:[%s5241_s1 + $0x128] sm:$0xff] %v609_v26  ;;  %v613_v28 = vld [vmem:[%s5245_s26 + $0x1f8] sm:$0xff]  ;;  %v615_v29 = vld [vmem:[%s5245_s26 + $0x200] sm:$0xff]  ;;  %487 = sbr.rel (!%p484_p9) target bundleno = 144 (0x90), region = 361 }
  0xa4   : >> { %612 = vst [vmem:[%s5241_s1 + $0x130] sm:$0xff] %v611_v27  ;;  %v617_v30 = vld [vmem:[%s5245_s26 + $0x208] sm:$0xff]  ;;  %614 = vst [vmem:[%s5241_s1 + $0x138] sm:$0xff] %v613_v28  ;;  %v619_v31 = vld [vmem:[%s5245_s26 + $0x210] sm:$0xff] }
  0xa5   : >> { %616 = vst [vmem:[%s5241_s1 + $0x140] sm:$0xff] %v615_v29  ;;  %618 = vst [vmem:[%s5241_s1 + $0x148] sm:$0xff] %v617_v30  ;;  %v621_v32 = vld [vmem:[%s5245_s26 + $0x218] sm:$0xff]  ;;  %v623_v33 = vld [vmem:[%s5245_s26 + $0x220] sm:$0xff] }
  0xa6   : >> { %620 = vst [vmem:[%s5241_s1 + $0x150] sm:$0xff] %v619_v31  ;;  %622 = vst [vmem:[%s5241_s1 + $0x158] sm:$0xff] %v621_v32  ;;  %v625_v34 = vld [vmem:[%s5245_s26 + $0x228] sm:$0xff]  ;;  %v627_v35 = vld [vmem:[%s5245_s26 + $0x230] sm:$0xff] }
  0xa7   : >> { %624 = vst [vmem:[%s5241_s1 + $0x160] sm:$0xff] %v623_v33  ;;  %v629_v36 = vld [vmem:[%s5245_s26 + $0x238] sm:$0xff]  ;;  %626 = vst [vmem:[%s5241_s1 + $0x168] sm:$0xff] %v625_v34  ;;  %v631_v37 = vld [vmem:[%s5245_s26 + $0x240] sm:$0xff] }
  0xa8   : >> { %628 = vst [vmem:[%s5241_s1 + $0x170] sm:$0xff] %v627_v35  ;;  %630 = vst [vmem:[%s5241_s1 + $0x178] sm:$0xff] %v629_v36  ;;  %v633_v38 = vld [vmem:[%s5245_s26 + $0x248] sm:$0xff]  ;;  %s8356_s26 = smov %s5785_s27 }
  0xa9   : >> { %632 = vst [vmem:[%s5241_s1 + $0x180] sm:$0xff] %v631_v37  ;;  %634 = vst [vmem:[%s5241_s1 + $0x188] sm:$0xff] %v633_v38  ;;  %s8355_s1 = smov %s5788_s29 }
  0xaa PF: > { %4957 = sdivrem.u32 %s477_s14, 24 }
  0xab   : > { %s4241_s12 = smul.u32 3072, %s5697_s30 }
  0xad   : > { %s646_s11 = sshra.s32 %s4241_s12, 4 }
  0xae   : > { %s5850_s8 = scalar_lea.vmem %s5497_s16, %s646_s11   ;;  %s5853_s6 = scalar_lea.vmem %s5501_s19, %s646_s11 [#allocation2]  }
  0xb3   : > { %s5855_s29 = spop.drf %4957 }
  0xb4   : > { %p4243_p10 = scmp.le.s32.totalorder %s5855_s29, 0 }
  0xb5   : > { %s8358_s1 = smov (!%p4243_p10), %s5853_s6  ;;  %s5259_s26 = smov (!%p4243_p10), %s5850_s8  }
  0xb6   : > { %4069 = sbr.rel (%p4243_p10) target bundleno = 199 (0xc7), region = 366  ;;  %s5263_s15 = smov (!%p4243_p10), 0  }
  0xb7   : > { %s5267_s9 = smov (!%p4243_p10), 0  }
  0xbd LB: >> { %v662_v39 = vld [vmem:[%s5261_s26] sm:$0xff]  ;;  %v664_v40 = vld [vmem:[%s5261_s26 + $0xc8] sm:$0xff]  ;;  %v666_v41 = vld [vmem:[%s5261_s26 + $0x190] sm:$0xff]  ;;  %s668_s14 = sadd.s32 1, %s5265_s15  ;;  %s656_s9 = sadd.s32 1, %s5269_s9   ;;  %s5269_s9 = sphi %s5267_s9, %s656_s9   ;;  %s5265_s15 = sphi %s5263_s15, %s5264_s15   ;;  %s5261_s26 = sphi %s5259_s26, %s673_s26   ;;  %s5257_s1 = sphi %s8358_s1, %s674_s1  }
  0xbe   : >> { %663 = vst [vmem:[%s5257_s1] sm:$0xff] %v662_v39  ;;  %665 = vst [vmem:[%s5257_s1 + $0x68] sm:$0xff] %v664_v40  ;;  %p669_p11 = scmp.ge.s32.totalorder %s668_s14, %s5855_s29  ;;  %p655_p12 = scmp.ge.s32.totalorder %s656_s9, %s5855_s29 }
  0xbf   : >> { %667 = vst [vmem:[%s5257_s1 + $0xd0] sm:$0xff] %v666_v41 }
  0xc0   : >> { %s8405_s14 = smov (%p669_p11, %s668_s14), 0  ;;  %658 = sbr.rel (!%p655_p12) target bundleno = 189 (0xbd), region = 372 }
  0xc1   : >> { %s4244_s30 = sshll.u32 %s8405_s14, 3  ;;  %s5264_s15 = smov %s8405_s14  }
  0xc2   : >> { %s673_s26 = scalar_lea.vmem %s5850_s8, %s4244_s30   ;;  %s674_s1 = scalar_lea.vmem %s5853_s6, %s4244_s30 [#allocation2]  }
  0xc7 PF: > { %s5399_s10 = smov 0  }
  0xc8   : > { %s675_s27 = sshllo.u32 %s5399_s10, %s5505_s20 }
  0xc9   : > { %v684_v42 = vld [vmem:[%s5690_s17] sm:%s675_s27]  ;;  %v686_v43 = vld [vmem:[%s5690_s17 + $0xc8] sm:%s675_s27] }
  0xca   : > { %685 = vst [vmem:[%s5693_s13] sm:%s675_s27] %v684_v42  ;;  %687 = vst [vmem:[%s5693_s13 + $0x68] sm:%s675_s27] %v686_v43 }
  0xcb   : > { %v688_v44 = vld [vmem:[%s5690_s17 + $0x190] sm:%s675_s27] }
  0xcc   : > { %689 = vst [vmem:[%s5693_s13 + $0xd0] sm:%s675_s27] %v688_v44 }
  0xcd PF: > { %p4246_p13 = scmp.ge.u32.totalorder %s5499_s18, 8 }
  0xce   : > { %s5400_s6 = smov (!%p4246_p13), 0  }
  0xcf   : > { %250 = sbr.rel (%p4246_p13) target bundleno = 214 (0xd6), region = 48  ;;  %s251_s8 = sshllo.u32 (!%p4246_p13), %s5400_s6, %s5499_s18 }
  0xd0   : > { %v260_v45 = vld [vmem:[%s5497_s16] sm:%s251_s8] (!%p4246_p13)  ;;  %v262_v46 = vld [vmem:[%s5497_s16 + $0xc8] sm:%s251_s8] (!%p4246_p13) }
  0xd1   : > { %261 = vst [vmem:[%s5501_s19] sm:%s251_s8] (!%p4246_p13), %v260_v45  ;;  %263 = vst [vmem:[%s5501_s19 + $0x68] sm:%s251_s8] (!%p4246_p13), %v262_v46 }
  0xd2   : > { %v264_v47 = vld [vmem:[%s5497_s16 + $0x190] sm:%s251_s8] (!%p4246_p13) }
  0xd3   : > { %265 = vst [vmem:[%s5501_s19 + $0xd0] sm:%s251_s8] (!%p4246_p13), %v264_v47 }
  0xd6 PF: > { %693 = sbr.rel (!%p5474_p3) target bundleno = 406 (0x196), region = 102  ;;  %s695_s20 = sand.u32 (%p5474_p3), 1, %s5193_s22  }
  0xd7   : > { %s698_s17 = smul.u32 (%p5474_p3), 13, %s5201_s24 }
  0xd8   : > { %s4512_s13 = smul.u32 (%p5474_p3), 312, %s695_s20 }
  0xd9   : > { %s699_s12 = ssub.s32 (%p5474_p3), 25, %s698_s17  ;;  %s4419_s18 = smul.u32 (%p5474_p3), 104, %s5201_s24 }
  0xda   : > { %p700_p0 = scmp.lt.s32.totalorder (%p5474_p3), %s699_s12, 13  ;;  %s5896_s28 = scalar_lea.vmem (%p5474_p3), [#allocation3], %s4512_s13  }
  0xdb   : > { %s5892_s16 = scalar_lea.vmem (%p5474_p3), %s8334_s2, %s4419_s18  }
  0xdd   : > { %s8407_s12 = smov (!%p700_p0, %s699_s12), 13 }
  0xde   : > { %s702_s19 = smul.u32 384, %s8407_s12  ;;  %s5894_s1 = sshll.u32 %s8407_s12, 3 }
  0xe0   : > { %p4250_p3 = scmp.eq.s32.totalorder %s702_s19, 0 }
  0xe1   : > { %p712_p1 = scmp.lt.u32.totalorder (!%p4250_p3), %s5894_s1, 8 }
  0xe2   : > { %711 = sbr.rel (%p4250_p3) target bundleno = 406 (0x196), region = 106 }
  0xe9   : > { %715 = sbr.rel (%p712_p1) target bundleno = 397 (0x18d), region = 110  ;;  %s5900_s26 = sand.u32 (!%p712_p1), 7, %s5894_s1  }
  0xea   : > { %p735_p2 = scmp.eq.s32.totalorder (!%p712_p1), %s5900_s26, 0  ;;  %p4251_p4 = scmp.ne.s32.totalorder (!%p712_p1), %s5900_s26, 0 }
  0xf0   : > { %738 = sbr.rel (%p4251_p4) target bundleno = 315 (0x13b), region = 125  ;;  %s739_s15 = sshrl.u32 (!%p4251_p4), %s5894_s1, 3 }
  0xf1   : > { %4959 = sdivrem.u32 (!%p4251_p4), %s739_s15, 24 }
  0xfa   : > { %s5907_s9 = spop.drf %4959 }
  0xfb   : > { %p4252_p5 = scmp.le.s32.totalorder %s5907_s9, 0 }
  0xfc   : > { %s8359_s14 = smov (!%p4252_p5), %s5896_s28  ;;  %s8360_s30 = smov (!%p4252_p5), %s5892_s16 }
  0xfd   : > { %4083 = sbr.rel (%p4252_p5) target bundleno = 286 (0x11e), region = 377  ;;  %s5916_s10 = smov (!%p4252_p5), 0  }
  0xfe   : > { %s5918_s27 = smov (!%p4252_p5), 0  }
 0x104 LB: >> { %v753_v48 = vld [vmem:[%s5277_s30] sm:$0xff]  ;;  %v755_v49 = vld [vmem:[%s5277_s30 + $0x8] sm:$0xff]  ;;  %v757_v50 = vld [vmem:[%s5277_s30 + $0x10] sm:$0xff]  ;;  %s897_s6 = sadd.s32 1, %s5281_s10  ;;  %s747_s27 = sadd.s32 1, %s5285_s27   ;;  %s5285_s27 = sphi %s5918_s27, %s747_s27   ;;  %s5281_s10 = sphi %s5916_s10, %s8363_s10   ;;  %s5277_s30 = sphi %s8360_s30, %s8362_s30   ;;  %s5273_s14 = sphi %s8359_s14, %s8361_s14  }
 0x105   : >> { %754 = vst [vmem:[%s5273_s14] sm:$0xff] %v753_v48  ;;  %756 = vst [vmem:[%s5273_s14 + $0x8] sm:$0xff] %v755_v49  ;;  %v759_v51 = vld [vmem:[%s5277_s30 + $0x18] sm:$0xff]  ;;  %v761_v52 = vld [vmem:[%s5277_s30 + $0x20] sm:$0xff]  ;;  %p898_p7 = scmp.ge.s32.totalorder %s897_s6, %s5907_s9  ;;  %p746_p8 = scmp.ge.s32.totalorder %s747_s27, %s5907_s9 }
 0x106   : >> { %758 = vst [vmem:[%s5273_s14 + $0x10] sm:$0xff] %v757_v50  ;;  %v763_v53 = vld [vmem:[%s5277_s30 + $0x28] sm:$0xff]  ;;  %760 = vst [vmem:[%s5273_s14 + $0x18] sm:$0xff] %v759_v51  ;;  %v765_v54 = vld [vmem:[%s5277_s30 + $0x30] sm:$0xff] }
 0x107   : >> { %762 = vst [vmem:[%s5273_s14 + $0x20] sm:$0xff] %v761_v52  ;;  %764 = vst [vmem:[%s5273_s14 + $0x28] sm:$0xff] %v763_v53  ;;  %v767_v55 = vld [vmem:[%s5277_s30 + $0x38] sm:$0xff]  ;;  %v769_v56 = vld [vmem:[%s5277_s30 + $0x40] sm:$0xff]  ;;  %s8409_s6 = smov (%p898_p7, %s897_s6), 0 }
 0x108   : >> { %766 = vst [vmem:[%s5273_s14 + $0x30] sm:$0xff] %v765_v54  ;;  %768 = vst [vmem:[%s5273_s14 + $0x38] sm:$0xff] %v767_v55  ;;  %v771_v57 = vld [vmem:[%s5277_s30 + $0x48] sm:$0xff]  ;;  %v773_v58 = vld [vmem:[%s5277_s30 + $0x50] sm:$0xff]  ;;  %s900_s8 = smul.u32 192, %s8409_s6  ;;  %s8363_s10 = smov %s8409_s6 }
 0x109   : >> { %770 = vst [vmem:[%s5273_s14 + $0x40] sm:$0xff] %v769_v56  ;;  %v775_v59 = vld [vmem:[%s5277_s30 + $0x58] sm:$0xff]  ;;  %772 = vst [vmem:[%s5273_s14 + $0x48] sm:$0xff] %v771_v57  ;;  %v777_v60 = vld [vmem:[%s5277_s30 + $0x60] sm:$0xff] }
 0x10a   : >> { %774 = vst [vmem:[%s5273_s14 + $0x50] sm:$0xff] %v773_v58  ;;  %776 = vst [vmem:[%s5273_s14 + $0x58] sm:$0xff] %v775_v59  ;;  %v801_v61 = vld [vmem:[%s5277_s30 + $0xc8] sm:$0xff]  ;;  %v803_v62 = vld [vmem:[%s5277_s30 + $0xd0] sm:$0xff]  ;;  %s5995_s20 = scalar_lea.vmem %s5892_s16, %s900_s8   ;;  %s5998_s17 = scalar_lea.vmem %s5896_s28, %s900_s8 [#allocation3]  }
 0x10b   : >> { %778 = vst [vmem:[%s5273_s14 + $0x60] sm:$0xff] %v777_v60  ;;  %802 = vst [vmem:[%s5273_s14 + $0x68] sm:$0xff] %v801_v61  ;;  %v805_v63 = vld [vmem:[%s5277_s30 + $0xd8] sm:$0xff]  ;;  %v807_v0 = vld [vmem:[%s5277_s30 + $0xe0] sm:$0xff] }
 0x10c   : >> { %804 = vst [vmem:[%s5273_s14 + $0x70] sm:$0xff] %v803_v62  ;;  %v809_v1 = vld [vmem:[%s5277_s30 + $0xe8] sm:$0xff]  ;;  %806 = vst [vmem:[%s5273_s14 + $0x78] sm:$0xff] %v805_v63  ;;  %v811_v2 = vld [vmem:[%s5277_s30 + $0xf0] sm:$0xff] }
 0x10d   : >> { %808 = vst [vmem:[%s5273_s14 + $0x80] sm:$0xff] %v807_v0  ;;  %810 = vst [vmem:[%s5273_s14 + $0x88] sm:$0xff] %v809_v1  ;;  %v813_v3 = vld [vmem:[%s5277_s30 + $0xf8] sm:$0xff]  ;;  %v815_v4 = vld [vmem:[%s5277_s30 + $0x100] sm:$0xff] }
 0x10e   : >> { %812 = vst [vmem:[%s5273_s14 + $0x90] sm:$0xff] %v811_v2  ;;  %814 = vst [vmem:[%s5273_s14 + $0x98] sm:$0xff] %v813_v3  ;;  %v817_v5 = vld [vmem:[%s5277_s30 + $0x108] sm:$0xff]  ;;  %v819_v6 = vld [vmem:[%s5277_s30 + $0x110] sm:$0xff] }
 0x10f   : >> { %816 = vst [vmem:[%s5273_s14 + $0xa0] sm:$0xff] %v815_v4  ;;  %v821_v7 = vld [vmem:[%s5277_s30 + $0x118] sm:$0xff]  ;;  %818 = vst [vmem:[%s5273_s14 + $0xa8] sm:$0xff] %v817_v5  ;;  %v823_v8 = vld [vmem:[%s5277_s30 + $0x120] sm:$0xff] }
 0x110   : >> { %820 = vst [vmem:[%s5273_s14 + $0xb0] sm:$0xff] %v819_v6  ;;  %822 = vst [vmem:[%s5273_s14 + $0xb8] sm:$0xff] %v821_v7  ;;  %v825_v9 = vld [vmem:[%s5277_s30 + $0x128] sm:$0xff]  ;;  %v849_v10 = vld [vmem:[%s5277_s30 + $0x190] sm:$0xff] }
 0x111   : >> { %824 = vst [vmem:[%s5273_s14 + $0xc0] sm:$0xff] %v823_v8  ;;  %826 = vst [vmem:[%s5273_s14 + $0xc8] sm:$0xff] %v825_v9  ;;  %v851_v11 = vld [vmem:[%s5277_s30 + $0x198] sm:$0xff]  ;;  %v853_v12 = vld [vmem:[%s5277_s30 + $0x1a0] sm:$0xff] }
 0x112   : >> { %850 = vst [vmem:[%s5273_s14 + $0xd0] sm:$0xff] %v849_v10  ;;  %v855_v13 = vld [vmem:[%s5277_s30 + $0x1a8] sm:$0xff]  ;;  %852 = vst [vmem:[%s5273_s14 + $0xd8] sm:$0xff] %v851_v11  ;;  %v857_v14 = vld [vmem:[%s5277_s30 + $0x1b0] sm:$0xff] }
 0x113   : >> { %854 = vst [vmem:[%s5273_s14 + $0xe0] sm:$0xff] %v853_v12  ;;  %856 = vst [vmem:[%s5273_s14 + $0xe8] sm:$0xff] %v855_v13  ;;  %v859_v15 = vld [vmem:[%s5277_s30 + $0x1b8] sm:$0xff]  ;;  %v861_v16 = vld [vmem:[%s5277_s30 + $0x1c0] sm:$0xff] }
 0x114   : >> { %858 = vst [vmem:[%s5273_s14 + $0xf0] sm:$0xff] %v857_v14  ;;  %860 = vst [vmem:[%s5273_s14 + $0xf8] sm:$0xff] %v859_v15  ;;  %v863_v17 = vld [vmem:[%s5277_s30 + $0x1c8] sm:$0xff]  ;;  %v865_v18 = vld [vmem:[%s5277_s30 + $0x1d0] sm:$0xff] }
 0x115   : >> { %862 = vst [vmem:[%s5273_s14 + $0x100] sm:$0xff] %v861_v16  ;;  %v867_v19 = vld [vmem:[%s5277_s30 + $0x1d8] sm:$0xff]  ;;  %864 = vst [vmem:[%s5273_s14 + $0x108] sm:$0xff] %v863_v17  ;;  %v869_v20 = vld [vmem:[%s5277_s30 + $0x1e0] sm:$0xff] }
 0x116   : >> { %866 = vst [vmem:[%s5273_s14 + $0x110] sm:$0xff] %v865_v18  ;;  %868 = vst [vmem:[%s5273_s14 + $0x118] sm:$0xff] %v867_v19  ;;  %v871_v21 = vld [vmem:[%s5277_s30 + $0x1e8] sm:$0xff]  ;;  %v873_v22 = vld [vmem:[%s5277_s30 + $0x1f0] sm:$0xff] }
 0x117   : >> { %870 = vst [vmem:[%s5273_s14 + $0x120] sm:$0xff] %v869_v20  ;;  %872 = vst [vmem:[%s5273_s14 + $0x128] sm:$0xff] %v871_v21  ;;  %v875_v23 = vld [vmem:[%s5277_s30 + $0x1f8] sm:$0xff]  ;;  %v877_v24 = vld [vmem:[%s5277_s30 + $0x200] sm:$0xff]  ;;  %749 = sbr.rel (!%p746_p8) target bundleno = 260 (0x104), region = 383 }
 0x118   : >> { %874 = vst [vmem:[%s5273_s14 + $0x130] sm:$0xff] %v873_v22  ;;  %v879_v25 = vld [vmem:[%s5277_s30 + $0x208] sm:$0xff]  ;;  %876 = vst [vmem:[%s5273_s14 + $0x138] sm:$0xff] %v875_v23  ;;  %v881_v26 = vld [vmem:[%s5277_s30 + $0x210] sm:$0xff] }
 0x119   : >> { %878 = vst [vmem:[%s5273_s14 + $0x140] sm:$0xff] %v877_v24  ;;  %880 = vst [vmem:[%s5273_s14 + $0x148] sm:$0xff] %v879_v25  ;;  %v883_v27 = vld [vmem:[%s5277_s30 + $0x218] sm:$0xff]  ;;  %v885_v28 = vld [vmem:[%s5277_s30 + $0x220] sm:$0xff] }
 0x11a   : >> { %882 = vst [vmem:[%s5273_s14 + $0x150] sm:$0xff] %v881_v26  ;;  %884 = vst [vmem:[%s5273_s14 + $0x158] sm:$0xff] %v883_v27  ;;  %v887_v29 = vld [vmem:[%s5277_s30 + $0x228] sm:$0xff]  ;;  %v889_v30 = vld [vmem:[%s5277_s30 + $0x230] sm:$0xff] }
 0x11b   : >> { %886 = vst [vmem:[%s5273_s14 + $0x160] sm:$0xff] %v885_v28  ;;  %v891_v31 = vld [vmem:[%s5277_s30 + $0x238] sm:$0xff]  ;;  %888 = vst [vmem:[%s5273_s14 + $0x168] sm:$0xff] %v887_v29  ;;  %v893_v32 = vld [vmem:[%s5277_s30 + $0x240] sm:$0xff] }
 0x11c   : >> { %890 = vst [vmem:[%s5273_s14 + $0x170] sm:$0xff] %v889_v30  ;;  %892 = vst [vmem:[%s5273_s14 + $0x178] sm:$0xff] %v891_v31  ;;  %v895_v33 = vld [vmem:[%s5277_s30 + $0x248] sm:$0xff]  ;;  %s8362_s30 = smov %s5995_s20 }
 0x11d   : >> { %894 = vst [vmem:[%s5273_s14 + $0x180] sm:$0xff] %v893_v32  ;;  %896 = vst [vmem:[%s5273_s14 + $0x188] sm:$0xff] %v895_v33  ;;  %s8361_s14 = smov %s5998_s17 }
 0x11e PF: > { %4961 = sdivrem.u32 %s739_s15, 24 }
 0x11f   : > { %s4253_s13 = smul.u32 3072, %s5907_s9 }
 0x121   : > { %s908_s12 = sshra.s32 %s4253_s13, 4 }
 0x122   : > { %s6060_s18 = scalar_lea.vmem %s5892_s16, %s908_s12   ;;  %s6063_s11 = scalar_lea.vmem %s5896_s28, %s908_s12 [#allocation3]  }
 0x127   : > { %s6065_s29 = spop.drf %4961 }
 0x128   : > { %p4255_p9 = scmp.le.s32.totalorder %s6065_s29, 0 }
 0x129   : > { %s8364_s19 = smov (!%p4255_p9), %s6063_s11  ;;  %s5291_s14 = smov (!%p4255_p9), %s6060_s18  }
 0x12a   : > { %4097 = sbr.rel (%p4255_p9) target bundleno = 315 (0x13b), region = 388  ;;  %s5295_s30 = smov (!%p4255_p9), 0  }
 0x12b   : > { %s5299_s10 = smov (!%p4255_p9), 0  }
 0x131 LB: >> { %v924_v34 = vld [vmem:[%s5293_s14] sm:$0xff]  ;;  %v926_v35 = vld [vmem:[%s5293_s14 + $0xc8] sm:$0xff]  ;;  %v928_v36 = vld [vmem:[%s5293_s14 + $0x190] sm:$0xff]  ;;  %s930_s15 = sadd.s32 1, %s5297_s30  ;;  %s918_s10 = sadd.s32 1, %s5301_s10   ;;  %s5301_s10 = sphi %s5299_s10, %s918_s10   ;;  %s5297_s30 = sphi %s5295_s30, %s5296_s30   ;;  %s5293_s14 = sphi %s5291_s14, %s935_s14   ;;  %s5289_s19 = sphi %s8364_s19, %s936_s19  }
 0x132   : >> { %925 = vst [vmem:[%s5289_s19] sm:$0xff] %v924_v34  ;;  %927 = vst [vmem:[%s5289_s19 + $0x68] sm:$0xff] %v926_v35  ;;  %p931_p10 = scmp.ge.s32.totalorder %s930_s15, %s6065_s29  ;;  %p917_p11 = scmp.ge.s32.totalorder %s918_s10, %s6065_s29 }
 0x133   : >> { %929 = vst [vmem:[%s5289_s19 + $0xd0] sm:$0xff] %v928_v36 }
 0x134   : >> { %s8411_s15 = smov (%p931_p10, %s930_s15), 0  ;;  %920 = sbr.rel (!%p917_p11) target bundleno = 305 (0x131), region = 394 }
 0x135   : >> { %s4256_s9 = sshll.u32 %s8411_s15, 3  ;;  %s5296_s30 = smov %s8411_s15  }
 0x136   : >> { %s935_s14 = scalar_lea.vmem %s6060_s18, %s4256_s9   ;;  %s936_s19 = scalar_lea.vmem %s6063_s11, %s4256_s9 [#allocation3]  }
 0x13b PF: > { %939 = sbr.rel (%p735_p2) target bundleno = 397 (0x18d), region = 143  ;;  %s941_s27 = ssub.s32 (!%p735_p2), %s5894_s1, %s5900_s26 }
 0x13c   : > { %s945_s6 = sshrl.u32 (!%p735_p2), %s5894_s1, 3  ;;  %s6085_s8 = scalar_lea.vmem (!%p735_p2), %s5892_s16, %s941_s27 }
 0x13d   : > { %s6088_s20 = scalar_lea.vmem (!%p735_p2), %s5896_s28, %s941_s27 [#allocation3]  ;;  %4963 = sdivrem.u32 (!%p735_p2), %s945_s6, 24 }
 0x146   : > { %s6092_s17 = spop.drf %4963 }
 0x147   : > { %p4258_p12 = scmp.le.s32.totalorder %s6092_s17, 0 }
 0x148   : > { %s8365_s13 = smov (!%p4258_p12), %s5896_s28  ;;  %s8366_s12 = smov (!%p4258_p12), %s5892_s16 }
 0x149   : > { %4111 = sbr.rel (%p4258_p12) target bundleno = 362 (0x16a), region = 399  ;;  %s6101_s18 = smov (!%p4258_p12), 0  }
 0x14a   : > { %s6103_s11 = smov (!%p4258_p12), 0  }
 0x150 LB: >> { %v959_v37 = vld [vmem:[%s5309_s12] sm:$0xff]  ;;  %v961_v38 = vld [vmem:[%s5309_s12 + $0x8] sm:$0xff]  ;;  %v963_v39 = vld [vmem:[%s5309_s12 + $0x10] sm:$0xff]  ;;  %s1103_s29 = sadd.s32 1, %s5313_s18  ;;  %s953_s11 = sadd.s32 1, %s5317_s11   ;;  %s5317_s11 = sphi %s6103_s11, %s953_s11   ;;  %s5313_s18 = sphi %s6101_s18, %s8369_s18   ;;  %s5309_s12 = sphi %s8366_s12, %s8368_s12   ;;  %s5305_s13 = sphi %s8365_s13, %s8367_s13  }
 0x151   : >> { %960 = vst [vmem:[%s5305_s13] sm:$0xff] %v959_v37  ;;  %962 = vst [vmem:[%s5305_s13 + $0x8] sm:$0xff] %v961_v38  ;;  %v965_v40 = vld [vmem:[%s5309_s12 + $0x18] sm:$0xff]  ;;  %v967_v41 = vld [vmem:[%s5309_s12 + $0x20] sm:$0xff]  ;;  %p1104_p13 = scmp.ge.s32.totalorder %s1103_s29, %s6092_s17  ;;  %p952_p0 = scmp.ge.s32.totalorder %s953_s11, %s6092_s17 }
 0x152   : >> { %964 = vst [vmem:[%s5305_s13 + $0x10] sm:$0xff] %v963_v39  ;;  %v969_v42 = vld [vmem:[%s5309_s12 + $0x28] sm:$0xff]  ;;  %966 = vst [vmem:[%s5305_s13 + $0x18] sm:$0xff] %v965_v40  ;;  %v971_v43 = vld [vmem:[%s5309_s12 + $0x30] sm:$0xff] }
 0x153   : >> { %968 = vst [vmem:[%s5305_s13 + $0x20] sm:$0xff] %v967_v41  ;;  %970 = vst [vmem:[%s5305_s13 + $0x28] sm:$0xff] %v969_v42  ;;  %v973_v44 = vld [vmem:[%s5309_s12 + $0x38] sm:$0xff]  ;;  %v975_v45 = vld [vmem:[%s5309_s12 + $0x40] sm:$0xff]  ;;  %s8413_s29 = smov (%p1104_p13, %s1103_s29), 0 }
 0x154   : >> { %972 = vst [vmem:[%s5305_s13 + $0x30] sm:$0xff] %v971_v43  ;;  %974 = vst [vmem:[%s5305_s13 + $0x38] sm:$0xff] %v973_v44  ;;  %v977_v46 = vld [vmem:[%s5309_s12 + $0x48] sm:$0xff]  ;;  %v979_v47 = vld [vmem:[%s5309_s12 + $0x50] sm:$0xff]  ;;  %s1106_s19 = smul.u32 192, %s8413_s29  ;;  %s8369_s18 = smov %s8413_s29 }
 0x155   : >> { %976 = vst [vmem:[%s5305_s13 + $0x40] sm:$0xff] %v975_v45  ;;  %v981_v48 = vld [vmem:[%s5309_s12 + $0x58] sm:$0xff]  ;;  %978 = vst [vmem:[%s5305_s13 + $0x48] sm:$0xff] %v977_v46  ;;  %v983_v49 = vld [vmem:[%s5309_s12 + $0x60] sm:$0xff] }
 0x156   : >> { %980 = vst [vmem:[%s5305_s13 + $0x50] sm:$0xff] %v979_v47  ;;  %982 = vst [vmem:[%s5305_s13 + $0x58] sm:$0xff] %v981_v48  ;;  %v1007_v50 = vld [vmem:[%s5309_s12 + $0xc8] sm:$0xff]  ;;  %v1009_v51 = vld [vmem:[%s5309_s12 + $0xd0] sm:$0xff]  ;;  %s6180_s14 = scalar_lea.vmem %s5892_s16, %s1106_s19   ;;  %s6183_s30 = scalar_lea.vmem %s5896_s28, %s1106_s19 [#allocation3]  }
 0x157   : >> { %984 = vst [vmem:[%s5305_s13 + $0x60] sm:$0xff] %v983_v49  ;;  %1008 = vst [vmem:[%s5305_s13 + $0x68] sm:$0xff] %v1007_v50  ;;  %v1011_v52 = vld [vmem:[%s5309_s12 + $0xd8] sm:$0xff]  ;;  %v1013_v53 = vld [vmem:[%s5309_s12 + $0xe0] sm:$0xff] }
 0x158   : >> { %1010 = vst [vmem:[%s5305_s13 + $0x70] sm:$0xff] %v1009_v51  ;;  %v1015_v54 = vld [vmem:[%s5309_s12 + $0xe8] sm:$0xff]  ;;  %1012 = vst [vmem:[%s5305_s13 + $0x78] sm:$0xff] %v1011_v52  ;;  %v1017_v55 = vld [vmem:[%s5309_s12 + $0xf0] sm:$0xff] }
 0x159   : >> { %1014 = vst [vmem:[%s5305_s13 + $0x80] sm:$0xff] %v1013_v53  ;;  %1016 = vst [vmem:[%s5305_s13 + $0x88] sm:$0xff] %v1015_v54  ;;  %v1019_v56 = vld [vmem:[%s5309_s12 + $0xf8] sm:$0xff]  ;;  %v1021_v57 = vld [vmem:[%s5309_s12 + $0x100] sm:$0xff] }
 0x15a   : >> { %1018 = vst [vmem:[%s5305_s13 + $0x90] sm:$0xff] %v1017_v55  ;;  %1020 = vst [vmem:[%s5305_s13 + $0x98] sm:$0xff] %v1019_v56  ;;  %v1023_v58 = vld [vmem:[%s5309_s12 + $0x108] sm:$0xff]  ;;  %v1025_v59 = vld [vmem:[%s5309_s12 + $0x110] sm:$0xff] }
 0x15b   : >> { %1022 = vst [vmem:[%s5305_s13 + $0xa0] sm:$0xff] %v1021_v57  ;;  %v1027_v60 = vld [vmem:[%s5309_s12 + $0x118] sm:$0xff]  ;;  %1024 = vst [vmem:[%s5305_s13 + $0xa8] sm:$0xff] %v1023_v58  ;;  %v1029_v61 = vld [vmem:[%s5309_s12 + $0x120] sm:$0xff] }
 0x15c   : >> { %1026 = vst [vmem:[%s5305_s13 + $0xb0] sm:$0xff] %v1025_v59  ;;  %1028 = vst [vmem:[%s5305_s13 + $0xb8] sm:$0xff] %v1027_v60  ;;  %v1031_v62 = vld [vmem:[%s5309_s12 + $0x128] sm:$0xff]  ;;  %v1055_v63 = vld [vmem:[%s5309_s12 + $0x190] sm:$0xff] }
 0x15d   : >> { %1030 = vst [vmem:[%s5305_s13 + $0xc0] sm:$0xff] %v1029_v61  ;;  %1032 = vst [vmem:[%s5305_s13 + $0xc8] sm:$0xff] %v1031_v62  ;;  %v1057_v0 = vld [vmem:[%s5309_s12 + $0x198] sm:$0xff]  ;;  %v1059_v1 = vld [vmem:[%s5309_s12 + $0x1a0] sm:$0xff] }
 0x15e   : >> { %1056 = vst [vmem:[%s5305_s13 + $0xd0] sm:$0xff] %v1055_v63  ;;  %v1061_v2 = vld [vmem:[%s5309_s12 + $0x1a8] sm:$0xff]  ;;  %1058 = vst [vmem:[%s5305_s13 + $0xd8] sm:$0xff] %v1057_v0  ;;  %v1063_v3 = vld [vmem:[%s5309_s12 + $0x1b0] sm:$0xff] }
 0x15f   : >> { %1060 = vst [vmem:[%s5305_s13 + $0xe0] sm:$0xff] %v1059_v1  ;;  %1062 = vst [vmem:[%s5305_s13 + $0xe8] sm:$0xff] %v1061_v2  ;;  %v1065_v4 = vld [vmem:[%s5309_s12 + $0x1b8] sm:$0xff]  ;;  %v1067_v5 = vld [vmem:[%s5309_s12 + $0x1c0] sm:$0xff] }
 0x160   : >> { %1064 = vst [vmem:[%s5305_s13 + $0xf0] sm:$0xff] %v1063_v3  ;;  %1066 = vst [vmem:[%s5305_s13 + $0xf8] sm:$0xff] %v1065_v4  ;;  %v1069_v6 = vld [vmem:[%s5309_s12 + $0x1c8] sm:$0xff]  ;;  %v1071_v7 = vld [vmem:[%s5309_s12 + $0x1d0] sm:$0xff] }
 0x161   : >> { %1068 = vst [vmem:[%s5305_s13 + $0x100] sm:$0xff] %v1067_v5  ;;  %v1073_v8 = vld [vmem:[%s5309_s12 + $0x1d8] sm:$0xff]  ;;  %1070 = vst [vmem:[%s5305_s13 + $0x108] sm:$0xff] %v1069_v6  ;;  %v1075_v9 = vld [vmem:[%s5309_s12 + $0x1e0] sm:$0xff] }
 0x162   : >> { %1072 = vst [vmem:[%s5305_s13 + $0x110] sm:$0xff] %v1071_v7  ;;  %1074 = vst [vmem:[%s5305_s13 + $0x118] sm:$0xff] %v1073_v8  ;;  %v1077_v10 = vld [vmem:[%s5309_s12 + $0x1e8] sm:$0xff]  ;;  %v1079_v11 = vld [vmem:[%s5309_s12 + $0x1f0] sm:$0xff] }
 0x163   : >> { %1076 = vst [vmem:[%s5305_s13 + $0x120] sm:$0xff] %v1075_v9  ;;  %1078 = vst [vmem:[%s5305_s13 + $0x128] sm:$0xff] %v1077_v10  ;;  %v1081_v12 = vld [vmem:[%s5309_s12 + $0x1f8] sm:$0xff]  ;;  %v1083_v13 = vld [vmem:[%s5309_s12 + $0x200] sm:$0xff]  ;;  %955 = sbr.rel (!%p952_p0) target bundleno = 336 (0x150), region = 405 }
 0x164   : >> { %1080 = vst [vmem:[%s5305_s13 + $0x130] sm:$0xff] %v1079_v11  ;;  %v1085_v14 = vld [vmem:[%s5309_s12 + $0x208] sm:$0xff]  ;;  %1082 = vst [vmem:[%s5305_s13 + $0x138] sm:$0xff] %v1081_v12  ;;  %v1087_v15 = vld [vmem:[%s5309_s12 + $0x210] sm:$0xff] }
 0x165   : >> { %1084 = vst [vmem:[%s5305_s13 + $0x140] sm:$0xff] %v1083_v13  ;;  %1086 = vst [vmem:[%s5305_s13 + $0x148] sm:$0xff] %v1085_v14  ;;  %v1089_v16 = vld [vmem:[%s5309_s12 + $0x218] sm:$0xff]  ;;  %v1091_v17 = vld [vmem:[%s5309_s12 + $0x220] sm:$0xff] }
 0x166   : >> { %1088 = vst [vmem:[%s5305_s13 + $0x150] sm:$0xff] %v1087_v15  ;;  %1090 = vst [vmem:[%s5305_s13 + $0x158] sm:$0xff] %v1089_v16  ;;  %v1093_v18 = vld [vmem:[%s5309_s12 + $0x228] sm:$0xff]  ;;  %v1095_v19 = vld [vmem:[%s5309_s12 + $0x230] sm:$0xff] }
 0x167   : >> { %1092 = vst [vmem:[%s5305_s13 + $0x160] sm:$0xff] %v1091_v17  ;;  %v1097_v20 = vld [vmem:[%s5309_s12 + $0x238] sm:$0xff]  ;;  %1094 = vst [vmem:[%s5305_s13 + $0x168] sm:$0xff] %v1093_v18  ;;  %v1099_v21 = vld [vmem:[%s5309_s12 + $0x240] sm:$0xff] }
 0x168   : >> { %1096 = vst [vmem:[%s5305_s13 + $0x170] sm:$0xff] %v1095_v19  ;;  %1098 = vst [vmem:[%s5305_s13 + $0x178] sm:$0xff] %v1097_v20  ;;  %v1101_v22 = vld [vmem:[%s5309_s12 + $0x248] sm:$0xff]  ;;  %s8368_s12 = smov %s6180_s14 }
 0x169   : >> { %1100 = vst [vmem:[%s5305_s13 + $0x180] sm:$0xff] %v1099_v21  ;;  %1102 = vst [vmem:[%s5305_s13 + $0x188] sm:$0xff] %v1101_v22  ;;  %s8367_s13 = smov %s6183_s30 }
 0x16a PF: > { %4965 = sdivrem.u32 %s945_s6, 24 }
 0x16b   : > { %s4259_s10 = smul.u32 3072, %s6092_s17 }
 0x16d   : > { %s1114_s15 = sshra.s32 %s4259_s10, 4 }
 0x16e   : > { %s6245_s9 = scalar_lea.vmem %s5892_s16, %s1114_s15   ;;  %s6248_s27 = scalar_lea.vmem %s5896_s28, %s1114_s15 [#allocation3]  }
 0x173   : > { %s6250_s19 = spop.drf %4965 }
 0x174   : > { %p4261_p3 = scmp.le.s32.totalorder %s6250_s19, 0 }
 0x175   : > { %s8370_s13 = smov (!%p4261_p3), %s6248_s27  ;;  %s5323_s12 = smov (!%p4261_p3), %s6245_s9  }
 0x176   : > { %4125 = sbr.rel (%p4261_p3) target bundleno = 391 (0x187), region = 410  ;;  %s5327_s18 = smov (!%p4261_p3), 0  }
 0x177   : > { %s5331_s11 = smov (!%p4261_p3), 0  }
 0x17d LB: >> { %v1130_v23 = vld [vmem:[%s5325_s12] sm:$0xff]  ;;  %v1132_v24 = vld [vmem:[%s5325_s12 + $0xc8] sm:$0xff]  ;;  %v1134_v25 = vld [vmem:[%s5325_s12 + $0x190] sm:$0xff]  ;;  %s1136_s6 = sadd.s32 1, %s5329_s18  ;;  %s1124_s11 = sadd.s32 1, %s5333_s11   ;;  %s5333_s11 = sphi %s5331_s11, %s1124_s11   ;;  %s5329_s18 = sphi %s5327_s18, %s5328_s18   ;;  %s5325_s12 = sphi %s5323_s12, %s1141_s12   ;;  %s5321_s13 = sphi %s8370_s13, %s1142_s13  }
 0x17e   : >> { %1131 = vst [vmem:[%s5321_s13] sm:$0xff] %v1130_v23  ;;  %1133 = vst [vmem:[%s5321_s13 + $0x68] sm:$0xff] %v1132_v24  ;;  %p1137_p1 = scmp.ge.s32.totalorder %s1136_s6, %s6250_s19  ;;  %p1123_p2 = scmp.ge.s32.totalorder %s1124_s11, %s6250_s19 }
 0x17f   : >> { %1135 = vst [vmem:[%s5321_s13 + $0xd0] sm:$0xff] %v1134_v25 }
 0x180   : >> { %s8415_s6 = smov (%p1137_p1, %s1136_s6), 0  ;;  %1126 = sbr.rel (!%p1123_p2) target bundleno = 381 (0x17d), region = 416 }
 0x181   : >> { %s4262_s17 = sshll.u32 %s8415_s6, 3  ;;  %s5328_s18 = smov %s8415_s6  }
 0x182   : >> { %s1141_s12 = scalar_lea.vmem %s6245_s9, %s4262_s17   ;;  %s1142_s13 = scalar_lea.vmem %s6248_s27, %s4262_s17 [#allocation3]  }
 0x187 PF: > { %s5401_s29 = smov 0  }
 0x188   : > { %s1143_s14 = sshllo.u32 %s5401_s29, %s5900_s26 }
 0x189   : > { %v1152_v26 = vld [vmem:[%s6085_s8] sm:%s1143_s14]  ;;  %v1154_v27 = vld [vmem:[%s6085_s8 + $0xc8] sm:%s1143_s14] }
 0x18a   : > { %1153 = vst [vmem:[%s6088_s20] sm:%s1143_s14] %v1152_v26  ;;  %1155 = vst [vmem:[%s6088_s20 + $0x68] sm:%s1143_s14] %v1154_v27 }
 0x18b   : > { %v1156_v28 = vld [vmem:[%s6085_s8 + $0x190] sm:%s1143_s14] }
 0x18c   : > { %1157 = vst [vmem:[%s6088_s20 + $0xd0] sm:%s1143_s14] %v1156_v28 }
 0x18d PF: > { %p4264_p4 = scmp.ge.u32.totalorder %s5894_s1, 8 }
 0x18e   : > { %s5402_s30 = smov (!%p4264_p4), 0  }
 0x18f   : > { %718 = sbr.rel (%p4264_p4) target bundleno = 406 (0x196), region = 114  ;;  %s719_s26 = sshllo.u32 (!%p4264_p4), %s5402_s30, %s5894_s1 }
 0x190   : > { %v728_v29 = vld [vmem:[%s5892_s16] sm:%s719_s26] (!%p4264_p4)  ;;  %v730_v30 = vld [vmem:[%s5892_s16 + $0xc8] sm:%s719_s26] (!%p4264_p4) }
 0x191   : > { %729 = vst [vmem:[%s5896_s28] sm:%s719_s26] (!%p4264_p4), %v728_v29  ;;  %731 = vst [vmem:[%s5896_s28 + $0x68] sm:%s719_s26] (!%p4264_p4), %v730_v30 }
 0x192   : > { %v732_v31 = vld [vmem:[%s5892_s16 + $0x190] sm:%s719_s26] (!%p4264_p4) }
 0x193   : > { %733 = vst [vmem:[%s5896_s28 + $0xd0] sm:%s719_s26] (!%p4264_p4), %v732_v31 }
 0x196 PF: > { %p4265_p5 = scmp.ge.s32.totalorder %s5205_s25, 1  ;;  %p1160_p7 = scmp.lt.s32.totalorder %s5205_s25, 3 }
 0x198   : > { %p1161_p8 = pnand %p4265_p5, %p1160_p7 }
 0x199   : > { %v1221_v32 = vld [vmem:[%s8332_s0] sm:$0xff] (!%p1161_p8)  ;;  %v1222_v33 = vld [vmem:[%s8332_s0 + $0x8] sm:$0xff] (!%p1161_p8)  ;;  %v1223_v34 = vld [vmem:[%s8332_s0 + $0x10] sm:$0xff] (!%p1161_p8)  ;;  %vm1319_vm0 = vcmask (!%p1161_p8), 523264   ;;  %s1167_s1 = sand.u32 (!%p1161_p8), 1, %s5189_s21   ;;  %vm1819_vm1 = vcmask (!%p1161_p8), 195584  }
 0x19a   : > { %1164 = sbr.rel (%p1161_p8) target bundleno = 1443 (0x5a3), region = 168  ;;  %v1224_v35 = vld [vmem:[%s8332_s0 + $0x18] sm:$0xff] (!%p1161_p8)  ;;  %v1296_v36 = vadd.f32 (!%p1161_p8), %v1222_v33, %v1221_v32  ;;  %v1381_v37 = vmul.f32 (!%p1161_p8), %v1221_v32, %v1221_v32  ;;  %v1382_v38 = vmul.f32 (!%p1161_p8), %v1222_v33, %v1222_v33  ;;  %v1383_v39 = vmul.f32 (!%p1161_p8), %v1223_v34, %v1223_v34  ;;  %v1225_v40 = vld [vmem:[%s8332_s0 + $0x20] sm:$0xff] (!%p1161_p8)  ;;  %v1226_v44 = vld [vmem:[%s8332_s0 + $0x28] sm:$0xff] (!%p1161_p8) }
 0x19b   : > { %v1384_v42 = vmul.f32 (!%p1161_p8), %v1224_v35, %v1224_v35  ;;  %v1385_v46 = vmul.f32 (!%p1161_p8), %v1225_v40, %v1225_v40  ;;  %v1227_v48 = vld [vmem:[%s8332_s0 + $0x30] sm:$0xff] (!%p1161_p8)  ;;  %v1386_v50 = vmul.f32 (!%p1161_p8), %v1226_v44, %v1226_v44  ;;  %v1246_v52 = vld [vmem:[%s8332_s0 + $0xc8] sm:$0xff] (!%p1161_p8)  ;;  %v1228_v54 = vld [vmem:[%s8332_s0 + $0x38] sm:$0xff] (!%p1161_p8)  ;;  %s4513_s10 = smul.u32 (!%p1161_p8), 312, %s1167_s1 }
 0x19c   : > { %v1297_v41 = vadd.f32 (!%p1161_p8), %v1296_v36, %v1223_v34  ;;  %v1456_v43 = vadd.f32 (!%p1161_p8), %v1382_v38, %v1381_v37  ;;  %v1247_v53 = vld [vmem:[%s8332_s0 + $0xd0] sm:$0xff] (!%p1161_p8)  ;;  %v1248_v56 = vld [vmem:[%s8332_s0 + $0xd8] sm:$0xff] (!%p1161_p8)  ;;  %v1387_v58 = vmul.f32 (!%p1161_p8), %v1227_v48, %v1227_v48  ;;  %v1249_v60 = vld [vmem:[%s8332_s0 + $0xe0] sm:$0xff] (!%p1161_p8)  ;;  %v1388_v0 = vmul.f32 (!%p1161_p8), %v1228_v54, %v1228_v54 }
 0x19d   : > { %v1324_v57 = vadd.f32 (!%p1161_p8), %v1247_v53, %v1246_v52  ;;  %v1229_v61 = vld [vmem:[%s8332_s0 + $0x40] sm:$0xff] (!%p1161_p8)  ;;  %v1250_v2 = vld [vmem:[%s8332_s0 + $0xe8] sm:$0xff] (!%p1161_p8)  ;;  %v1251_v8 = vld [vmem:[%s8332_s0 + $0xf0] sm:$0xff] (!%p1161_p8)  ;;  %v1406_v16 = vmul.f32 (!%p1161_p8), %v1246_v52, %v1246_v52  ;;  %v1407_v17 = vmul.f32 (!%p1161_p8), %v1247_v53, %v1247_v53  ;;  %v1408_v25 = vmul.f32 (!%p1161_p8), %v1248_v56, %v1248_v56  ;;  %s6676_s16 = scalar_lea.vmem (!%p1161_p8), [#allocation2], %s4513_s10  ;;  %s6681_s28 = scalar_lea.vmem (!%p1161_p8), [#allocation3], %s4513_s10 }
 0x19e   : > { %v1298_v45 = vadd.f32 (!%p1161_p8), %v1297_v41, %v1224_v35  ;;  %v1457_v47 = vadd.f32 (!%p1161_p8), %v1456_v43, %v1383_v39  ;;  %v1230_v3 = vld [vmem:[%s8332_s0 + $0x48] sm:$0xff] (!%p1161_p8)  ;;  %v1389_v6 = vmul.f32 (!%p1161_p8), %v1229_v61, %v1229_v61  ;;  %v1231_v9 = vld [vmem:[%s8332_s0 + $0x50] sm:$0xff] (!%p1161_p8)  ;;  %v1232_v12 = vld [vmem:[%s8332_s0 + $0x58] sm:$0xff] (!%p1161_p8)  ;;  %v1409_v36 = vmul.f32 (!%p1161_p8), %v1249_v60, %v1249_v60 }
 0x19f   : > { %v1325_v63 = vadd.f32 (!%p1161_p8), %v1324_v57, %v1248_v56  ;;  %v1390_v13 = vmul.f32 (!%p1161_p8), %v1230_v3, %v1230_v3  ;;  %v1252_v15 = vld [vmem:[%s8332_s0 + $0xf8] sm:$0xff] (!%p1161_p8)  ;;  %v1233_v18 = vld [vmem:[%s8332_s0 + $0x60] sm:$0xff] (!%p1161_p8)  ;;  %v1234_v19 = vld [vmem:[%s8332_s0 + $0x68] sm:$0xff] (!%p1161_p8)  ;;  %v1391_v22 = vmul.f32 (!%p1161_p8), %v1231_v9, %v1231_v9  ;;  %v1392_v30 = vmul.f32 (!%p1161_p8), %v1232_v12, %v1232_v12 }
 0x1a0   : > { %v1299_v49 = vadd.f32 (!%p1161_p8), %v1298_v45, %v1225_v40  ;;  %v1458_v51 = vadd.f32 (!%p1161_p8), %v1457_v47, %v1384_v42  ;;  %v1253_v24 = vld [vmem:[%s8332_s0 + $0x100] sm:$0xff] (!%p1161_p8)  ;;  %v6350_v26 = vld [vmem:[%s8332_s0 + $0x190] sm:$0xff] (!%p1161_p8)  ;;  %v6355_v27 = vld [vmem:[%s8332_s0 + $0x198] sm:$0xff] (!%p1161_p8)  ;;  %v1393_v33 = vmul.f32 (!%p1161_p8), %v1233_v18, %v1233_v18  ;;  %v1483_v37 = vadd.f32 (!%p1161_p8), %v1407_v17, %v1406_v16 }
 0x1a1   : > { %v1326_v5 = vadd.f32 %v1325_v63, %v1249_v60  ;;  %v1235_v28 = vld [vmem:[%s8332_s0 + $0x70] sm:$0xff]  ;;  %v1236_v32 = vld [vmem:[%s8332_s0 + $0x78] sm:$0xff]  ;;  %v1254_v35 = vld [vmem:[%s8332_s0 + $0x108] sm:$0xff]  ;;  %v1394_v41 = vmul.f32 %v1234_v19, %v1234_v19  ;;  %v1351_v43 = vadd.f32 %v6355_v27, %v6350_v26  ;;  %v1411_v60 = vmul.f32 %v1251_v8, %v1251_v8  ;;  %s4420_s15 = smul.u32 (%p5481_p6), 104, %s5197_s23  ;;  %s8371_s19 = sld [smem:[#allocation8_spill]] (%p5481_p6) }
 0x1a2   : > { %v1300_v55 = vadd.f32 %v1299_v49, %v1226_v44  ;;  %v1459_v59 = vadd.f32 %v1458_v51, %v1385_v46  ;;  %v6369_v38 = vld [vmem:[%s8332_s0 + $0x1a0] sm:$0xff]  ;;  %v6379_v44 = vld [vmem:[%s8332_s0 + $0x88] sm:$0xff]  ;;  %v1395_v45 = vmul.f32 %v1235_v28, %v1235_v28  ;;  %v1255_v47 = vld [vmem:[%s8332_s0 + $0x110] sm:$0xff]  ;;  %v1484_v49 = vadd.f32 %v1483_v37, %v1408_v25 }
 0x1a3   : > { %v1327_v11 = vadd.f32 %v1326_v5, %v1250_v2  ;;  %v1237_v39 = vld [vmem:[%s8332_s0 + $0x80] sm:$0xff]  ;;  %v6392_v51 = vld [vmem:[%s8332_s0 + $0x90] sm:$0xff]  ;;  %v1396_v53 = vmul.f32 %v1236_v32, %v1236_v32  ;;  %v6398_v56 = vld [vmem:[%s8332_s0 + $0x98] sm:$0xff] }
 0x1a4   : > { %v1301_v62 = vadd.f32 %v1300_v55, %v1227_v48  ;;  %v1460_v1 = vadd.f32 %v1459_v59, %v1386_v50  ;;  %v1410_v48 = vmul.f32 %v1250_v2, %v1250_v2  ;;  %v6387_v50 = vld [vmem:[%s8332_s0 + $0x1a8] sm:$0xff]  ;;  %v1352_v55 = vadd.f32 %v1351_v43, %v6369_v38  ;;  %v1256_v59 = vld [vmem:[%s8332_s0 + $0x118] sm:$0xff]  ;;  %v6411_v63 = vld [vmem:[%s8332_s0 + $0xa0] sm:$0xff] }
 0x1a5   : > { %v1328_v21 = vadd.f32 %v1327_v11, %v1251_v8  ;;  %v1397_v57 = vmul.f32 %v1237_v39, %v1237_v39  ;;  %v6423_v5 = vmul.f32 %v6392_v51, %v6392_v51  ;;  %v1412_v8 = vmul.f32 %v1252_v15, %v1252_v15  ;;  %v6436_v11 = vld [vmem:[%s8332_s0 + $0xb0] sm:$0xff] }
 0x1a6   : > { %v1302_v4 = vadd.f32 %v1301_v62, %v1228_v54  ;;  %v1461_v7 = vadd.f32 %v1460_v1, %v1387_v58  ;;  %v6406_v62 = vld [vmem:[%s8332_s0 + $0x1b0] sm:$0xff]  ;;  %v1398_v1 = vmul.f32 %v6379_v44, %v6379_v44  ;;  %v6450_v17 = vmul.f32 %v6411_v63, %v6411_v63 }
 0x1a7   : > { %v1329_v31 = vadd.f32 %v1328_v21, %v1252_v15  ;;  %v6446_v15 = vld [vmem:[%s8332_s0 + $0xb8] sm:$0xff]  ;;  %s7598_s13 = scalar_lea.vmem (%p5481_p6), %s8371_s19, %s4420_s15  }
 0x1a8   : > { %v1303_v10 = vadd.f32 %v1302_v4, %v1229_v61  ;;  %v1462_v14 = vadd.f32 %v1461_v7, %v1388_v0  ;;  %v1485_v61 = vadd.f32 %v1484_v49, %v1409_v36  ;;  %v6419_v4 = vld [vmem:[%s8332_s0 + $0xa8] sm:$0xff]  ;;  %v1257_v7 = vld [vmem:[%s8332_s0 + $0x120] sm:$0xff]  ;;  %v6491_v49 = vld [vmem:[%s8332_s0 + $0x1d0] sm:$0xff] }
 0x1a9   : > { %v1330_v42 = vadd.f32 %v1329_v31, %v1253_v24 }
 0x1aa   : > { %v1304_v20 = vadd.f32 %v1303_v10, %v1230_v3  ;;  %v1463_v23 = vadd.f32 %v1462_v14, %v1389_v6  ;;  %v1353_v3 = vadd.f32 %v1352_v55, %v6387_v50  ;;  %v6431_v10 = vld [vmem:[%s8332_s0 + $0x1b8] sm:$0xff] }
 0x1ab   : > { %v1331_v54 = vadd.f32 %v1330_v42, %v1254_v35 }
 0x1ac   : > { %v1305_v29 = vadd.f32 %v1304_v20, %v1231_v9  ;;  %v1464_v34 = vadd.f32 %v1463_v23, %v1390_v13  ;;  %v1486_v9 = vadd.f32 %v1485_v61, %v1410_v48  ;;  %v6440_v13 = vmul.f32 %v6398_v56, %v6398_v56  ;;  %v1245_v23 = vld [vmem:[%s8332_s0 + $0xc0] sm:$0xff]  ;;  %v6504_v61 = vld [vmem:[%s8332_s0 + $0x1d8] sm:$0xff] }
 0x1ad   : > { %v1332_v2 = vadd.f32 %v1331_v54, %v1255_v47  ;;  %v1354_v16 = vadd.f32 %v1353_v3, %v6406_v62  ;;  %v1413_v20 = vmul.f32 %v1253_v24, %v1253_v24  ;;  %v6470_v24 = vmul.f32 %v6436_v11, %v6436_v11 }
 0x1ae   : > { %v1306_v40 = vadd.f32 %v1305_v29, %v1232_v12  ;;  %v1465_v46 = vadd.f32 %v1464_v34, %v1391_v22  ;;  %v1487_v21 = vadd.f32 %v1486_v9, %v1411_v60  ;;  %v6458_v22 = vld [vmem:[%s8332_s0 + $0x1c0] sm:$0xff]  ;;  %v1414_v34 = vmul.f32 %v1254_v35, %v1254_v35  ;;  %v1260_v35 = vld [vmem:[%s8332_s0 + $0x138] sm:$0xff] }
 0x1af   : > { %v1333_v14 = vadd.f32 %v1332_v2, %v1256_v59  ;;  %v1405_v43 = vmul.f32 %v1245_v23, %v1245_v23  ;;  %v1417_v9 = vmul.f32 %v1257_v7, %v1257_v7 }
 0x1b0   : > { %v1307_v52 = vadd.f32 %v1306_v40, %v1233_v18  ;;  %v1466_v58 = vadd.f32 %v1465_v46, %v1392_v30  ;;  %v1355_v30 = vadd.f32 %v1354_v16, %v6431_v10  ;;  %v1488_v36 = vadd.f32 %v1487_v21, %v1412_v8  ;;  %v1262_v8 = vld [vmem:[%s8332_s0 + $0x148] sm:$0xff] }
 0x1b1   : > { %v1334_v29 = vadd.f32 %v1333_v14, %v1257_v7  ;;  %v6482_v40 = vmul.f32 %v6446_v15, %v6446_v15  ;;  %v1415_v46 = vmul.f32 %v1255_v47, %v1255_v47  ;;  %v1416_v47 = vmul.f32 %v1256_v59, %v1256_v59  ;;  %v1263_v7 = vld [vmem:[%s8332_s0 + $0x150] sm:$0xff]  ;;  %v6534_v21 = vld [vmem:[%s8332_s0 + $0x1e8] sm:$0xff] }
 0x1b2   : > { %v1308_v0 = vadd.f32 %v1307_v52, %v1234_v19  ;;  %v1467_v6 = vadd.f32 %v1466_v58, %v1393_v33  ;;  %v1258_v19 = vld [vmem:[%s8332_s0 + $0x128] sm:$0xff]  ;;  %v1259_v33 = vld [vmem:[%s8332_s0 + $0x130] sm:$0xff]  ;;  %v1356_v42 = vadd.f32 %v1355_v30, %v6458_v22  ;;  %v1489_v48 = vadd.f32 %v1488_v36, %v1413_v20  ;;  %v1261_v58 = vld [vmem:[%s8332_s0 + $0x140] sm:$0xff] }
 0x1b3   : > { %v6495_v52 = vsel %vm1319_vm0, %v1245_v23, 0.0  ;;  %v6513_v59 = vsel %vm1319_vm0, %v1405_v43, 0.0  ;;  %v1419_v30 = vmul.f32 %v1259_v33, %v1259_v33 }
 0x1b4   : > { %v1309_v12 = vadd.f32 %v1308_v0, %v1235_v28  ;;  %v1468_v18 = vadd.f32 %v1467_v6, %v1394_v41  ;;  %v6465_v28 = vmul.f32 %v6419_v4, %v6419_v4  ;;  %v1335_v41 = vadd.f32 %v1334_v29, %v1258_v19 }
 0x1b5   : > { %v1490_v60 = vadd.f32 %v1489_v48, %v1414_v34  ;;  %v6547_v34 = vld [vmem:[%s8332_s0 + $0x1f0] sm:$0xff] }
 0x1b6   : > { %v1310_v25 = vadd.f32 %v1309_v12, %v1236_v32  ;;  %v1469_v31 = vadd.f32 %v1468_v18, %v1395_v45  ;;  %v6478_v32 = vld [vmem:[%s8332_s0 + $0x1c8] sm:$0xff]  ;;  %v1336_v54 = vadd.f32 %v1335_v41, %v1259_v33  ;;  %v1418_v18 = vmul.f32 %v1258_v19, %v1258_v19  ;;  %v1264_v19 = vld [vmem:[%s8332_s0 + $0x158] sm:$0xff]  ;;  %v1265_v33 = vld [vmem:[%s8332_s0 + $0x160] sm:$0xff] }
 0x1b7   : > { %v1357_v55 = vadd.f32 %v1356_v42, %v6478_v32  ;;  %v1491_v12 = vadd.f32 %v1490_v60, %v1415_v46  ;;  %v1420_v42 = vmul.f32 %v1260_v35, %v1260_v35 }
 0x1b8   : > { %v1311_v37 = vadd.f32 %v1310_v25, %v1237_v39  ;;  %v1470_v45 = vadd.f32 %v1469_v31, %v1396_v53  ;;  %v1337_v2 = vadd.f32 %v1336_v54, %v1260_v35  ;;  %v1266_v35 = vld [vmem:[%s8332_s0 + $0x168] sm:$0xff]  ;;  %v1421_v54 = vmul.f32 %v1261_v58, %v1261_v58 }
 0x1b9   : > { %v1358_v3 = vadd.f32 %v1357_v55, %v6491_v49  ;;  %v1492_v20 = vadd.f32 %v1491_v12, %v1416_v47  ;;  %v1423_v12 = vmul.f32 %v1263_v7, %v1263_v7 }
 0x1ba   : > { %v1312_v39 = vadd.f32 %v1311_v37, %v6379_v44  ;;  %v1471_v53 = vadd.f32 %v1470_v45, %v1397_v57  ;;  %v1431_v44 = vmul.f32 %v6350_v26, %v6350_v26  ;;  %v1432_v57 = vmul.f32 %v6355_v27, %v6355_v27  ;;  %v6521_v26 = vld [vmem:[%s8332_s0 + $0x1e0] sm:$0xff]  ;;  %v6560_v45 = vld [vmem:[%s8332_s0 + $0x1f8] sm:$0xff] }
 0x1bb   : > { %v1338_v14 = vadd.f32 %v1337_v2, %v1261_v58  ;;  %v1359_v27 = vadd.f32 %v1358_v3, %v6504_v61  ;;  %v1493_v31 = vadd.f32 %v1492_v20, %v1417_v9  ;;  %v1267_v58 = vld [vmem:[%s8332_s0 + $0x170] sm:$0xff]  ;;  %v6586_v3 = vld [vmem:[%s8332_s0 + $0x208] sm:$0xff] }
 0x1bc   : > { %v1313_v0 = vadd.f32 %v1312_v39, %v6392_v51  ;;  %v1472_v6 = vadd.f32 %v1471_v53, %v1398_v1  ;;  %v1433_v1 = vmul.f32 %v6369_v38, %v6369_v38  ;;  %v6573_v53 = vld [vmem:[%s8332_s0 + $0x200] sm:$0xff] }
 0x1bd   : > { %v1339_v25 = vadd.f32 %v1338_v14, %v1262_v8  ;;  %v1360_v38 = vadd.f32 %v1359_v27, %v6521_v26  ;;  %v1494_v43 = vadd.f32 %v1493_v31, %v1418_v18  ;;  %v1287_v14 = vld [vmem:[%s8332_s0 + $0x210] sm:$0xff]  ;;  %v1424_v18 = vmul.f32 %v1264_v19, %v1264_v19 }
 0x1be   : > { %v1314_v51 = vadd.f32 %v1313_v0, %v6398_v56  ;;  %v1473_v16 = vadd.f32 %v1472_v6, %v6423_v5  ;;  %v1434_v56 = vmul.f32 %v6387_v50, %v6387_v50  ;;  %v1510_v5 = vadd.f32 %v1432_v57, %v1431_v44 }
 0x1bf   : > { %v1435_v50 = vmul.f32 %v6406_v62, %v6406_v62  ;;  %v1340_v36 = vadd.f32 %v1339_v25, %v1263_v7  ;;  %v1361_v37 = vadd.f32 %v1360_v38, %v6534_v21  ;;  %v1436_v62 = vmul.f32 %v6431_v10, %v6431_v10  ;;  %v1269_v7 = vld [vmem:[%s8332_s0 + $0x180] sm:$0xff] }
 0x1c0   : > { %v1315_v23 = vadd.f32 %v1314_v51, %v6411_v63  ;;  %v1474_v29 = vadd.f32 %v1473_v16, %v6440_v13  ;;  %v1511_v13 = vadd.f32 %v1510_v5, %v1433_v1  ;;  %v1495_v55 = vadd.f32 %v1494_v43, %v1419_v30 }
 0x1c1   : > { %v1341_v46 = vadd.f32 %v1340_v36, %v1264_v19  ;;  %v1362_v48 = vadd.f32 %v1361_v37, %v6547_v34  ;;  %v1437_v10 = vmul.f32 %v6458_v22, %v6458_v22  ;;  %v1422_v0 = vmul.f32 %v1262_v8, %v1262_v8  ;;  %v1268_v8 = vld [vmem:[%s8332_s0 + $0x178] sm:$0xff]  ;;  %v1289_v19 = vld [vmem:[%s8332_s0 + $0x220] sm:$0xff] }
 0x1c2   : > { %v1316_v63 = vadd.f32 %v1315_v23, %v6419_v4  ;;  %v1475_v41 = vadd.f32 %v1474_v29, %v6450_v17  ;;  %v1512_v17 = vadd.f32 %v1511_v13, %v1434_v56  ;;  %v1496_v2 = vadd.f32 %v1495_v55, %v1420_v42  ;;  %v1288_v56 = vld [vmem:[%s8332_s0 + $0x218] sm:$0xff] }
 0x1c3   : > { %v1342_v47 = vadd.f32 %v1341_v46, %v1265_v33  ;;  %v1363_v60 = vadd.f32 %v1362_v48, %v6560_v45  ;;  %v1440_v38 = vmul.f32 %v6504_v61, %v6504_v61  ;;  %v1426_v36 = vmul.f32 %v1266_v35, %v1266_v35  ;;  %v1290_v61 = vld [vmem:[%s8332_s0 + $0x228] sm:$0xff] }
 0x1c4   : > { %v1317_v4 = vadd.f32 %v1316_v63, %v6436_v11  ;;  %v1476_v39 = vadd.f32 %v1475_v41, %v6465_v28  ;;  %v1513_v28 = vadd.f32 %v1512_v17, %v1435_v50  ;;  %v1497_v51 = vadd.f32 %v1496_v2, %v1421_v54 }
 0x1c5   : > { %v1343_v57 = vadd.f32 %v1342_v47, %v1266_v35  ;;  %v1364_v6 = vadd.f32 %v1363_v60, %v6573_v53  ;;  %v1441_v50 = vmul.f32 %v6521_v26, %v6521_v26  ;;  %v1427_v43 = vmul.f32 %v1267_v58, %v1267_v58  ;;  %v1292_v35 = vld [vmem:[%s8332_s0 + $0x238] sm:$0xff]  ;;  %v1293_v60 = vld [vmem:[%s8332_s0 + $0x240] sm:$0xff] }
 0x1c6   : > { %v1318_v11 = vadd.f32 %v1317_v4, %v6446_v15  ;;  %v1477_v44 = vadd.f32 %v1476_v39, %v6470_v24  ;;  %v1438_v15 = vmul.f32 %v6478_v32, %v6478_v32  ;;  %v1514_v24 = vadd.f32 %v1513_v28, %v1436_v62  ;;  %v1270_v32 = vld [vmem:[%s8332_s0 + $0x188] sm:$0xff]  ;;  %v1291_v4 = vld [vmem:[%s8332_s0 + $0x230] sm:$0xff] }
 0x1c7   : > { %v1365_v27 = vadd.f32 %v1364_v6, %v6586_v3  ;;  %v1498_v20 = vadd.f32 %v1497_v51, %v1422_v0  ;;  %v1443_v46 = vmul.f32 %v6547_v34, %v6547_v34  ;;  %v1428_v17 = vmul.f32 %v1268_v8, %v1268_v8  ;;  %v1295_v34 = vld [vmem:[%s8332_s0 + $0x250] sm:$0xff] }
 0x1c8   : > { %v1321_v22 = vadd.f32 %v6495_v52, %v1318_v11  ;;  %v1478_v9 = vadd.f32 %v1477_v44, %v6482_v40  ;;  %v1344_v52 = vadd.f32 %v1343_v57, %v1267_v58  ;;  %v1439_v40 = vmul.f32 %v6491_v49, %v6491_v49 }
 0x1c9   : > { %v1515_v1 = vadd.f32 %v1514_v24, %v1437_v10  ;;  %v1366_v25 = vadd.f32 %v1365_v27, %v1287_v14  ;;  %v1347_v49 = vsel %vm1319_vm0, %v1270_v32, 0.0  ;;  %v1499_v29 = vadd.f32 %v1498_v20, %v1423_v12 }
 0x1ca   : > { %1322 = vadd.xlane.f32.xlu0 %v1321_v22  ;;  %v1480_v16 = vadd.f32 %v6513_v59, %v1478_v9  ;;  %v1345_v23 = vadd.f32 %v1344_v52, %v1268_v8  ;;  %v1425_v59 = vmul.f32 %v1265_v33, %v1265_v33  ;;  %v1442_v33 = vmul.f32 %v6534_v21, %v6534_v21 }
 0x1cb   : > { %v1516_v5 = vadd.f32 %v1515_v1, %v1438_v15  ;;  %v1367_v31 = vadd.f32 %v1366_v25, %v1288_v56  ;;  %v1500_v37 = vadd.f32 %v1499_v29, %v1424_v18  ;;  %v1430_v21 = vmul.f32 %v1270_v32, %v1270_v32 }
 0x1cc   : > { %1481 = vadd.xlane.f32.xlu1 %v1480_v16  ;;  %v1346_v30 = vadd.f32 %v1345_v23, %v1269_v7  ;;  %v1444_v55 = vmul.f32 %v6560_v45, %v6560_v45  ;;  %v1429_v11 = vmul.f32 %v1269_v7, %v1269_v7  ;;  %v1445_v44 = vmul.f32 %v6573_v53, %v6573_v53  ;;  %v1294_v45 = vld [vmem:[%s8332_s0 + $0x248] sm:$0xff] }
 0x1cd   : > { %v1517_v63 = vadd.f32 %v1516_v5, %v1439_v40  ;;  %v1368_v41 = vadd.f32 %v1367_v31, %v1289_v19  ;;  %v1501_v62 = vadd.f32 %v1500_v37, %v1425_v59  ;;  %v1506_v2 = vsel %vm1319_vm0, %v1430_v21, 0.0 }
 0x1ce   : > { %v1348_v13 = vadd.f32 %v1347_v49, %v1346_v30  ;;  %v1446_v22 = vmul.f32 %v6586_v3, %v6586_v3  ;;  %v1374_v24 = vsel %vm1319_vm0, %v1295_v34, 0.0  ;;  %v1447_v8 = vmul.f32 %v1287_v14, %v1287_v14 }
 0x1cf   : > { %v1518_v42 = vadd.f32 %v1517_v63, %v1440_v38  ;;  %v1369_v26 = vadd.f32 %v1368_v41, %v1290_v61  ;;  %v1502_v39 = vadd.f32 %v1501_v62, %v1426_v36  ;;  %v1448_v32 = vmul.f32 %v1288_v56, %v1288_v56 }
 0x1d0   : > { %1349 = vadd.xlane.f32.xlu0 %v1348_v13  ;;  %v1449_v27 = vmul.f32 %v1289_v19, %v1289_v19  ;;  %v1450_v1 = vmul.f32 %v1290_v61, %v1290_v61  ;;  %v1451_v7 = vmul.f32 %v1291_v4, %v1291_v4  ;;  %v1452_v3 = vmul.f32 %v1292_v35, %v1292_v35 }
 0x1d1   : > { %v1519_v48 = vadd.f32 %v1518_v42, %v1441_v50  ;;  %v1370_v54 = vadd.f32 %v1369_v26, %v1291_v4  ;;  %v1503_v47 = vadd.f32 %v1502_v39, %v1427_v43  ;;  %v1453_v23 = vmul.f32 %v1293_v60, %v1293_v60  ;;  %v1561_v4 = vld [vmem:[%s8335_s3] sm:$0xff] }
 0x1d2   : > { %v1455_v38 = vmul.f32 %v1295_v34, %v1295_v34  ;;  %v1454_v5 = vmul.f32 %v1294_v45, %v1294_v45  ;;  %v5403_v30 = vmov 0  }
 0x1d3   : > { %v1520_v10 = vadd.f32 %v1519_v48, %v1442_v33  ;;  %v1371_v28 = vadd.f32 %v1370_v54, %v1292_v35  ;;  %v1504_v0 = vadd.f32 %v1503_v47, %v1428_v17  ;;  %4967 = vset.pattern.permute.xlu0 %v5403_v30  ;;  %4968 = vset.pattern.permute.xlu1 %v5403_v30  ;;  %v1562_v54 = vld [vmem:[%s8335_s3 + $0x8] sm:$0xff] }
 0x1d4   : > { %v1533_v59 = vsel %vm1319_vm0, %v1455_v38, 0.0  ;;  %v1577_v38 = vld [vmem:[%s6676_s16 + $0x8] sm:$0xff] }
 0x1d5   : > { %v1521_v58 = vadd.f32 %v1520_v10, %v1443_v46  ;;  %v1372_v15 = vadd.f32 %v1371_v28, %v1293_v60  ;;  %v1505_v6 = vadd.f32 %v1504_v0, %v1429_v11  ;;  %v1567_v28 = vld [vmem:[%s8336_s4] sm:$0xff] }
 0x1d7   : > { %v1522_v57 = vadd.f32 %v1521_v58, %v1444_v55  ;;  %v1373_v9 = vadd.f32 %v1372_v15, %v1294_v45  ;;  %v1507_v53 = vadd.f32 %v1506_v2, %v1505_v6  ;;  %v1568_v2 = vld [vmem:[%s8336_s4 + $0x8] sm:$0xff] }
 0x1d9   : > { %v1523_v12 = vadd.f32 %v1522_v57, %v1445_v44  ;;  %v1375_v51 = vadd.f32 %v1374_v24, %v1373_v9  ;;  %1508 = vadd.xlane.f32.xlu1 %v1507_v53  ;;  %v1563_v57 = vld [vmem:[%s8335_s3 + $0x10] sm:$0xff]  ;;  %v5404_v53 = vmov 0.0  }
 0x1da   : > { %v1569_v9 = vld [vmem:[%s8336_s4 + $0x10] sm:$0xff]  ;;  %1938 = vmatprep.mubr.f32.mxu0 %v5404_v53  ;;  %2022 = vmatprep.mubr.f32.mxu1 %v5404_v53 }
 0x1db   : > { %v1524_v52 = vadd.f32 %v1523_v12, %v1446_v22  ;;  %1376 = vadd.xlane.f32.xlu0 %v1375_v51 }
 0x1dd   : > { %v1525_v40 = vadd.f32 %v1524_v52, %v1447_v8  ;;  %v1588_v52 = vld [vmem:[%s6676_s16 + $0x60] sm:$0xff] }
 0x1df   : > { %v1526_v16 = vadd.f32 %v1525_v40, %v1448_v32  ;;  %v1584_v32 = vld [vmem:[%s6676_s16 + $0x40] sm:$0xff]  ;;  %v1623_v40 = vld [vmem:[%s6681_s28 + $0x40] sm:$0xff] }
 0x1e1   : > { %v1527_v18 = vadd.f32 %v1526_v16, %v1449_v27  ;;  %v1586_v27 = vld [vmem:[%s6676_s16 + $0x50] sm:$0xff] }
 0x1e3   : > { %v1528_v20 = vadd.f32 %v1527_v18, %v1450_v1  ;;  %v1627_v1 = vld [vmem:[%s6681_s28 + $0x60] sm:$0xff]  ;;  %v1625_v18 = vld [vmem:[%s6681_s28 + $0x50] sm:$0xff] }
 0x1e5   : > { %v1529_v25 = vadd.f32 %v1528_v20, %v1451_v7 }
 0x1e7   : > { %v1530_v14 = vadd.f32 %v1529_v25, %v1452_v3 }
 0x1e9   : > { %v1531_v49 = vadd.f32 %v1530_v14, %v1453_v23  ;;  %v1590_v14 = vld [vmem:[%s6676_s16 + $0x70] sm:$0xff] }
 0x1eb   : > { %v1532_v56 = vadd.f32 %v1531_v49, %v1454_v5  ;;  %v1576_v49 = vld [vmem:[%s6676_s16] sm:$0xff] }
 0x1ed   : > { %v1534_v29 = vadd.f32 %v1533_v59, %v1532_v56  ;;  %v1589_v59 = vld [vmem:[%s6676_s16 + $0x68] sm:$0xff]  ;;  %v1579_v56 = vld [vmem:[%s6676_s16 + $0x18] sm:$0xff] }
 0x1ef   : > { %1535 = vadd.xlane.f32.xlu1 %v1534_v29  ;;  %v1616_v29 = vld [vmem:[%s6681_s28 + $0x8] sm:$0xff] }
 0x257   : > { %v1323_v19 = vpop.xlane.xlu0 %1322 }
 0x258   : > { %v1540_v31 = vmul.f32 0.00031887754, %v1323_v19 }
 0x259   : > { %v1482_v63 = vpop.xlane.xlu1 %1481 }
 0x25a   : > { %v1546_v50 = vmul.f32 %v1540_v31, %v1540_v31  ;;  %v1543_v36 = vmul.f32 0.00031887754, %v1482_v63  ;;  %v1581_v63 = vld [vmem:[%s6676_s16 + $0x28] sm:$0xff] }
 0x25c   : > { %v1549_v37 = vsub.f32 %v1543_v36, %v1546_v50  ;;  %v1578_v36 = vld [vmem:[%s6676_s16 + $0x10] sm:$0xff] }
 0x25d   : > { %v1350_v41 = vpop.xlane.xlu0 %1349 }
 0x25e   : > { %v1552_v61 = vmax.f32 %v1549_v37, 0.0  ;;  %v1541_v33 = vmul.f32 0.00031887754, %v1350_v41  ;;  %v1628_v41 = vld [vmem:[%s6681_s28 + $0x68] sm:$0xff] }
 0x260   : > { %v1555_v13 = vadd.f32 1e-05, %v1552_v61  ;;  %v1547_v42 = vmul.f32 %v1541_v33, %v1541_v33  ;;  %v1629_v61 = vld [vmem:[%s6681_s28 + $0x70] sm:$0xff] }
 0x262   : > { %4969 = vrsqrt.f32 %v1555_v13  ;;  %v1615_v13 = vld [vmem:[%s6681_s28] sm:$0xff] }
 0x266   : > { %v1509_v43 = vpop.xlane.xlu1 %1508 }
 0x267   : > { %v1544_v62 = vmul.f32 0.00031887754, %v1509_v43 }
 0x268   : > { %v1377_v35 = vpop.xlane.xlu0 %1376 }
 0x269   : > { %v1550_v46 = vsub.f32 %v1544_v62, %v1547_v42  ;;  %v1542_v21 = vmul.f32 0.00031887754, %v1377_v35  ;;  %v1601_v42 = vld [vmem:[%s6676_s16 + $0xc8] sm:$0xff] }
 0x26a   : > { %v1618_v35 = vld [vmem:[%s6681_s28 + $0x18] sm:$0xff] }
 0x26b   : > { %v1553_v17 = vmax.f32 %v1550_v46, 0.0  ;;  %v1548_v55 = vmul.f32 %v1542_v21, %v1542_v21 }
 0x26c   : > { %v4970_v26 = vpop.eup %4969 }
 0x26d   : > { %v1564_v48 = vmul.f32 %v4970_v26, %v1561_v4  ;;  %v1556_v39 = vadd.f32 1e-05, %v1553_v17  ;;  %v1580_v26 = vld [vmem:[%s6676_s16 + $0x20] sm:$0xff] }
 0x26f   : > { %1656 = vperm.xlu0 %4967, %v1564_v48   ;;  %4971 = vrsqrt.f32 %v1556_v39  ;;  %v1570_v34 = vmul.f32 %v1564_v48, %v1540_v31 }
 0x271   : > { %v1573_v0 = vsub.f32 %v1567_v28, %v1570_v34 }
 0x279   : > { %v4972_v10 = vpop.eup %4971 }
 0x27a   : > { %v1565_v60 = vmul.f32 %v4972_v10, %v1562_v54  ;;  %v1585_v54 = vld [vmem:[%s6676_s16 + $0x48] sm:$0xff]  ;;  %v1592_v10 = vld [vmem:[%s6676_s16 + $0x80] sm:$0xff] }
 0x27c   : > { %v1536_v11 = vpop.xlane.xlu1 %1535  ;;  %1661 = vperm.xlu1 %4968, %v1565_v60   ;;  %v1571_v45 = vmul.f32 %v1565_v60, %v1541_v33  ;;  %v1597_v33 = vld [vmem:[%s6676_s16 + $0xa8] sm:$0xff] }
 0x27d   : > { %v1545_v47 = vmul.f32 0.00031887754, %v1536_v11  ;;  %v1620_v11 = vld [vmem:[%s6681_s28 + $0x28] sm:$0xff] }
 0x27e   : > { %v1574_v22 = vsub.f32 %v1568_v2, %v1571_v45 }
 0x27f   : > { %v1551_v44 = vsub.f32 %v1545_v47, %v1548_v55  ;;  %v1617_v47 = vld [vmem:[%s6681_s28 + $0x10] sm:$0xff] }
 0x280   : > { %1749 = vperm.xlu1 %4968, %v1573_v0  }
 0x281   : > { %v1554_v58 = vmax.f32 %v1551_v44, 0.0 }
 0x283   : > { %v1557_v15 = vadd.f32 1e-05, %v1554_v58 }
 0x284   : > { %1754 = vperm.xlu1 %4968, %v1574_v22   ;;  %v1591_v22 = vld [vmem:[%s6676_s16 + $0x78] sm:$0xff] }
 0x285   : > { %4973 = vrsqrt.f32 %v1557_v15  ;;  %v1594_v15 = vld [vmem:[%s6676_s16 + $0x90] sm:$0xff] }
 0x28f   : > { %v4974_v6 = vpop.eup %4973 }
 0x290   : > { %v1566_v24 = vmul.f32 %v4974_v6, %v1563_v57  ;;  %v1593_v57 = vld [vmem:[%s6676_s16 + $0x88] sm:$0xff] }
 0x292   : > { %1666 = vperm.xlu1 %4968, %v1566_v24   ;;  %v1572_v8 = vmul.f32 %v1566_v24, %v1542_v21  ;;  %v1583_v21 = vld [vmem:[%s6676_s16 + $0x38] sm:$0xff] }
 0x294   : > { %v1575_v12 = vsub.f32 %v1569_v9, %v1572_v8  ;;  %v1596_v9 = vld [vmem:[%s6676_s16 + $0xa0] sm:$0xff] }
 0x296   : > { %1759 = vperm.xlu1 %4968, %v1575_v12   ;;  %v1598_v12 = vld [vmem:[%s6676_s16 + $0xb0] sm:$0xff] }
 0x2ee   : > { %v6674_v51 = vpop.permute.xlu0 %1656 }
 0x2ef   : > { %v1677_v16 = vmul.f32 %v6674_v51, %v1584_v32  ;;  %v1681_v7 = vmul.f32 %v6674_v51, %v1588_v52  ;;  %v1679_v3 = vmul.f32 %v6674_v51, %v1586_v27  ;;  %v1670_v30 = vmul.f32 %v6674_v51, %v1577_v38  ;;  %v1636_v52 = vld [vmem:[%s6681_s28 + $0xa8] sm:$0xff]  ;;  %v1619_v38 = vld [vmem:[%s6681_s28 + $0x20] sm:$0xff] }
 0x2f0   : > { %v1669_v31 = vmul.f32 %v6674_v51, %v1576_v49  ;;  %v1672_v43 = vmul.f32 %v6674_v51, %v1579_v56  ;;  %v1674_v62 = vmul.f32 %v6674_v51, %v1581_v63  ;;  %v1671_v4 = vmul.f32 %v6674_v51, %v1578_v36  ;;  %v1622_v49 = vld [vmem:[%s6681_s28 + $0x38] sm:$0xff]  ;;  %v1631_v56 = vld [vmem:[%s6681_s28 + $0x80] sm:$0xff]  ;;  %v1632_v36 = vld [vmem:[%s6681_s28 + $0x88] sm:$0xff] }
 0x2f1   : > { %v1716_v20 = vadd.f32 %v1677_v16, %v1623_v40  ;;  %v1720_v23 = vadd.f32 %v1681_v7, %v1627_v1  ;;  %v6689_v25 = vadd.f32 %v1679_v3, %v1625_v18  ;;  %v1709_v46 = vadd.f32 %v1670_v30, %v1616_v29  ;;  %v1640_v7 = vld [vmem:[%s6681_s28 + $0xc8] sm:$0xff]  ;;  %v1633_v29 = vld [vmem:[%s6681_s28 + $0x90] sm:$0xff]  ;;  %v1630_v63 = vld [vmem:[%s6681_s28 + $0x78] sm:$0xff] }
 0x2f2   : > { %v1708_v17 = vadd.f32 %v1669_v31, %v1615_v13  ;;  %v1711_v6 = vadd.f32 %v1672_v43, %v1618_v35  ;;  %v1673_v24 = vmul.f32 %v6674_v51, %v1580_v26  ;;  %v1676_v8 = vmul.f32 %v6674_v51, %v1583_v21  ;;  %v1599_v18 = vld [vmem:[%s6676_s16 + $0xb8] sm:$0xff] }
 0x2f3   : > { %v1678_v32 = vmul.f32 %v6674_v51, %v1585_v54  ;;  %v1713_v1 = vadd.f32 %v1674_v62, %v1620_v11  ;;  %v1710_v16 = vadd.f32 %v1671_v4, %v1617_v47  ;;  %v1637_v62 = vld [vmem:[%s6681_s28 + $0xb0] sm:$0xff]  ;;  %v1607_v11 = vld [vmem:[%s6676_s16 + $0xf8] sm:$0xff] }
 0x2f4   : > { %v6767_v43 = vadd.f32 %v1676_v8, %v1622_v49 }
 0x2fb   : > { %v6692_v5 = vpop.permute.xlu1 %1661 }
 0x2fc   : > { %v1683_v19 = vmul.f32 %v6692_v5, %v1590_v14  ;;  %v1682_v50 = vmul.f32 %v6692_v5, %v1589_v59  ;;  %v1690_v60 = vmul.f32 %v6692_v5, %v1597_v33  ;;  %v1694_v28 = vmul.f32 %v6692_v5, %v1601_v42  ;;  %v1624_v59 = vld [vmem:[%s6681_s28 + $0x48] sm:$0xff] }
 0x2fd   : > { %v1685_v3 = vmul.f32 %v6692_v5, %v1592_v10  ;;  %v1686_v14 = vmul.f32 %v6692_v5, %v1593_v57  ;;  %v1689_v30 = vmul.f32 %v6692_v5, %v1596_v9  ;;  %v1712_v42 = vadd.f32 %v1673_v24, %v1619_v38  ;;  %v1605_v10 = vld [vmem:[%s6676_s16 + $0xe8] sm:$0xff]  ;;  %v1641_v24 = vld [vmem:[%s6681_s28 + $0xd0] sm:$0xff] }
 0x2fe   : > { %v1722_v48 = vadd.f32 %v1683_v19, %v1629_v61  ;;  %v1721_v39 = vadd.f32 %v1682_v50, %v1628_v41  ;;  %v1691_v19 = vmul.f32 %v6692_v5, %v1598_v12  ;;  %v1729_v31 = vadd.f32 %v1690_v60, %v1636_v52  ;;  %v1638_v50 = vld [vmem:[%s6681_s28 + $0xb8] sm:$0xff]  ;;  %v1635_v61 = vld [vmem:[%s6681_s28 + $0xa0] sm:$0xff] }
 0x2ff   : > { %v6705_v37 = vpop.permute.xlu1 %1749  ;;  %v1733_v13 = vadd.f32 %v1694_v28, %v1640_v7  ;;  %v1692_v41 = vmul.f32 %v6692_v5, %v1599_v18  ;;  %v6770_v4 = vadd.f32 %v1678_v32, %v1624_v59  ;;  %v1725_v54 = vadd.f32 %v1686_v14, %v1632_v36  ;;  %v1642_v57 = vld [vmem:[%s6681_s28 + $0xd8] sm:$0xff]  ;;  %v1643_v59 = vld [vmem:[%s6681_s28 + $0xe0] sm:$0xff] }
 0x300   : > { %v6726_v34 = vadd.f32 %v6705_v37, %v1716_v20  ;;  %v6730_v44 = vadd.f32 %v6705_v37, %v1720_v23  ;;  %v1763_v58 = vadd.f32 %v6705_v37, %v1709_v46  ;;  %v1762_v45 = vadd.f32 %v6705_v37, %v1708_v17  ;;  %v1603_v46 = vld [vmem:[%s6676_s16 + $0xd8] sm:$0xff]  ;;  %v1610_v36 = vld [vmem:[%s6676_s16 + $0x110] sm:$0xff] }
 0x301   : > { %v1687_v20 = vmul.f32 %v6692_v5, %v1594_v15  ;;  %v1684_v23 = vmul.f32 %v6692_v5, %v1591_v22  ;;  %v6765_v33 = vadd.f32 %v6705_v37, %v6689_v25  ;;  %v1731_v35 = vadd.f32 %v1692_v41, %v1638_v50  ;;  %v1602_v25 = vld [vmem:[%s6676_s16 + $0xd0] sm:$0xff] }
 0x302   : > { %v1728_v47 = vadd.f32 %v1689_v30, %v1635_v61  ;;  %v6783_v28 = vadd.f32 %v6705_v37, %v1711_v6  ;;  %v1767_v8 = vadd.f32 %v6705_v37, %v1713_v1  ;;  %v1764_v7 = vadd.f32 %v6705_v37, %v1710_v16  ;;  %v1646_v1 = vld [vmem:[%s6681_s28 + $0xf8] sm:$0xff] }
 0x303   : > { %v6719_v55 = vpop.permute.xlu1 %1754  ;;  %v1726_v17 = vadd.f32 %v1687_v20, %v1633_v29  ;;  %v1723_v21 = vadd.f32 %v1684_v23, %v1630_v63  ;;  %v1766_v14 = vadd.f32 %v6705_v37, %v1712_v42  ;;  %v6819_v29 = vld [vmem:[%s8337_s5] sm:$0xff]  ;;  %v1611_v63 = vld [vmem:[%s6676_s16 + $0x118] sm:$0xff] }
 0x304   : > { %v1776_v0 = vadd.f32 %v6719_v55, %v1722_v48  ;;  %v1775_v2 = vadd.f32 %v6719_v55, %v1721_v39  ;;  %v6773_v26 = vadd.f32 %v6719_v55, %v1729_v31  ;;  %v1724_v48 = vadd.f32 %v1685_v3, %v1631_v56  ;;  %v1645_v56 = vld [vmem:[%s6681_s28 + $0xf0] sm:$0xff] }
 0x305   : > { %v1787_v39 = vadd.f32 %v6719_v55, %v1733_v13  ;;  %v6791_v15 = vadd.f32 %v6719_v55, %v1731_v35  ;;  %v1780_v6 = vadd.f32 %v6719_v55, %v1726_v17  ;;  %v1777_v12 = vadd.f32 %v6719_v55, %v1723_v21  ;;  %v6838_v17 = vld [vmem:[%s8337_s5 + $0x70] sm:$0xff] }
 0x306   : > { %v4479_v27 = vpack.c.bf16 %v1776_v0, %v1763_v58  ;;  %v4481_v40 = vpack.c.bf16 %v1775_v2, %v1762_v45  ;;  %v4497_v60 = vpack.c.bf16 %v6773_v26, %v6726_v34  ;;  %v1604_v58 = vld [vmem:[%s6676_s16 + $0xe0] sm:$0xff]  ;;  %v1606_v0 = vld [vmem:[%s6676_s16 + $0xf0] sm:$0xff]  ;;  %v1730_v45 = vadd.f32 %v1691_v19, %v1637_v62  ;;  %v1613_v62 = vld [vmem:[%s6676_s16 + $0x128] sm:$0xff] }
 0x307   : > { %v6788_v2 = vpack.c.bf16 %v1787_v39, %v6730_v44  ;;  %v1778_v9 = vadd.f32 %v6719_v55, %v1724_v48  ;;  %v1644_v44 = vld [vmem:[%s6681_s28 + $0xe8] sm:$0xff]  ;;  %v1779_v18 = vadd.f32 %v6719_v55, %v1725_v54  ;;  %v4487_v19 = vpack.c.bf16 %v1780_v6, %v1767_v8  ;;  %v1614_v48 = vld [vmem:[%s6676_s16 + $0x130] sm:$0xff]  ;;  %v1650_v54 = vld [vmem:[%s6681_s28 + $0x118] sm:$0xff] }
 0x308   : > { %4480 = vmatprep.subr.bf16.mxu0 %v4479_v27  ;;  %4507 = vmatprep.subr.bf16.mxu1 %v4479_v27  ;;  %v6823_v31 = vadd.f32 %v6719_v55, %v1728_v47  ;;  %v6826_v50 = vadd.f32 %v6719_v55, %v1730_v45  ;;  %v4485_v41 = vpack.c.bf16 %v1777_v12, %v1764_v7  ;;  %v1653_v45 = vld [vmem:[%s6681_s28 + $0x130] sm:$0xff] }
 0x309   : > { %4482 = vmatpush1.bf16.msra.mxu0 %v4481_v40  ;;  %4509 = vmatpush1.bf16.msra.mxu1 %v4481_v40  ;;  %v4483_v30 = vpack.c.bf16 %v1778_v9, %v6783_v28  ;;  %v4489_v39 = vpack.c.bf16 %v1779_v18, %v1766_v14  ;;  %v4501_v28 = vpack.c.bf16 %v6791_v15, %v6765_v33 }
 0x30a   : > { %v1769_v7 = vadd.f32 %v6705_v37, %v6767_v43  ;;  %v1771_v18 = vadd.f32 %v6705_v37, %v6770_v4 }
 0x30c   : > { %v4491_v14 = vpack.c.bf16 %v6823_v31, %v1769_v7  ;;  %v1609_v31 = vld [vmem:[%s6676_s16 + $0x108] sm:$0xff] }
 0x30d   : > { %v7001_v7 = vld [vmem:[%s8337_s5 + $0x40] sm:$0xff] }
 0x311   : > { %v6793_v22 = vpop.permute.xlu1 %1666 }
 0x312   : > { %v1696_v32 = vmul.f32 %v6793_v22, %v1603_v46  ;;  %v1695_v52 = vmul.f32 %v6793_v22, %v1602_v25  ;;  %v1698_v27 = vmul.f32 %v6793_v22, %v1605_v10  ;;  %v1700_v40 = vmul.f32 %v6793_v22, %v1607_v11  ;;  %v1612_v46 = vld [vmem:[%s6676_s16 + $0x120] sm:$0xff] }
 0x313   : > { %v1697_v3 = vmul.f32 %v6793_v22, %v1604_v58  ;;  %v1699_v20 = vmul.f32 %v6793_v22, %v1606_v0  ;;  %v1649_v10 = vld [vmem:[%s6681_s28 + $0x110] sm:$0xff]  ;;  %v1704_v11 = vmul.f32 %v6793_v22, %v1611_v63  ;;  %v1703_v47 = vmul.f32 %v6793_v22, %v1610_v36  ;;  %v1652_v58 = vld [vmem:[%s6681_s28 + $0x128] sm:$0xff]  ;;  %v1651_v0 = vld [vmem:[%s6681_s28 + $0x120] sm:$0xff] }
 0x314   : > { %v1735_v23 = vadd.f32 %v1696_v32, %v1642_v57  ;;  %v1734_v38 = vadd.f32 %v1695_v52, %v1641_v24  ;;  %v1737_v49 = vadd.f32 %v1698_v27, %v1644_v44  ;;  %v1739_v42 = vadd.f32 %v1700_v40, %v1646_v1  ;;  %v6863_v27 = vld [vmem:[%s8337_s5 + $0x8] sm:$0xff]  ;;  %v6868_v40 = vld [vmem:[%s8337_s5 + $0x78] sm:$0xff] }
 0x315   : > { %v6814_v16 = vpop.permute.xlu1 %1759  ;;  %v1736_v25 = vadd.f32 %v1697_v3, %v1643_v59  ;;  %v1738_v21 = vadd.f32 %v1699_v20, %v1645_v56  ;;  %v1706_v57 = vmul.f32 %v6793_v22, %v1613_v62  ;;  %v1705_v24 = vmul.f32 %v6793_v22, %v1612_v46  ;;  %v1595_v3 = vld [vmem:[%s6676_s16 + $0x98] sm:$0xff]  ;;  %v1582_v59 = vld [vmem:[%s6676_s16 + $0x30] sm:$0xff]  ;;  %v1600_v36 = vld [vmem:[%s6676_s16 + $0xc0] sm:$0xff] }
 0x316   : > { %v1789_v61 = vadd.f32 %v6814_v16, %v1735_v23  ;;  %v1788_v13 = vadd.f32 %v6814_v16, %v1734_v38  ;;  %v1791_v35 = vadd.f32 %v6814_v16, %v1737_v49  ;;  %v1707_v9 = vmul.f32 %v6793_v22, %v1614_v48  ;;  %v6901_v56 = vld [vmem:[%s8337_s5 + $0x10] sm:$0xff]  ;;  %v6928_v62 = vld [vmem:[%s8337_s5 + $0x18] sm:$0xff]  ;;  %v6933_v46 = vld [vmem:[%s8337_s5 + $0x88] sm:$0xff] }
 0x317   : > { %v1793_v8 = vadd.f32 %v6814_v16, %v1739_v42  ;;  %v6858_v6 = vadd.f32 %v1704_v11, %v1650_v54  ;;  %v1742_v12 = vadd.f32 %v1703_v47, %v1649_v10  ;;  %v1745_v44 = vadd.f32 %v1706_v57, %v1652_v58  ;;  %v1587_v42 = vld [vmem:[%s6676_s16 + $0x58] sm:$0xff]  ;;  %v1639_v10 = vld [vmem:[%s6681_s28 + $0xc0] sm:$0xff] }
 0x318   : > { %1878 = vmatprep.subr.mxu0 %v1789_v61  ;;  %4508 = vmatprep.subr.mxu1 %v1789_v61  ;;  %v1744_v32 = vadd.f32 %v1705_v24, %v1651_v0  ;;  %v1746_v52 = vadd.f32 %v1707_v9, %v1653_v45  ;;  %v1790_v43 = vadd.f32 %v6814_v16, %v1736_v25  ;;  %v1621_v61 = vld [vmem:[%s6681_s28 + $0x30] sm:$0xff]  ;;  %v1647_v47 = vld [vmem:[%s6681_s28 + $0x100] sm:$0xff]  ;;  %v1626_v0 = vld [vmem:[%s6681_s28 + $0x58] sm:$0xff] }
 0x319   : > { %1879 = vmatpush1.msra.mxu0 %v1788_v13  ;;  %4510 = vmatpush1.msra.mxu1 %v1788_v13  ;;  %v6875_v1 = vadd.f32 %v6814_v16, %v1742_v12  ;;  %v6879_v20 = vadd.f32 %v6814_v16, %v1745_v44  ;;  %v1792_v4 = vadd.f32 %v6814_v16, %v1738_v21  ;;  %v6965_v12 = vld [vmem:[%s8337_s5 + $0x28] sm:$0xff] }
 0x31a   : > { %4266 = vmatmul.mubr.msk.f32.vlgmr.msra.gmra.mrb[0].mxu0 %vm1819_vm1, %v6819_v29  ;;  %4280 = vmatmul.mubr.msk.f32.vlgmr.msra.gmra.mrb[0].mxu1 %vm1819_vm1, %v6838_v17  ;;  %v6882_v23 = vadd.f32 %v6814_v16, %v1744_v32  ;;  %v6885_v38 = vadd.f32 %v6814_v16, %v1746_v52  ;;  %v4495_v49 = vpack.c.bf16 %v6826_v50, %v1771_v18  ;;  %v1634_v50 = vld [vmem:[%s6681_s28 + $0x98] sm:$0xff]  ;;  %v6978_v52 = vld [vmem:[%s8337_s5 + $0x30] sm:$0xff] }
 0x31b   : > { %4484 = vmatprep.subr.bf16.mxu1 %v4483_v30  ;;  %4488 = vmatprep.subr.bf16.mxu0 %v4487_v19  ;;  %v6906_v30 = vld [vmem:[%s8337_s5 + $0x80] sm:$0xff]  ;;  %v1688_v19 = vmul.f32 %v6692_v5, %v1595_v3  ;;  %v1675_v63 = vmul.f32 %v6674_v51, %v1582_v59  ;;  %v1702_v13 = vmul.f32 %v6793_v22, %v1609_v31  ;;  %v7012_v18 = vld [vmem:[%s8337_s5 + $0x48] sm:$0xff]  ;;  %v7023_v3 = vld [vmem:[%s8337_s5 + $0x50] sm:$0xff] }
 0x31c   : > { %4486 = vmatpush1.bf16.msra.mxu1 %v4485_v41  ;;  %4490 = vmatpush1.bf16.msra.mxu0 %v4489_v39  ;;  %v1608_v41 = vld [vmem:[%s6676_s16 + $0x100] sm:$0xff]  ;;  %v1648_v39 = vld [vmem:[%s6681_s28 + $0x108] sm:$0xff]  ;;  %v1680_v58 = vmul.f32 %v6674_v51, %v1587_v42  ;;  %s4514_s16 = smul.u32 1872, %s1167_s1 }
 0x31d   : > { %2051 = vmatprep.subr.mxu1 %v1791_v35  ;;  %2224 = vmatprep.subr.mxu0 %v1793_v8  ;;  %v1727_v48 = vadd.f32 %v1688_v19, %v1634_v50  ;;  %v1693_v35 = vmul.f32 %v6692_v5, %v1600_v36  ;;  %v1714_v25 = vadd.f32 %v1675_v63, %v1621_v61  ;;  %v6951_v5 = vld [vmem:[%s8337_s5 + $0x20] sm:$0xff]  ;;  %s3308_s1 = smul.u32 (%p5481_p6), 13, %s5197_s23 }
 0x31e   : > { %1944 = vmatprep.mubr.f32.mxu0 %v5404_v53  ;;  %2028 = vmatprep.mubr.f32.mxu1 %v5404_v53  ;;  %v1701_v54 = vmul.f32 %v6793_v22, %v1608_v41  ;;  %v1741_v11 = vadd.f32 %v1702_v13, %v1648_v39  ;;  %v1719_v9 = vadd.f32 %v1680_v58, %v1626_v0  ;;  %s7319_s21 = scalar_lea.vmem [#allocation4], %s4514_s16  }
 0x31f   : > { %4267 = vmatmul.mubr.msk.f32.gmra.mrb[2].mxu0 %vm1819_vm1, %v6863_v27  ;;  %4281 = vmatmul.mubr.msk.f32.gmra.mrb[2].mxu1 %vm1819_vm1, %v6868_v40  ;;  %v1781_v21 = vadd.f32 %v6719_v55, %v1727_v48  ;;  %v1768_v22 = vadd.f32 %v6705_v37, %v1714_v25  ;;  %v1732_v45 = vadd.f32 %v1693_v35, %v1639_v10  ;;  %s3309_s9 = ssub.s32 (%p5481_p6), 25, %s3308_s1 }
 0x320   : > { %2052 = vmatpush1.msra.mxu1 %v1790_v43  ;;  %2225 = vmatpush1.msra.mxu0 %v1792_v4  ;;  %v1740_v24 = vadd.f32 %v1701_v54, %v1647_v47  ;;  %v1795_v51 = vadd.f32 %v6814_v16, %v1741_v11  ;;  %v1773_v44 = vadd.f32 %v6705_v37, %v1719_v9  ;;  %v6990_v37 = vld [vmem:[%s8337_s5 + $0x38] sm:$0xff]  ;;  %v7045_v4 = vld [vmem:[%s8337_s5 + $0x60] sm:$0xff]  ;;  %p3310_p9 = scmp.lt.s32.totalorder (%p5481_p6), %s3309_s9, 13 }
 0x321   : > { %4492 = vmatprep.subr.bf16.mxu1 %v4491_v14  ;;  %4496 = vmatprep.subr.bf16.mxu0 %v4495_v49  ;;  %v4493_v57 = vpack.c.bf16 %v1781_v21, %v1768_v22  ;;  %v1786_v8 = vadd.f32 %v6719_v55, %v1732_v45  ;;  %v7034_v43 = vld [vmem:[%s8337_s5 + $0x58] sm:$0xff]  ;;  %v7056_v14 = vld [vmem:[%s8337_s5 + $0x68] sm:$0xff]  ;;  %v1797_v49 = vadd.f32 %v6814_v16, %v6858_v6 }
 0x322   : > { %1950 = vmatprep.mubr.f32.mxu0 %v5404_v53  ;;  %2034 = vmatprep.mubr.f32.mxu1 %v5404_v53  ;;  %v1794_v32 = vadd.f32 %v6814_v16, %v1740_v24 }
 0x323   : > { %4268 = vmatmul.mubr.msk.f32.gmra.mrb[4].mxu0 %vm1819_vm1, %v6901_v56  ;;  %4282 = vmatmul.mubr.msk.f32.gmra.mrb[4].mxu1 %vm1819_vm1, %v6906_v30  ;;  %v4499_v55 = vpack.c.bf16 %v1786_v8, %v1773_v44 }
 0x324   : > { %1956 = vmatprep.mubr.f32.mxu0 %v5404_v53  ;;  %2040 = vmatprep.mubr.f32.mxu1 %v5404_v53 }
 0x327   : > { %4269 = vmatmul.mubr.msk.f32.gmra.mrb[6].mxu0 %vm1819_vm1, %v6928_v62  ;;  %4283 = vmatmul.mubr.msk.f32.gmra.mrb[6].mxu1 %vm1819_vm1, %v6933_v46 }
 0x328   : > { %1962 = vmatprep.mubr.f32.mxu0 %v5404_v53  ;;  %2111 = vmatprep.mubr.f32.mxu1 %v5404_v53 }
 0x32b   : > { %4270 = vmatmul.mubr.msk.f32.gmra.mrb[8].mxu0 %vm1819_vm1, %v6951_v5  ;;  %4284 = vmatmul.mubr.msk.f32.vlgmr.msra.gmra.mrb[8].mxu1 %vm1819_vm1, %v6819_v29 }
 0x32c   : > { %4494 = vmatpush1.bf16.msra.mxu1 %v4493_v57  ;;  %1968 = vmatprep.mubr.f32.mxu0 %v5404_v53 }
 0x32d   : > { %2397 = vmatprep.subr.mxu1 %v1795_v51  ;;  %2117 = vmatprep.mubr.f32.mxu1 %v5404_v53 }
 0x32f   : > { %4271 = vmatmul.mubr.msk.f32.gmra.mrb[10].mxu0 %vm1819_vm1, %v6965_v12  ;;  %4285 = vmatmul.mubr.msk.f32.gmra.mrb[10].mxu1 %vm1819_vm1, %v6863_v27 }
 0x330   : > { %2398 = vmatpush1.msra.mxu1 %v1794_v32  ;;  %1974 = vmatprep.mubr.f32.mxu0 %v5404_v53 }
 0x331   : > { %4500 = vmatprep.subr.bf16.mxu1 %v4499_v55  ;;  %2123 = vmatprep.mubr.f32.mxu1 %v5404_v53 }
 0x333   : > { %4272 = vmatmul.mubr.msk.f32.gmra.mrb[12].mxu0 %vm1819_vm1, %v6978_v52  ;;  %4286 = vmatmul.mubr.msk.f32.gmra.mrb[12].mxu1 %vm1819_vm1, %v6901_v56 }
 0x334   : > { %1980 = vmatprep.mubr.f32.mxu0 %v5404_v53  ;;  %2129 = vmatprep.mubr.f32.mxu1 %v5404_v53 }
 0x337   : > { %4273 = vmatmul.mubr.msk.f32.gmra.mrb[14].mxu0 %vm1819_vm1, %v6990_v37  ;;  %4287 = vmatmul.mubr.msk.f32.gmra.mrb[14].mxu1 %vm1819_vm1, %v6928_v62 }
 0x338   : > { %1986 = vmatprep.mubr.f32.mxu0 %v5404_v53  ;;  %2135 = vmatprep.mubr.f32.mxu1 %v5404_v53 }
 0x33b   : > { %4274 = vmatmul.mubr.msk.f32.gmra.mrb[16].mxu0 %vm1819_vm1, %v7001_v7  ;;  %4288 = vmatmul.mubr.msk.f32.gmra.mrb[16].mxu1 %vm1819_vm1, %v6951_v5 }
 0x33c   : > { %1992 = vmatprep.mubr.f32.mxu0 %v5404_v53  ;;  %2141 = vmatprep.mubr.f32.mxu1 %v5404_v53 }
 0x33f   : > { %4275 = vmatmul.mubr.msk.f32.gmra.mrb[18].mxu0 %vm1819_vm1, %v7012_v18  ;;  %4289 = vmatmul.mubr.msk.f32.gmra.mrb[18].mxu1 %vm1819_vm1, %v6965_v12 }
 0x340   : > { %1998 = vmatprep.mubr.f32.mxu0 %v5404_v53  ;;  %2147 = vmatprep.mubr.f32.mxu1 %v5404_v53 }
 0x343   : > { %4276 = vmatmul.mubr.msk.f32.gmra.mrb[20].mxu0 %vm1819_vm1, %v7023_v3  ;;  %4290 = vmatmul.mubr.msk.f32.gmra.mrb[20].mxu1 %vm1819_vm1, %v6978_v52 }
 0x344   : > { %2004 = vmatprep.mubr.f32.mxu0 %v5404_v53  ;;  %2153 = vmatprep.mubr.f32.mxu1 %v5404_v53 }
 0x347   : > { %4277 = vmatmul.mubr.msk.f32.gmra.mrb[22].mxu0 %vm1819_vm1, %v7034_v43  ;;  %4291 = vmatmul.mubr.msk.f32.gmra.mrb[22].mxu1 %vm1819_vm1, %v6990_v37 }
 0x348   : > { %2010 = vmatprep.mubr.f32.mxu0 %v5404_v53  ;;  %2159 = vmatprep.mubr.f32.mxu1 %v5404_v53 }
 0x34b   : > { %4278 = vmatmul.mubr.msk.f32.gmra.mrb[24].mxu0 %vm1819_vm1, %v7045_v4  ;;  %4292 = vmatmul.mubr.msk.f32.gmra.mrb[24].mxu1 %vm1819_vm1, %v7001_v7 }
 0x34c   : > { %2016 = vmatprep.mubr.f32.mxu0 %v5404_v53  ;;  %2165 = vmatprep.mubr.f32.mxu1 %v5404_v53 }
 0x34f   : > { %4279 = vmatmul.mubr.msk.f32.gmra.mrb[26].mxu0 %vm1819_vm1, %v7056_v14  ;;  %4293 = vmatmul.mubr.msk.f32.gmra.mrb[26].mxu1 %vm1819_vm1, %v7012_v18 }
 0x350   : > { %2171 = vmatprep.mubr.f32.mxu1 %v5404_v53  ;;  %2284 = vmatprep.mubr.f32.mxu0 %v5404_v53 }
 0x353   : > { %4294 = vmatmul.mubr.msk.f32.gmra.mrb[28].mxu1 %vm1819_vm1, %v7023_v3  ;;  %4302 = vmatmul.mubr.msk.f32.vlgmr.msra.gmra.mrb[28].mxu0 %vm1819_vm1, %v6819_v29 }
 0x354   : > { %4498 = vmatpush1.bf16.msra.mxu0 %v4497_v60  ;;  %2177 = vmatprep.mubr.f32.mxu1 %v5404_v53 }
 0x355   : > { %2570 = vmatprep.subr.mxu0 %v1797_v49  ;;  %2290 = vmatprep.mubr.f32.mxu0 %v5404_v53 }
 0x357   : > { %4295 = vmatmul.mubr.msk.f32.gmra.mrb[30].mxu1 %vm1819_vm1, %v7034_v43  ;;  %4303 = vmatmul.mubr.msk.f32.gmra.mrb[30].mxu0 %vm1819_vm1, %v6863_v27 }
 0x358   : > { %2571 = vmatpush1.msra.mxu0 %v6875_v1  ;;  %2183 = vmatprep.mubr.f32.mxu1 %v5404_v53 }
 0x359   : > { %4504 = vmatprep.subr.bf16.mxu0 %v6788_v2  ;;  %2296 = vmatprep.mubr.f32.mxu0 %v5404_v53 }
 0x35b   : > { %4296 = vmatmul.mubr.msk.f32.gmra.mrb[32].mxu1 %vm1819_vm1, %v7045_v4  ;;  %4304 = vmatmul.mubr.msk.f32.gmra.mrb[32].mxu0 %vm1819_vm1, %v6901_v56 }
 0x35c   : > { %2189 = vmatprep.mubr.f32.mxu1 %v5404_v53  ;;  %2302 = vmatprep.mubr.f32.mxu0 %v5404_v53 }
 0x35f   : > { %4297 = vmatmul.mubr.msk.f32.gmra.mrb[34].mxu1 %vm1819_vm1, %v7056_v14  ;;  %4305 = vmatmul.mubr.msk.f32.gmra.mrb[34].mxu0 %vm1819_vm1, %v6928_v62 }
 0x360   : > { %2195 = vmatprep.mubr.f32.mxu1 %v5404_v53  ;;  %2308 = vmatprep.mubr.f32.mxu0 %v5404_v53 }
 0x363   : > { %4298 = vmatmul.mubr.msk.f32.gmra.mrb[36].mxu1 %vm1819_vm1, %v6838_v17  ;;  %4306 = vmatmul.mubr.msk.f32.gmra.mrb[36].mxu0 %vm1819_vm1, %v6951_v5 }
 0x364   : > { %2201 = vmatprep.mubr.f32.mxu1 %v5404_v53  ;;  %2314 = vmatprep.mubr.f32.mxu0 %v5404_v53 }
 0x367   : > { %4299 = vmatmul.mubr.msk.f32.gmra.mrb[38].mxu1 %vm1819_vm1, %v6868_v40  ;;  %4307 = vmatmul.mubr.msk.f32.gmra.mrb[38].mxu0 %vm1819_vm1, %v6965_v12 }
 0x368   : > { %2207 = vmatprep.mubr.f32.mxu1 %v5404_v53  ;;  %2320 = vmatprep.mubr.f32.mxu0 %v5404_v53 }
 0x36b   : > { %4300 = vmatmul.mubr.msk.f32.gmra.mrb[40].mxu1 %vm1819_vm1, %v6906_v30  ;;  %4308 = vmatmul.mubr.msk.f32.gmra.mrb[40].mxu0 %vm1819_vm1, %v6978_v52 }
 0x36c   : > { %2213 = vmatprep.mubr.f32.mxu1 %v5404_v53  ;;  %2326 = vmatprep.mubr.f32.mxu0 %v5404_v53 }
 0x36f   : > { %4301 = vmatmul.mubr.msk.f32.gmra.mrb[42].mxu1 %vm1819_vm1, %v6933_v46  ;;  %4309 = vmatmul.mubr.msk.f32.gmra.mrb[42].mxu0 %vm1819_vm1, %v6990_v37 }
 0x370   : > { %2332 = vmatprep.mubr.f32.mxu0 %v5404_v53  ;;  %2457 = vmatprep.mubr.f32.mxu1 %v5404_v53 }
 0x373   : > { %4310 = vmatmul.mubr.msk.f32.gmra.mrb[44].mxu0 %vm1819_vm1, %v7001_v7  ;;  %4320 = vmatmul.mubr.msk.f32.vlgmr.msra.gmra.mrb[44].mxu1 %vm1819_vm1, %v6819_v29 }
 0x374   : > { %4502 = vmatpush1.bf16.msra.mxu1 %v4501_v28  ;;  %2338 = vmatprep.mubr.f32.mxu0 %v5404_v53 }
 0x375   : > { %2743 = vmatprep.subr.mxu1 %v6879_v20  ;;  %2463 = vmatprep.mubr.f32.mxu1 %v5404_v53 }
 0x377   : > { %4311 = vmatmul.mubr.msk.f32.gmra.mrb[46].mxu0 %vm1819_vm1, %v7012_v18  ;;  %4321 = vmatmul.mubr.msk.f32.gmra.mrb[46].mxu1 %vm1819_vm1, %v6863_v27 }
 0x378   : > { %2744 = vmatpush1.msra.mxu1 %v6882_v23  ;;  %2344 = vmatprep.mubr.f32.mxu0 %v5404_v53 }
 0x379   : > { %2469 = vmatprep.mubr.f32.mxu1 %v5404_v53 }
 0x37b   : > { %4312 = vmatmul.mubr.msk.f32.gmra.mrb[48].mxu0 %vm1819_vm1, %v7023_v3  ;;  %4322 = vmatmul.mubr.msk.f32.gmra.mrb[48].mxu1 %vm1819_vm1, %v6901_v56 }
 0x37c   : > { %2350 = vmatprep.mubr.f32.mxu0 %v5404_v53  ;;  %2475 = vmatprep.mubr.f32.mxu1 %v5404_v53 }
 0x37f   : > { %4313 = vmatmul.mubr.msk.f32.gmra.mrb[50].mxu0 %vm1819_vm1, %v7034_v43  ;;  %4323 = vmatmul.mubr.msk.f32.gmra.mrb[50].mxu1 %vm1819_vm1, %v6928_v62 }
 0x380   : > { %2356 = vmatprep.mubr.f32.mxu0 %v5404_v53  ;;  %2481 = vmatprep.mubr.f32.mxu1 %v5404_v53 }
 0x383   : > { %4314 = vmatmul.mubr.msk.f32.gmra.mrb[52].mxu0 %vm1819_vm1, %v7045_v4  ;;  %4324 = vmatmul.mubr.msk.f32.gmra.mrb[52].mxu1 %vm1819_vm1, %v6951_v5 }
 0x384   : > { %2362 = vmatprep.mubr.f32.mxu0 %v5404_v53  ;;  %2487 = vmatprep.mubr.f32.mxu1 %v5404_v53 }
 0x387   : > { %4315 = vmatmul.mubr.msk.f32.gmra.mrb[54].mxu0 %vm1819_vm1, %v7056_v14  ;;  %4325 = vmatmul.mubr.msk.f32.gmra.mrb[54].mxu1 %vm1819_vm1, %v6965_v12 }
 0x388   : > { %2368 = vmatprep.mubr.f32.mxu0 %v5404_v53  ;;  %2493 = vmatprep.mubr.f32.mxu1 %v5404_v53 }
 0x38b   : > { %4316 = vmatmul.mubr.msk.f32.gmra.mrb[56].mxu0 %vm1819_vm1, %v6838_v17  ;;  %4326 = vmatmul.mubr.msk.f32.gmra.mrb[56].mxu1 %vm1819_vm1, %v6978_v52 }
 0x38c   : > { %2374 = vmatprep.mubr.f32.mxu0 %v5404_v53  ;;  %2499 = vmatprep.mubr.f32.mxu1 %v5404_v53 }
 0x38f   : > { %4317 = vmatmul.mubr.msk.f32.gmra.mrb[58].mxu0 %vm1819_vm1, %v6868_v40  ;;  %4327 = vmatmul.mubr.msk.f32.gmra.mrb[58].mxu1 %vm1819_vm1, %v6990_v37 }
 0x390   : > { %2380 = vmatprep.mubr.f32.mxu0 %v5404_v53  ;;  %2505 = vmatprep.mubr.f32.mxu1 %v5404_v53 }
 0x393   : > { %4318 = vmatmul.mubr.msk.f32.gmra.mrb[60].mxu0 %vm1819_vm1, %v6906_v30  ;;  %4328 = vmatmul.mubr.msk.f32.gmra.mrb[60].mxu1 %vm1819_vm1, %v7001_v7 }
 0x394   : > { %2386 = vmatprep.mubr.f32.mxu0 %v5404_v53  ;;  %2511 = vmatprep.mubr.f32.mxu1 %v5404_v53 }
 0x397   : > { %4319 = vmatmul.mubr.msk.f32.gmra.mrb[62].mxu0 %vm1819_vm1, %v6933_v46  ;;  %4329 = vmatmul.mubr.msk.f32.gmra.mrb[62].mxu1 %vm1819_vm1, %v7012_v18 }
 0x398   : > { %2630 = vmatprep.mubr.f32.mxu0 %v5404_v53  ;;  %2517 = vmatprep.mubr.f32.mxu1 %v5404_v53 }
 0x39b   : > { %4338 = vmatmul.mubr.msk.f32.vlgmr.msra.gmra.mrb[64].mxu0 %vm1819_vm1, %v6819_v29  ;;  %4330 = vmatmul.mubr.msk.f32.gmra.mrb[64].mxu1 %vm1819_vm1, %v7023_v3 }
 0x39c   : > { %4506 = vmatpush3.bf16.msra.mxu0 %v6788_v2  ;;  %2636 = vmatprep.mubr.f32.mxu0 %v5404_v53 }
 0x39d   : > { %4450 = vmatprep.subr.mxu0 %v6885_v38  ;;  %2523 = vmatprep.mubr.f32.mxu1 %v5404_v53 }
 0x39f   : > { %4339 = vmatmul.mubr.msk.f32.gmra.mrb[66].mxu0 %vm1819_vm1, %v6863_v27  ;;  %4331 = vmatmul.mubr.msk.f32.gmra.mrb[66].mxu1 %vm1819_vm1, %v7034_v43 }
 0x3a0   : > { %4451 = vmatpush3.msra.mxu0 %v6885_v38  ;;  %2642 = vmatprep.mubr.f32.mxu0 %v5404_v53 }
 0x3a1   : > { %2529 = vmatprep.mubr.f32.mxu1 %v5404_v53 }
 0x3a3   : > { %4340 = vmatmul.mubr.msk.f32.gmra.mrb[68].mxu0 %vm1819_vm1, %v6901_v56  ;;  %4332 = vmatmul.mubr.msk.f32.gmra.mrb[68].mxu1 %vm1819_vm1, %v7045_v4 }
 0x3a4   : > { %2648 = vmatprep.mubr.f32.mxu0 %v5404_v53  ;;  %2535 = vmatprep.mubr.f32.mxu1 %v5404_v53 }
 0x3a7   : > { %4341 = vmatmul.mubr.msk.f32.gmra.mrb[70].mxu0 %vm1819_vm1, %v6928_v62  ;;  %4333 = vmatmul.mubr.msk.f32.gmra.mrb[70].mxu1 %vm1819_vm1, %v7056_v14 }
 0x3a8   : > { %2654 = vmatprep.mubr.f32.mxu0 %v5404_v53  ;;  %2541 = vmatprep.mubr.f32.mxu1 %v5404_v53 }
 0x3ab   : > { %4342 = vmatmul.mubr.msk.f32.gmra.mrb[72].mxu0 %vm1819_vm1, %v6951_v5  ;;  %4334 = vmatmul.mubr.msk.f32.gmra.mrb[72].mxu1 %vm1819_vm1, %v6838_v17 }
 0x3ac   : > { %2660 = vmatprep.mubr.f32.mxu0 %v5404_v53  ;;  %2547 = vmatprep.mubr.f32.mxu1 %v5404_v53 }
 0x3af   : > { %4343 = vmatmul.mubr.msk.f32.gmra.mrb[74].mxu0 %vm1819_vm1, %v6965_v12  ;;  %4335 = vmatmul.mubr.msk.f32.gmra.mrb[74].mxu1 %vm1819_vm1, %v6868_v40 }
 0x3b0   : > { %2666 = vmatprep.mubr.f32.mxu0 %v5404_v53  ;;  %2553 = vmatprep.mubr.f32.mxu1 %v5404_v53 }
 0x3b3   : > { %4344 = vmatmul.mubr.msk.f32.gmra.mrb[76].mxu0 %vm1819_vm1, %v6978_v52  ;;  %4336 = vmatmul.mubr.msk.f32.gmra.mrb[76].mxu1 %vm1819_vm1, %v6906_v30 }
 0x3b4   : > { %2672 = vmatprep.mubr.f32.mxu0 %v5404_v53  ;;  %2559 = vmatprep.mubr.f32.mxu1 %v5404_v53 }
 0x3b7   : > { %4345 = vmatmul.mubr.msk.f32.gmra.mrb[78].mxu0 %vm1819_vm1, %v6990_v37  ;;  %4337 = vmatmul.mubr.msk.f32.gmra.mrb[78].mxu1 %vm1819_vm1, %v6933_v46 }
 0x3b8   : > { %2678 = vmatprep.mubr.f32.mxu0 %v5404_v53  ;;  %2803 = vmatprep.mubr.f32.mxu1 %v5404_v53 }
 0x3bb   : > { %4346 = vmatmul.mubr.msk.f32.gmra.mrb[80].mxu0 %vm1819_vm1, %v7001_v7  ;;  %4356 = vmatmul.mubr.msk.f32.vlgmr.msra.gmra.mrb[80].mxu1 %vm1819_vm1, %v6819_v29 }
 0x3bc   : > { %2684 = vmatprep.mubr.f32.mxu0 %v5404_v53  ;;  %2809 = vmatprep.mubr.f32.mxu1 %v5404_v53 }
 0x3bf   : > { %4347 = vmatmul.mubr.msk.f32.gmra.mrb[82].mxu0 %vm1819_vm1, %v7012_v18  ;;  %4357 = vmatmul.mubr.msk.f32.gmra.mrb[82].mxu1 %vm1819_vm1, %v6863_v27 }
 0x3c0   : > { %2690 = vmatprep.mubr.f32.mxu0 %v5404_v53  ;;  %2815 = vmatprep.mubr.f32.mxu1 %v5404_v53 }
 0x3c3   : > { %4348 = vmatmul.mubr.msk.f32.gmra.mrb[84].mxu0 %vm1819_vm1, %v7023_v3  ;;  %4358 = vmatmul.mubr.msk.f32.gmra.mrb[84].mxu1 %vm1819_vm1, %v6901_v56 }
 0x3c4   : > { %2696 = vmatprep.mubr.f32.mxu0 %v5404_v53  ;;  %2821 = vmatprep.mubr.f32.mxu1 %v5404_v53 }
 0x3c7   : > { %4349 = vmatmul.mubr.msk.f32.gmra.mrb[86].mxu0 %vm1819_vm1, %v7034_v43  ;;  %4359 = vmatmul.mubr.msk.f32.gmra.mrb[86].mxu1 %vm1819_vm1, %v6928_v62 }
 0x3c8   : > { %2702 = vmatprep.mubr.f32.mxu0 %v5404_v53  ;;  %2827 = vmatprep.mubr.f32.mxu1 %v5404_v53 }
 0x3cb   : > { %4350 = vmatmul.mubr.msk.f32.gmra.mrb[88].mxu0 %vm1819_vm1, %v7045_v4  ;;  %4360 = vmatmul.mubr.msk.f32.gmra.mrb[88].mxu1 %vm1819_vm1, %v6951_v5 }
 0x3cc   : > { %2708 = vmatprep.mubr.f32.mxu0 %v5404_v53  ;;  %2833 = vmatprep.mubr.f32.mxu1 %v5404_v53 }
 0x3cf   : > { %4351 = vmatmul.mubr.msk.f32.gmra.mrb[90].mxu0 %vm1819_vm1, %v7056_v14  ;;  %4361 = vmatmul.mubr.msk.f32.gmra.mrb[90].mxu1 %vm1819_vm1, %v6965_v12 }
 0x3d0   : > { %2714 = vmatprep.mubr.f32.mxu0 %v5404_v53  ;;  %2839 = vmatprep.mubr.f32.mxu1 %v5404_v53 }
 0x3d3   : > { %4352 = vmatmul.mubr.msk.f32.gmra.mrb[92].mxu0 %vm1819_vm1, %v6838_v17  ;;  %4362 = vmatmul.mubr.msk.f32.gmra.mrb[92].mxu1 %vm1819_vm1, %v6978_v52 }
 0x3d4   : > { %2720 = vmatprep.mubr.f32.mxu0 %v5404_v53  ;;  %2845 = vmatprep.mubr.f32.mxu1 %v5404_v53 }
 0x3d7   : > { %4353 = vmatmul.mubr.msk.f32.gmra.mrb[94].mxu0 %vm1819_vm1, %v6868_v40  ;;  %4363 = vmatmul.mubr.msk.f32.gmra.mrb[94].mxu1 %vm1819_vm1, %v6990_v37 }
 0x3d8   : > { %2726 = vmatprep.mubr.f32.mxu0 %v5404_v53  ;;  %2851 = vmatprep.mubr.f32.mxu1 %v5404_v53 }
 0x3db   : > { %4354 = vmatmul.mubr.msk.f32.gmra.mrb[96].mxu0 %vm1819_vm1, %v6906_v30  ;;  %4364 = vmatmul.mubr.msk.f32.gmra.mrb[96].mxu1 %vm1819_vm1, %v7001_v7 }
 0x3dc   : > { %2732 = vmatprep.mubr.f32.mxu0 %v5404_v53  ;;  %2857 = vmatprep.mubr.f32.mxu1 %v5404_v53 }
 0x3df   : > { %4355 = vmatmul.mubr.msk.f32.gmra.mrb[98].mxu0 %vm1819_vm1, %v6933_v46  ;;  %4365 = vmatmul.mubr.msk.f32.gmra.mrb[98].mxu1 %vm1819_vm1, %v7012_v18 }
 0x3e0   : > { %4452 = vmatprep.mubr.msk.f32.mxu0 %vm1819_vm1, %v6819_v29  ;;  %2863 = vmatprep.mubr.f32.mxu1 %v5404_v53 }
 0x3e3   : > { %4453 = vmatmul.mubr.msk.f32.vlgmr.msra.gmra.mrb[100].mxu0 %vm1819_vm1, %v6863_v27  ;;  %4366 = vmatmul.mubr.msk.f32.gmra.mrb[100].mxu1 %vm1819_vm1, %v7023_v3 }
 0x3e4   : > { %4455 = vmatprep.mubr.msk.f32.mxu0 %vm1819_vm1, %v6901_v56  ;;  %2869 = vmatprep.mubr.f32.mxu1 %v5404_v53 }
 0x3e7   : > { %4456 = vmatmul.mubr.msk.f32.gmra.mrb[102].mxu0 %vm1819_vm1, %v6928_v62  ;;  %4367 = vmatmul.mubr.msk.f32.gmra.mrb[102].mxu1 %vm1819_vm1, %v7034_v43 }
 0x3e8   : > { %4458 = vmatprep.mubr.msk.f32.mxu0 %vm1819_vm1, %v6951_v5  ;;  %2875 = vmatprep.mubr.f32.mxu1 %v5404_v53 }
 0x3eb   : > { %4459 = vmatmul.mubr.msk.f32.gmra.mrb[104].mxu0 %vm1819_vm1, %v6965_v12  ;;  %4368 = vmatmul.mubr.msk.f32.gmra.mrb[104].mxu1 %vm1819_vm1, %v7045_v4 }
 0x3ec   : > { %4461 = vmatprep.mubr.msk.f32.mxu0 %vm1819_vm1, %v6978_v52  ;;  %2881 = vmatprep.mubr.f32.mxu1 %v5404_v53 }
 0x3ed   : > { %v1940_v34 = vpop.f32.mrb[0].mxu0  ;;  %v2024_v33 = vpop.f32.mrb[0].mxu1 }
 0x3ee   : > { %3067 = vst [vmem:[%s7319_s21] sm:$0xff] %v1940_v34  ;;  %v1942_v26 = vpop.f32.mrb[1].mxu0  ;;  %3249 = vst [vmem:[%s7319_s21 + $0x5b0] sm:$0xff] %v2024_v33  ;;  %v2026_v60 = vpop.f32.mrb[1].mxu1 }
 0x3ef   : > { %3068 = vst [vmem:[%s7319_s21 + $0x8] sm:$0xff] %v1942_v26  ;;  %4462 = vmatmul.mubr.msk.f32.gmra.mrb[106].mxu0 %vm1819_vm1, %v6990_v37  ;;  %3250 = vst [vmem:[%s7319_s21 + $0x5b8] sm:$0xff] %v2026_v60  ;;  %4369 = vmatmul.mubr.msk.f32.gmra.mrb[106].mxu1 %vm1819_vm1, %v7056_v14 }
 0x3f0   : > { %4464 = vmatprep.mubr.msk.f32.mxu0 %vm1819_vm1, %v7001_v7  ;;  %2887 = vmatprep.mubr.f32.mxu1 %v5404_v53 }
 0x3f2   : > { %v1946_v2 = vpop.f32.mrb[2].mxu0  ;;  %v2030_v15 = vpop.f32.mrb[2].mxu1 }
 0x3f3   : > { %3080 = vst [vmem:[%s7319_s21 + $0x68] sm:$0xff] %v1946_v2  ;;  %v1948_v16 = vpop.f32.mrb[3].mxu0  ;;  %4465 = vmatmul.mubr.msk.f32.gmra.mrb[108].mxu0 %vm1819_vm1, %v7012_v18  ;;  %3262 = vst [vmem:[%s7319_s21 + $0x618] sm:$0xff] %v2030_v15  ;;  %v2032_v29 = vpop.f32.mrb[3].mxu1  ;;  %4370 = vmatmul.mubr.msk.f32.gmra.mrb[108].mxu1 %vm1819_vm1, %v6838_v17 }
 0x3f4   : > { %3081 = vst [vmem:[%s7319_s21 + $0x70] sm:$0xff] %v1948_v16  ;;  %4467 = vmatprep.mubr.msk.f32.mxu0 %vm1819_vm1, %v7023_v3  ;;  %3263 = vst [vmem:[%s7319_s21 + $0x620] sm:$0xff] %v2032_v29  ;;  %2893 = vmatprep.mubr.f32.mxu1 %v5404_v53 }
 0x3f6   : > { %v1952_v28 = vpop.f32.mrb[4].mxu0  ;;  %v2036_v6 = vpop.f32.mrb[4].mxu1 }
 0x3f7   : > { %3093 = vst [vmem:[%s7319_s21 + $0xd0] sm:$0xff] %v1952_v28  ;;  %v1954_v27 = vpop.f32.mrb[5].mxu0  ;;  %4468 = vmatmul.mubr.msk.f32.gmra.mrb[110].mxu0 %vm1819_vm1, %v7034_v43  ;;  %3275 = vst [vmem:[%s7319_s21 + $0x680] sm:$0xff] %v2036_v6  ;;  %v2038_v1 = vpop.f32.mrb[5].mxu1  ;;  %4371 = vmatmul.mubr.msk.f32.gmra.mrb[110].mxu1 %vm1819_vm1, %v6868_v40 }
 0x3f8   : > { %3094 = vst [vmem:[%s7319_s21 + $0xd8] sm:$0xff] %v1954_v27  ;;  %4470 = vmatprep.mubr.msk.f32.mxu0 %vm1819_vm1, %v7045_v4  ;;  %3276 = vst [vmem:[%s7319_s21 + $0x688] sm:$0xff] %v2038_v1  ;;  %2899 = vmatprep.mubr.f32.mxu1 %v5404_v53 }
 0x3fa   : > { %v1958_v20 = vpop.f32.mrb[6].mxu0  ;;  %v2042_v23 = vpop.f32.mrb[6].mxu1 }
 0x3fb   : > { %3106 = vst [vmem:[%s7319_s21 + $0x138] sm:$0xff] %v1958_v20  ;;  %v1960_v38 = vpop.f32.mrb[7].mxu0  ;;  %4471 = vmatmul.mubr.msk.f32.gmra.mrb[112].mxu0 %vm1819_vm1, %v7056_v14  ;;  %3288 = vst [vmem:[%s7319_s21 + $0x6e8] sm:$0xff] %v2042_v23  ;;  %v2044_v59 = vpop.f32.mrb[7].mxu1  ;;  %4372 = vmatmul.mubr.msk.f32.gmra.mrb[112].mxu1 %vm1819_vm1, %v6906_v30 }
 0x3fc   : > { %3107 = vst [vmem:[%s7319_s21 + $0x140] sm:$0xff] %v1960_v38  ;;  %4473 = vmatprep.mubr.msk.f32.mxu0 %vm1819_vm1, %v6838_v17  ;;  %3289 = vst [vmem:[%s7319_s21 + $0x6f0] sm:$0xff] %v2044_v59  ;;  %2905 = vmatprep.mubr.f32.mxu1 %v5404_v53 }
 0x3fe   : > { %v1964_v56 = vpop.f32.mrb[8].mxu0  ;;  %v2113_v19 = vpop.f32.mrb[8].mxu1 }
 0x3ff   : > { %3119 = vst [vmem:[%s7319_s21 + $0x1a0] sm:$0xff] %v1964_v56  ;;  %v1966_v31 = vpop.f32.mrb[9].mxu0  ;;  %4474 = vmatmul.mubr.msk.f32.gmra.mrb[114].mxu0 %vm1819_vm1, %v6868_v40  ;;  %3069 = vst [vmem:[%s7319_s21 + $0x10] sm:$0xff] %v2113_v19  ;;  %v2115_v50 = vpop.f32.mrb[9].mxu1  ;;  %4373 = vmatmul.mubr.msk.f32.gmra.mrb[114].mxu1 %vm1819_vm1, %v6933_v46 }
 0x400   : > { %3120 = vst [vmem:[%s7319_s21 + $0x1a8] sm:$0xff] %v1966_v31  ;;  %4476 = vmatprep.mubr.msk.f32.mxu0 %vm1819_vm1, %v6906_v30  ;;  %3070 = vst [vmem:[%s7319_s21 + $0x18] sm:$0xff] %v2115_v50 }
 0x402   : > { %v1970_v53 = vpop.f32.mrb[10].mxu0  ;;  %v2119_v17 = vpop.f32.mrb[10].mxu1 }
 0x403   : > { %3132 = vst [vmem:[%s7319_s21 + $0x208] sm:$0xff] %v1970_v53  ;;  %v1972_v63 = vpop.f32.mrb[11].mxu0  ;;  %4477 = vmatmul.mubr.msk.f32.gmra.mrb[116].mxu0 %vm1819_vm1, %v6933_v46  ;;  %3082 = vst [vmem:[%s7319_s21 + $0x78] sm:$0xff] %v2119_v17  ;;  %v2121_v40 = vpop.f32.mrb[11].mxu1 }
 0x404   : > { %3133 = vst [vmem:[%s7319_s21 + $0x210] sm:$0xff] %v1972_v63  ;;  %3083 = vst [vmem:[%s7319_s21 + $0x80] sm:$0xff] %v2121_v40 }
 0x406   : > { %v1976_v36 = vpop.f32.mrb[12].mxu0  ;;  %v2125_v30 = vpop.f32.mrb[12].mxu1 }
 0x407   : > { %3145 = vst [vmem:[%s7319_s21 + $0x270] sm:$0xff] %v1976_v36  ;;  %v1978_v61 = vpop.f32.mrb[13].mxu0  ;;  %3095 = vst [vmem:[%s7319_s21 + $0xe0] sm:$0xff] %v2125_v30  ;;  %v2127_v13 = vpop.f32.mrb[13].mxu1 }
 0x408   : > { %3146 = vst [vmem:[%s7319_s21 + $0x278] sm:$0xff] %v1978_v61  ;;  %3096 = vst [vmem:[%s7319_s21 + $0xe8] sm:$0xff] %v2127_v13 }
 0x40a   : > { %v1982_v41 = vpop.f32.mrb[14].mxu0  ;;  %v2131_v42 = vpop.f32.mrb[14].mxu1 }
 0x40b   : > { %3158 = vst [vmem:[%s7319_s21 + $0x2d8] sm:$0xff] %v1982_v41  ;;  %v1984_v62 = vpop.f32.mrb[15].mxu0  ;;  %3108 = vst [vmem:[%s7319_s21 + $0x148] sm:$0xff] %v2131_v42  ;;  %v2133_v46 = vpop.f32.mrb[15].mxu1 }
 0x40c   : > { %3159 = vst [vmem:[%s7319_s21 + $0x2e0] sm:$0xff] %v1984_v62  ;;  %3109 = vst [vmem:[%s7319_s21 + $0x150] sm:$0xff] %v2133_v46 }
 0x40e   : > { %v1988_v48 = vpop.f32.mrb[16].mxu0  ;;  %v2137_v39 = vpop.f32.mrb[16].mxu1 }
 0x40f   : > { %3171 = vst [vmem:[%s7319_s21 + $0x340] sm:$0xff] %v1988_v48  ;;  %v1990_v35 = vpop.f32.mrb[17].mxu0  ;;  %3121 = vst [vmem:[%s7319_s21 + $0x1b0] sm:$0xff] %v2137_v39  ;;  %v2139_v25 = vpop.f32.mrb[17].mxu1 }
 0x410   : > { %3172 = vst [vmem:[%s7319_s21 + $0x348] sm:$0xff] %v1990_v35  ;;  %3122 = vst [vmem:[%s7319_s21 + $0x1b8] sm:$0xff] %v2139_v25 }
 0x412   : > { %v1994_v21 = vpop.f32.mrb[18].mxu0  ;;  %v2143_v54 = vpop.f32.mrb[18].mxu1 }
 0x413   : > { %3184 = vst [vmem:[%s7319_s21 + $0x3a8] sm:$0xff] %v1994_v21  ;;  %v1996_v10 = vpop.f32.mrb[19].mxu0  ;;  %3134 = vst [vmem:[%s7319_s21 + $0x218] sm:$0xff] %v2143_v54  ;;  %v2145_v11 = vpop.f32.mrb[19].mxu1 }
 0x414   : > { %3185 = vst [vmem:[%s7319_s21 + $0x3b0] sm:$0xff] %v1996_v10  ;;  %3135 = vst [vmem:[%s7319_s21 + $0x220] sm:$0xff] %v2145_v11 }
 0x416   : > { %v2000_v47 = vpop.f32.mrb[20].mxu0  ;;  %v2149_v58 = vpop.f32.mrb[20].mxu1 }
 0x417   : > { %3197 = vst [vmem:[%s7319_s21 + $0x410] sm:$0xff] %v2000_v47  ;;  %v2002_v5 = vpop.f32.mrb[21].mxu0  ;;  %3147 = vst [vmem:[%s7319_s21 + $0x280] sm:$0xff] %v2149_v58  ;;  %v2151_v22 = vpop.f32.mrb[21].mxu1 }
 0x418   : > { %3198 = vst [vmem:[%s7319_s21 + $0x418] sm:$0xff] %v2002_v5  ;;  %3148 = vst [vmem:[%s7319_s21 + $0x288] sm:$0xff] %v2151_v22 }
 0x41a   : > { %v2006_v0 = vpop.f32.mrb[22].mxu0  ;;  %v2155_v45 = vpop.f32.mrb[22].mxu1 }
 0x41b   : > { %3210 = vst [vmem:[%s7319_s21 + $0x478] sm:$0xff] %v2006_v0  ;;  %v2008_v57 = vpop.f32.mrb[23].mxu0  ;;  %3160 = vst [vmem:[%s7319_s21 + $0x2e8] sm:$0xff] %v2155_v45  ;;  %v2157_v24 = vpop.f32.mrb[23].mxu1 }
 0x41c   : > { %3211 = vst [vmem:[%s7319_s21 + $0x480] sm:$0xff] %v2008_v57  ;;  %3161 = vst [vmem:[%s7319_s21 + $0x2f0] sm:$0xff] %v2157_v24 }
 0x41e   : > { %v2012_v51 = vpop.f32.mrb[24].mxu0  ;;  %v2161_v9 = vpop.f32.mrb[24].mxu1 }
 0x41f   : > { %3223 = vst [vmem:[%s7319_s21 + $0x4e0] sm:$0xff] %v2012_v51  ;;  %v2014_v8 = vpop.f32.mrb[25].mxu0  ;;  %3173 = vst [vmem:[%s7319_s21 + $0x350] sm:$0xff] %v2161_v9  ;;  %v2163_v12 = vpop.f32.mrb[25].mxu1 }
 0x420   : > { %3224 = vst [vmem:[%s7319_s21 + $0x4e8] sm:$0xff] %v2014_v8  ;;  %3174 = vst [vmem:[%s7319_s21 + $0x358] sm:$0xff] %v2163_v12 }
 0x422   : > { %v2018_v44 = vpop.f32.mrb[26].mxu0  ;;  %v2167_v32 = vpop.f32.mrb[26].mxu1 }
 0x423   : > { %3236 = vst [vmem:[%s7319_s21 + $0x548] sm:$0xff] %v2018_v44  ;;  %v2020_v55 = vpop.f32.mrb[27].mxu0  ;;  %3186 = vst [vmem:[%s7319_s21 + $0x3b8] sm:$0xff] %v2167_v32  ;;  %v2169_v52 = vpop.f32.mrb[27].mxu1 }
 0x424   : > { %3237 = vst [vmem:[%s7319_s21 + $0x550] sm:$0xff] %v2020_v55  ;;  %3187 = vst [vmem:[%s7319_s21 + $0x3c0] sm:$0xff] %v2169_v52 }
 0x426   : > { %v2286_v37 = vpop.f32.mrb[28].mxu0  ;;  %v2173_v7 = vpop.f32.mrb[28].mxu1 }
 0x427   : > { %3071 = vst [vmem:[%s7319_s21 + $0x20] sm:$0xff] %v2286_v37  ;;  %v2288_v18 = vpop.f32.mrb[29].mxu0  ;;  %3199 = vst [vmem:[%s7319_s21 + $0x420] sm:$0xff] %v2173_v7  ;;  %v2175_v3 = vpop.f32.mrb[29].mxu1 }
 0x428   : > { %3072 = vst [vmem:[%s7319_s21 + $0x28] sm:$0xff] %v2288_v18  ;;  %3200 = vst [vmem:[%s7319_s21 + $0x428] sm:$0xff] %v2175_v3 }
 0x42a   : > { %v2292_v43 = vpop.f32.mrb[30].mxu0  ;;  %v2179_v4 = vpop.f32.mrb[30].mxu1 }
 0x42b   : > { %3084 = vst [vmem:[%s7319_s21 + $0x88] sm:$0xff] %v2292_v43  ;;  %v2294_v14 = vpop.f32.mrb[31].mxu0  ;;  %3212 = vst [vmem:[%s7319_s21 + $0x488] sm:$0xff] %v2179_v4  ;;  %v2181_v49 = vpop.f32.mrb[31].mxu1 }
 0x42c   : > { %3085 = vst [vmem:[%s7319_s21 + $0x90] sm:$0xff] %v2294_v14  ;;  %3213 = vst [vmem:[%s7319_s21 + $0x490] sm:$0xff] %v2181_v49 }
 0x42e   : > { %v2298_v34 = vpop.f32.mrb[32].mxu0  ;;  %v2185_v33 = vpop.f32.mrb[32].mxu1 }
 0x42f   : > { %3097 = vst [vmem:[%s7319_s21 + $0xf0] sm:$0xff] %v2298_v34  ;;  %v2300_v26 = vpop.f32.mrb[33].mxu0  ;;  %3225 = vst [vmem:[%s7319_s21 + $0x4f0] sm:$0xff] %v2185_v33  ;;  %v2187_v60 = vpop.f32.mrb[33].mxu1 }
 0x430   : > { %3098 = vst [vmem:[%s7319_s21 + $0xf8] sm:$0xff] %v2300_v26  ;;  %3226 = vst [vmem:[%s7319_s21 + $0x4f8] sm:$0xff] %v2187_v60 }
 0x432   : > { %v2304_v2 = vpop.f32.mrb[34].mxu0  ;;  %v2191_v15 = vpop.f32.mrb[34].mxu1 }
 0x433   : > { %3110 = vst [vmem:[%s7319_s21 + $0x158] sm:$0xff] %v2304_v2  ;;  %v2306_v16 = vpop.f32.mrb[35].mxu0  ;;  %3238 = vst [vmem:[%s7319_s21 + $0x558] sm:$0xff] %v2191_v15  ;;  %v2193_v29 = vpop.f32.mrb[35].mxu1 }
 0x434   : > { %3111 = vst [vmem:[%s7319_s21 + $0x160] sm:$0xff] %v2306_v16  ;;  %3239 = vst [vmem:[%s7319_s21 + $0x560] sm:$0xff] %v2193_v29 }
 0x436   : > { %v2310_v28 = vpop.f32.mrb[36].mxu0  ;;  %v2197_v6 = vpop.f32.mrb[36].mxu1 }
 0x437   : > { %3123 = vst [vmem:[%s7319_s21 + $0x1c0] sm:$0xff] %v2310_v28  ;;  %v2312_v27 = vpop.f32.mrb[37].mxu0  ;;  %3251 = vst [vmem:[%s7319_s21 + $0x5c0] sm:$0xff] %v2197_v6  ;;  %v2199_v1 = vpop.f32.mrb[37].mxu1 }
 0x438   : > { %3124 = vst [vmem:[%s7319_s21 + $0x1c8] sm:$0xff] %v2312_v27  ;;  %3252 = vst [vmem:[%s7319_s21 + $0x5c8] sm:$0xff] %v2199_v1 }
 0x43a   : > { %v2316_v20 = vpop.f32.mrb[38].mxu0  ;;  %v2203_v23 = vpop.f32.mrb[38].mxu1 }
 0x43b   : > { %3136 = vst [vmem:[%s7319_s21 + $0x228] sm:$0xff] %v2316_v20  ;;  %v2318_v38 = vpop.f32.mrb[39].mxu0  ;;  %3264 = vst [vmem:[%s7319_s21 + $0x628] sm:$0xff] %v2203_v23  ;;  %v2205_v59 = vpop.f32.mrb[39].mxu1 }
 0x43c   : > { %3137 = vst [vmem:[%s7319_s21 + $0x230] sm:$0xff] %v2318_v38  ;;  %3265 = vst [vmem:[%s7319_s21 + $0x630] sm:$0xff] %v2205_v59 }
 0x43e   : > { %v2322_v56 = vpop.f32.mrb[40].mxu0  ;;  %v2209_v19 = vpop.f32.mrb[40].mxu1 }
 0x43f   : > { %3149 = vst [vmem:[%s7319_s21 + $0x290] sm:$0xff] %v2322_v56  ;;  %v2324_v31 = vpop.f32.mrb[41].mxu0  ;;  %3277 = vst [vmem:[%s7319_s21 + $0x690] sm:$0xff] %v2209_v19  ;;  %v2211_v50 = vpop.f32.mrb[41].mxu1 }
 0x440   : > { %3150 = vst [vmem:[%s7319_s21 + $0x298] sm:$0xff] %v2324_v31  ;;  %3278 = vst [vmem:[%s7319_s21 + $0x698] sm:$0xff] %v2211_v50 }
 0x442   : > { %v2328_v53 = vpop.f32.mrb[42].mxu0  ;;  %v2215_v17 = vpop.f32.mrb[42].mxu1 }
 0x443   : > { %3162 = vst [vmem:[%s7319_s21 + $0x2f8] sm:$0xff] %v2328_v53  ;;  %v2330_v63 = vpop.f32.mrb[43].mxu0  ;;  %3290 = vst [vmem:[%s7319_s21 + $0x6f8] sm:$0xff] %v2215_v17  ;;  %v2217_v40 = vpop.f32.mrb[43].mxu1 }
 0x444   : > { %3163 = vst [vmem:[%s7319_s21 + $0x300] sm:$0xff] %v2330_v63  ;;  %3291 = vst [vmem:[%s7319_s21 + $0x700] sm:$0xff] %v2217_v40 }
 0x446   : > { %v2334_v36 = vpop.f32.mrb[44].mxu0  ;;  %v2459_v30 = vpop.f32.mrb[44].mxu1 }
 0x447   : > { %3175 = vst [vmem:[%s7319_s21 + $0x360] sm:$0xff] %v2334_v36  ;;  %v2336_v61 = vpop.f32.mrb[45].mxu0  ;;  %3073 = vst [vmem:[%s7319_s21 + $0x30] sm:$0xff] %v2459_v30  ;;  %v2461_v13 = vpop.f32.mrb[45].mxu1 }
 0x448   : > { %3176 = vst [vmem:[%s7319_s21 + $0x368] sm:$0xff] %v2336_v61  ;;  %3074 = vst [vmem:[%s7319_s21 + $0x38] sm:$0xff] %v2461_v13 }
 0x44a   : > { %v2340_v41 = vpop.f32.mrb[46].mxu0  ;;  %v2465_v42 = vpop.f32.mrb[46].mxu1 }
 0x44b   : > { %3188 = vst [vmem:[%s7319_s21 + $0x3c8] sm:$0xff] %v2340_v41  ;;  %v2342_v62 = vpop.f32.mrb[47].mxu0  ;;  %3086 = vst [vmem:[%s7319_s21 + $0x98] sm:$0xff] %v2465_v42  ;;  %v2467_v46 = vpop.f32.mrb[47].mxu1 }
 0x44c   : > { %3189 = vst [vmem:[%s7319_s21 + $0x3d0] sm:$0xff] %v2342_v62  ;;  %3087 = vst [vmem:[%s7319_s21 + $0xa0] sm:$0xff] %v2467_v46 }
 0x44e   : > { %v2346_v48 = vpop.f32.mrb[48].mxu0  ;;  %v2471_v39 = vpop.f32.mrb[48].mxu1 }
 0x44f   : > { %3201 = vst [vmem:[%s7319_s21 + $0x430] sm:$0xff] %v2346_v48  ;;  %v2348_v35 = vpop.f32.mrb[49].mxu0  ;;  %3099 = vst [vmem:[%s7319_s21 + $0x100] sm:$0xff] %v2471_v39  ;;  %v2473_v25 = vpop.f32.mrb[49].mxu1 }
 0x450   : > { %3202 = vst [vmem:[%s7319_s21 + $0x438] sm:$0xff] %v2348_v35  ;;  %3100 = vst [vmem:[%s7319_s21 + $0x108] sm:$0xff] %v2473_v25 }
 0x452   : > { %v2352_v21 = vpop.f32.mrb[50].mxu0  ;;  %v2477_v54 = vpop.f32.mrb[50].mxu1 }
 0x453   : > { %3214 = vst [vmem:[%s7319_s21 + $0x498] sm:$0xff] %v2352_v21  ;;  %v2354_v10 = vpop.f32.mrb[51].mxu0  ;;  %3112 = vst [vmem:[%s7319_s21 + $0x168] sm:$0xff] %v2477_v54  ;;  %v2479_v11 = vpop.f32.mrb[51].mxu1 }
 0x454   : > { %3215 = vst [vmem:[%s7319_s21 + $0x4a0] sm:$0xff] %v2354_v10  ;;  %3113 = vst [vmem:[%s7319_s21 + $0x170] sm:$0xff] %v2479_v11 }
 0x456   : > { %v2358_v47 = vpop.f32.mrb[52].mxu0  ;;  %v2483_v58 = vpop.f32.mrb[52].mxu1 }
 0x457   : > { %3227 = vst [vmem:[%s7319_s21 + $0x500] sm:$0xff] %v2358_v47  ;;  %v2360_v5 = vpop.f32.mrb[53].mxu0  ;;  %3125 = vst [vmem:[%s7319_s21 + $0x1d0] sm:$0xff] %v2483_v58  ;;  %v2485_v22 = vpop.f32.mrb[53].mxu1 }
 0x458   : > { %3228 = vst [vmem:[%s7319_s21 + $0x508] sm:$0xff] %v2360_v5  ;;  %3126 = vst [vmem:[%s7319_s21 + $0x1d8] sm:$0xff] %v2485_v22 }
 0x45a   : > { %v2364_v0 = vpop.f32.mrb[54].mxu0  ;;  %v2489_v45 = vpop.f32.mrb[54].mxu1 }
 0x45b   : > { %3240 = vst [vmem:[%s7319_s21 + $0x568] sm:$0xff] %v2364_v0  ;;  %v2366_v57 = vpop.f32.mrb[55].mxu0  ;;  %3138 = vst [vmem:[%s7319_s21 + $0x238] sm:$0xff] %v2489_v45  ;;  %v2491_v24 = vpop.f32.mrb[55].mxu1 }
 0x45c   : > { %3241 = vst [vmem:[%s7319_s21 + $0x570] sm:$0xff] %v2366_v57  ;;  %3139 = vst [vmem:[%s7319_s21 + $0x240] sm:$0xff] %v2491_v24 }
 0x45e   : > { %v2370_v51 = vpop.f32.mrb[56].mxu0  ;;  %v2495_v9 = vpop.f32.mrb[56].mxu1 }
 0x45f   : > { %3253 = vst [vmem:[%s7319_s21 + $0x5d0] sm:$0xff] %v2370_v51  ;;  %v2372_v8 = vpop.f32.mrb[57].mxu0  ;;  %3151 = vst [vmem:[%s7319_s21 + $0x2a0] sm:$0xff] %v2495_v9  ;;  %v2497_v12 = vpop.f32.mrb[57].mxu1 }
 0x460   : > { %3254 = vst [vmem:[%s7319_s21 + $0x5d8] sm:$0xff] %v2372_v8  ;;  %3152 = vst [vmem:[%s7319_s21 + $0x2a8] sm:$0xff] %v2497_v12 }
 0x462   : > { %v2376_v44 = vpop.f32.mrb[58].mxu0  ;;  %v2501_v32 = vpop.f32.mrb[58].mxu1 }
 0x463   : > { %3266 = vst [vmem:[%s7319_s21 + $0x638] sm:$0xff] %v2376_v44  ;;  %v2378_v55 = vpop.f32.mrb[59].mxu0  ;;  %3164 = vst [vmem:[%s7319_s21 + $0x308] sm:$0xff] %v2501_v32  ;;  %v2503_v52 = vpop.f32.mrb[59].mxu1 }
 0x464   : > { %3267 = vst [vmem:[%s7319_s21 + $0x640] sm:$0xff] %v2378_v55  ;;  %3165 = vst [vmem:[%s7319_s21 + $0x310] sm:$0xff] %v2503_v52 }
 0x466   : > { %v2382_v37 = vpop.f32.mrb[60].mxu0  ;;  %v2507_v7 = vpop.f32.mrb[60].mxu1 }
 0x467   : > { %3279 = vst [vmem:[%s7319_s21 + $0x6a0] sm:$0xff] %v2382_v37  ;;  %v2384_v18 = vpop.f32.mrb[61].mxu0  ;;  %3177 = vst [vmem:[%s7319_s21 + $0x370] sm:$0xff] %v2507_v7  ;;  %v2509_v3 = vpop.f32.mrb[61].mxu1 }
 0x468   : > { %3280 = vst [vmem:[%s7319_s21 + $0x6a8] sm:$0xff] %v2384_v18  ;;  %3178 = vst [vmem:[%s7319_s21 + $0x378] sm:$0xff] %v2509_v3 }
 0x46a   : > { %v2388_v43 = vpop.f32.mrb[62].mxu0  ;;  %v2513_v4 = vpop.f32.mrb[62].mxu1 }
 0x46b   : > { %3292 = vst [vmem:[%s7319_s21 + $0x708] sm:$0xff] %v2388_v43  ;;  %v2390_v14 = vpop.f32.mrb[63].mxu0  ;;  %3190 = vst [vmem:[%s7319_s21 + $0x3d8] sm:$0xff] %v2513_v4  ;;  %v2515_v49 = vpop.f32.mrb[63].mxu1 }
 0x46c   : > { %3293 = vst [vmem:[%s7319_s21 + $0x710] sm:$0xff] %v2390_v14  ;;  %3191 = vst [vmem:[%s7319_s21 + $0x3e0] sm:$0xff] %v2515_v49 }
 0x46e   : > { %v2632_v34 = vpop.f32.mrb[64].mxu0  ;;  %v2519_v33 = vpop.f32.mrb[64].mxu1 }
 0x46f   : > { %3075 = vst [vmem:[%s7319_s21 + $0x40] sm:$0xff] %v2632_v34  ;;  %v2634_v26 = vpop.f32.mrb[65].mxu0  ;;  %3203 = vst [vmem:[%s7319_s21 + $0x440] sm:$0xff] %v2519_v33  ;;  %v2521_v60 = vpop.f32.mrb[65].mxu1 }
 0x470   : > { %3076 = vst [vmem:[%s7319_s21 + $0x48] sm:$0xff] %v2634_v26  ;;  %3204 = vst [vmem:[%s7319_s21 + $0x448] sm:$0xff] %v2521_v60 }
 0x472   : > { %v2638_v2 = vpop.f32.mrb[66].mxu0  ;;  %v2525_v15 = vpop.f32.mrb[66].mxu1 }
 0x473   : > { %3088 = vst [vmem:[%s7319_s21 + $0xa8] sm:$0xff] %v2638_v2  ;;  %v2640_v16 = vpop.f32.mrb[67].mxu0  ;;  %3216 = vst [vmem:[%s7319_s21 + $0x4a8] sm:$0xff] %v2525_v15  ;;  %v2527_v29 = vpop.f32.mrb[67].mxu1 }
 0x474   : > { %3089 = vst [vmem:[%s7319_s21 + $0xb0] sm:$0xff] %v2640_v16  ;;  %3217 = vst [vmem:[%s7319_s21 + $0x4b0] sm:$0xff] %v2527_v29 }
 0x476   : > { %v2644_v28 = vpop.f32.mrb[68].mxu0  ;;  %v2531_v6 = vpop.f32.mrb[68].mxu1 }
 0x477   : > { %3101 = vst [vmem:[%s7319_s21 + $0x110] sm:$0xff] %v2644_v28  ;;  %v2646_v27 = vpop.f32.mrb[69].mxu0  ;;  %3229 = vst [vmem:[%s7319_s21 + $0x510] sm:$0xff] %v2531_v6  ;;  %v2533_v1 = vpop.f32.mrb[69].mxu1 }
 0x478   : > { %3102 = vst [vmem:[%s7319_s21 + $0x118] sm:$0xff] %v2646_v27  ;;  %3230 = vst [vmem:[%s7319_s21 + $0x518] sm:$0xff] %v2533_v1 }
 0x47a   : > { %v2650_v20 = vpop.f32.mrb[70].mxu0  ;;  %v2537_v23 = vpop.f32.mrb[70].mxu1 }
 0x47b   : > { %3114 = vst [vmem:[%s7319_s21 + $0x178] sm:$0xff] %v2650_v20  ;;  %v2652_v38 = vpop.f32.mrb[71].mxu0  ;;  %3242 = vst [vmem:[%s7319_s21 + $0x578] sm:$0xff] %v2537_v23  ;;  %v2539_v59 = vpop.f32.mrb[71].mxu1 }
 0x47c   : > { %3115 = vst [vmem:[%s7319_s21 + $0x180] sm:$0xff] %v2652_v38  ;;  %3243 = vst [vmem:[%s7319_s21 + $0x580] sm:$0xff] %v2539_v59 }
 0x47e   : > { %v2656_v56 = vpop.f32.mrb[72].mxu0  ;;  %v2543_v19 = vpop.f32.mrb[72].mxu1 }
 0x47f   : > { %3127 = vst [vmem:[%s7319_s21 + $0x1e0] sm:$0xff] %v2656_v56  ;;  %v2658_v31 = vpop.f32.mrb[73].mxu0  ;;  %3255 = vst [vmem:[%s7319_s21 + $0x5e0] sm:$0xff] %v2543_v19  ;;  %v2545_v50 = vpop.f32.mrb[73].mxu1 }
 0x480   : > { %3128 = vst [vmem:[%s7319_s21 + $0x1e8] sm:$0xff] %v2658_v31  ;;  %3256 = vst [vmem:[%s7319_s21 + $0x5e8] sm:$0xff] %v2545_v50 }
 0x482   : > { %v2662_v53 = vpop.f32.mrb[74].mxu0  ;;  %v2549_v17 = vpop.f32.mrb[74].mxu1 }
 0x483   : > { %3140 = vst [vmem:[%s7319_s21 + $0x248] sm:$0xff] %v2662_v53  ;;  %v2664_v63 = vpop.f32.mrb[75].mxu0  ;;  %3268 = vst [vmem:[%s7319_s21 + $0x648] sm:$0xff] %v2549_v17  ;;  %v2551_v40 = vpop.f32.mrb[75].mxu1 }
 0x484   : > { %3141 = vst [vmem:[%s7319_s21 + $0x250] sm:$0xff] %v2664_v63  ;;  %3269 = vst [vmem:[%s7319_s21 + $0x650] sm:$0xff] %v2551_v40 }
 0x486   : > { %v2668_v36 = vpop.f32.mrb[76].mxu0  ;;  %v2555_v30 = vpop.f32.mrb[76].mxu1 }
 0x487   : > { %3153 = vst [vmem:[%s7319_s21 + $0x2b0] sm:$0xff] %v2668_v36  ;;  %v2670_v61 = vpop.f32.mrb[77].mxu0  ;;  %3281 = vst [vmem:[%s7319_s21 + $0x6b0] sm:$0xff] %v2555_v30  ;;  %v2557_v13 = vpop.f32.mrb[77].mxu1 }
 0x488   : > { %3154 = vst [vmem:[%s7319_s21 + $0x2b8] sm:$0xff] %v2670_v61  ;;  %3282 = vst [vmem:[%s7319_s21 + $0x6b8] sm:$0xff] %v2557_v13 }
 0x48a   : > { %v2674_v41 = vpop.f32.mrb[78].mxu0  ;;  %v2561_v42 = vpop.f32.mrb[78].mxu1 }
 0x48b   : > { %3166 = vst [vmem:[%s7319_s21 + $0x318] sm:$0xff] %v2674_v41  ;;  %v2676_v62 = vpop.f32.mrb[79].mxu0  ;;  %3294 = vst [vmem:[%s7319_s21 + $0x718] sm:$0xff] %v2561_v42  ;;  %v2563_v46 = vpop.f32.mrb[79].mxu1 }
 0x48c   : > { %3167 = vst [vmem:[%s7319_s21 + $0x320] sm:$0xff] %v2676_v62  ;;  %3295 = vst [vmem:[%s7319_s21 + $0x720] sm:$0xff] %v2563_v46 }
 0x48e   : > { %v2680_v48 = vpop.f32.mrb[80].mxu0  ;;  %v2805_v39 = vpop.f32.mrb[80].mxu1 }
 0x48f   : > { %3179 = vst [vmem:[%s7319_s21 + $0x380] sm:$0xff] %v2680_v48  ;;  %v2682_v35 = vpop.f32.mrb[81].mxu0  ;;  %3077 = vst [vmem:[%s7319_s21 + $0x50] sm:$0xff] %v2805_v39  ;;  %v2807_v25 = vpop.f32.mrb[81].mxu1 }
 0x490   : > { %3180 = vst [vmem:[%s7319_s21 + $0x388] sm:$0xff] %v2682_v35  ;;  %3078 = vst [vmem:[%s7319_s21 + $0x58] sm:$0xff] %v2807_v25 }
 0x492   : > { %v2686_v21 = vpop.f32.mrb[82].mxu0  ;;  %v2811_v54 = vpop.f32.mrb[82].mxu1 }
 0x493   : > { %3192 = vst [vmem:[%s7319_s21 + $0x3e8] sm:$0xff] %v2686_v21  ;;  %v2688_v10 = vpop.f32.mrb[83].mxu0  ;;  %3090 = vst [vmem:[%s7319_s21 + $0xb8] sm:$0xff] %v2811_v54  ;;  %v2813_v11 = vpop.f32.mrb[83].mxu1 }
 0x494   : > { %3193 = vst [vmem:[%s7319_s21 + $0x3f0] sm:$0xff] %v2688_v10  ;;  %3091 = vst [vmem:[%s7319_s21 + $0xc0] sm:$0xff] %v2813_v11 }
 0x496   : > { %v2692_v47 = vpop.f32.mrb[84].mxu0  ;;  %v2817_v58 = vpop.f32.mrb[84].mxu1 }
 0x497   : > { %3205 = vst [vmem:[%s7319_s21 + $0x450] sm:$0xff] %v2692_v47  ;;  %v2694_v5 = vpop.f32.mrb[85].mxu0  ;;  %3103 = vst [vmem:[%s7319_s21 + $0x120] sm:$0xff] %v2817_v58  ;;  %v2819_v22 = vpop.f32.mrb[85].mxu1 }
 0x498   : > { %3206 = vst [vmem:[%s7319_s21 + $0x458] sm:$0xff] %v2694_v5  ;;  %3104 = vst [vmem:[%s7319_s21 + $0x128] sm:$0xff] %v2819_v22 }
 0x49a   : > { %v2698_v0 = vpop.f32.mrb[86].mxu0  ;;  %v2823_v45 = vpop.f32.mrb[86].mxu1 }
 0x49b   : > { %3218 = vst [vmem:[%s7319_s21 + $0x4b8] sm:$0xff] %v2698_v0  ;;  %v2700_v57 = vpop.f32.mrb[87].mxu0  ;;  %3116 = vst [vmem:[%s7319_s21 + $0x188] sm:$0xff] %v2823_v45  ;;  %v2825_v24 = vpop.f32.mrb[87].mxu1 }
 0x49c   : > { %3219 = vst [vmem:[%s7319_s21 + $0x4c0] sm:$0xff] %v2700_v57  ;;  %3117 = vst [vmem:[%s7319_s21 + $0x190] sm:$0xff] %v2825_v24 }
 0x49e   : > { %v2704_v51 = vpop.f32.mrb[88].mxu0  ;;  %v2829_v9 = vpop.f32.mrb[88].mxu1 }
 0x49f   : > { %3231 = vst [vmem:[%s7319_s21 + $0x520] sm:$0xff] %v2704_v51  ;;  %v2706_v8 = vpop.f32.mrb[89].mxu0  ;;  %3129 = vst [vmem:[%s7319_s21 + $0x1f0] sm:$0xff] %v2829_v9  ;;  %v2831_v12 = vpop.f32.mrb[89].mxu1 }
 0x4a0   : > { %3232 = vst [vmem:[%s7319_s21 + $0x528] sm:$0xff] %v2706_v8  ;;  %3130 = vst [vmem:[%s7319_s21 + $0x1f8] sm:$0xff] %v2831_v12 }
 0x4a2   : > { %v2710_v44 = vpop.f32.mrb[90].mxu0  ;;  %v2835_v32 = vpop.f32.mrb[90].mxu1 }
 0x4a3   : > { %3244 = vst [vmem:[%s7319_s21 + $0x588] sm:$0xff] %v2710_v44  ;;  %v2712_v55 = vpop.f32.mrb[91].mxu0  ;;  %3142 = vst [vmem:[%s7319_s21 + $0x258] sm:$0xff] %v2835_v32  ;;  %v2837_v52 = vpop.f32.mrb[91].mxu1 }
 0x4a4   : > { %3245 = vst [vmem:[%s7319_s21 + $0x590] sm:$0xff] %v2712_v55  ;;  %3143 = vst [vmem:[%s7319_s21 + $0x260] sm:$0xff] %v2837_v52 }
 0x4a6   : > { %v2716_v37 = vpop.f32.mrb[92].mxu0  ;;  %v2841_v7 = vpop.f32.mrb[92].mxu1 }
 0x4a7   : > { %3257 = vst [vmem:[%s7319_s21 + $0x5f0] sm:$0xff] %v2716_v37  ;;  %v2718_v18 = vpop.f32.mrb[93].mxu0  ;;  %3155 = vst [vmem:[%s7319_s21 + $0x2c0] sm:$0xff] %v2841_v7  ;;  %v2843_v3 = vpop.f32.mrb[93].mxu1 }
 0x4a8   : > { %3258 = vst [vmem:[%s7319_s21 + $0x5f8] sm:$0xff] %v2718_v18  ;;  %3156 = vst [vmem:[%s7319_s21 + $0x2c8] sm:$0xff] %v2843_v3 }
 0x4aa   : > { %v2722_v43 = vpop.f32.mrb[94].mxu0  ;;  %v2847_v4 = vpop.f32.mrb[94].mxu1 }
 0x4ab   : > { %3270 = vst [vmem:[%s7319_s21 + $0x658] sm:$0xff] %v2722_v43  ;;  %v2724_v14 = vpop.f32.mrb[95].mxu0  ;;  %3168 = vst [vmem:[%s7319_s21 + $0x328] sm:$0xff] %v2847_v4  ;;  %v2849_v49 = vpop.f32.mrb[95].mxu1 }
 0x4ac   : > { %3271 = vst [vmem:[%s7319_s21 + $0x660] sm:$0xff] %v2724_v14  ;;  %3169 = vst [vmem:[%s7319_s21 + $0x330] sm:$0xff] %v2849_v49 }
 0x4ae   : > { %v2728_v34 = vpop.f32.mrb[96].mxu0  ;;  %v2853_v33 = vpop.f32.mrb[96].mxu1 }
 0x4af   : > { %3283 = vst [vmem:[%s7319_s21 + $0x6c0] sm:$0xff] %v2728_v34  ;;  %v2730_v26 = vpop.f32.mrb[97].mxu0  ;;  %3181 = vst [vmem:[%s7319_s21 + $0x390] sm:$0xff] %v2853_v33  ;;  %v2855_v60 = vpop.f32.mrb[97].mxu1 }
 0x4b0   : > { %3284 = vst [vmem:[%s7319_s21 + $0x6c8] sm:$0xff] %v2730_v26  ;;  %3182 = vst [vmem:[%s7319_s21 + $0x398] sm:$0xff] %v2855_v60 }
 0x4b2   : > { %v2734_v2 = vpop.f32.mrb[98].mxu0  ;;  %v2859_v15 = vpop.f32.mrb[98].mxu1 }
 0x4b3   : > { %3296 = vst [vmem:[%s7319_s21 + $0x728] sm:$0xff] %v2734_v2  ;;  %v2736_v16 = vpop.f32.mrb[99].mxu0  ;;  %3194 = vst [vmem:[%s7319_s21 + $0x3f8] sm:$0xff] %v2859_v15  ;;  %v2861_v29 = vpop.f32.mrb[99].mxu1 }
 0x4b4   : > { %3297 = vst [vmem:[%s7319_s21 + $0x730] sm:$0xff] %v2736_v16  ;;  %3195 = vst [vmem:[%s7319_s21 + $0x400] sm:$0xff] %v2861_v29 }
 0x4b6   : > { %v4454_v28 = vpop.f32.mrb[100].mxu0  ;;  %v2865_v6 = vpop.f32.mrb[100].mxu1 }
 0x4b7   : > { %3092 = vst [vmem:[%s7319_s21 + $0xc8] sm:$0xff] %v4454_v28  ;;  %v2978_v27 = vpop.f32.mrb[101].mxu0  ;;  %3207 = vst [vmem:[%s7319_s21 + $0x460] sm:$0xff] %v2865_v6  ;;  %v2867_v1 = vpop.f32.mrb[101].mxu1 }
 0x4b8   : > { %3079 = vst [vmem:[%s7319_s21 + $0x60] sm:$0xff] %v2978_v27  ;;  %3208 = vst [vmem:[%s7319_s21 + $0x468] sm:$0xff] %v2867_v1 }
 0x4ba   : > { %v4457_v20 = vpop.f32.mrb[102].mxu0  ;;  %v2871_v23 = vpop.f32.mrb[102].mxu1 }
 0x4bb   : > { %3118 = vst [vmem:[%s7319_s21 + $0x198] sm:$0xff] %v4457_v20  ;;  %v2988_v38 = vpop.f32.mrb[103].mxu0  ;;  %3220 = vst [vmem:[%s7319_s21 + $0x4c8] sm:$0xff] %v2871_v23  ;;  %v2873_v59 = vpop.f32.mrb[103].mxu1 }
 0x4bc   : > { %3105 = vst [vmem:[%s7319_s21 + $0x130] sm:$0xff] %v2988_v38  ;;  %3221 = vst [vmem:[%s7319_s21 + $0x4d0] sm:$0xff] %v2873_v59 }
 0x4be   : > { %v4460_v56 = vpop.f32.mrb[104].mxu0  ;;  %v2877_v19 = vpop.f32.mrb[104].mxu1 }
 0x4bf   : > { %3144 = vst [vmem:[%s7319_s21 + $0x268] sm:$0xff] %v4460_v56  ;;  %v2998_v31 = vpop.f32.mrb[105].mxu0  ;;  %3233 = vst [vmem:[%s7319_s21 + $0x530] sm:$0xff] %v2877_v19  ;;  %v2879_v50 = vpop.f32.mrb[105].mxu1 }
 0x4c0   : > { %3131 = vst [vmem:[%s7319_s21 + $0x200] sm:$0xff] %v2998_v31  ;;  %3234 = vst [vmem:[%s7319_s21 + $0x538] sm:$0xff] %v2879_v50 }
 0x4c2   : > { %v4463_v53 = vpop.f32.mrb[106].mxu0  ;;  %v2883_v17 = vpop.f32.mrb[106].mxu1 }
 0x4c3   : > { %3170 = vst [vmem:[%s7319_s21 + $0x338] sm:$0xff] %v4463_v53  ;;  %v3008_v63 = vpop.f32.mrb[107].mxu0  ;;  %3246 = vst [vmem:[%s7319_s21 + $0x598] sm:$0xff] %v2883_v17  ;;  %v2885_v40 = vpop.f32.mrb[107].mxu1 }
 0x4c4   : > { %3157 = vst [vmem:[%s7319_s21 + $0x2d0] sm:$0xff] %v3008_v63  ;;  %3247 = vst [vmem:[%s7319_s21 + $0x5a0] sm:$0xff] %v2885_v40 }
 0x4c6   : > { %v4466_v36 = vpop.f32.mrb[108].mxu0  ;;  %v2889_v30 = vpop.f32.mrb[108].mxu1 }
 0x4c7   : > { %3196 = vst [vmem:[%s7319_s21 + $0x408] sm:$0xff] %v4466_v36  ;;  %v3018_v61 = vpop.f32.mrb[109].mxu0  ;;  %3259 = vst [vmem:[%s7319_s21 + $0x600] sm:$0xff] %v2889_v30  ;;  %v2891_v13 = vpop.f32.mrb[109].mxu1 }
 0x4c8   : > { %3183 = vst [vmem:[%s7319_s21 + $0x3a0] sm:$0xff] %v3018_v61  ;;  %3260 = vst [vmem:[%s7319_s21 + $0x608] sm:$0xff] %v2891_v13 }
 0x4ca   : > { %v4469_v41 = vpop.f32.mrb[110].mxu0  ;;  %v2895_v42 = vpop.f32.mrb[110].mxu1 }
 0x4cb   : > { %3222 = vst [vmem:[%s7319_s21 + $0x4d8] sm:$0xff] %v4469_v41  ;;  %v3028_v62 = vpop.f32.mrb[111].mxu0  ;;  %3272 = vst [vmem:[%s7319_s21 + $0x668] sm:$0xff] %v2895_v42  ;;  %v2897_v46 = vpop.f32.mrb[111].mxu1 }
 0x4cc   : > { %3209 = vst [vmem:[%s7319_s21 + $0x470] sm:$0xff] %v3028_v62  ;;  %3273 = vst [vmem:[%s7319_s21 + $0x670] sm:$0xff] %v2897_v46 }
 0x4ce   : > { %v4472_v48 = vpop.f32.mrb[112].mxu0  ;;  %v2901_v39 = vpop.f32.mrb[112].mxu1 }
 0x4cf   : > { %3248 = vst [vmem:[%s7319_s21 + $0x5a8] sm:$0xff] %v4472_v48  ;;  %v3038_v35 = vpop.f32.mrb[113].mxu0  ;;  %3285 = vst [vmem:[%s7319_s21 + $0x6d0] sm:$0xff] %v2901_v39  ;;  %v2903_v25 = vpop.f32.mrb[113].mxu1 }
 0x4d0   : > { %3235 = vst [vmem:[%s7319_s21 + $0x540] sm:$0xff] %v3038_v35  ;;  %3286 = vst [vmem:[%s7319_s21 + $0x6d8] sm:$0xff] %v2903_v25 }
 0x4d2   : > { %v4475_v21 = vpop.f32.mrb[114].mxu0  ;;  %v2907_v54 = vpop.f32.mrb[114].mxu1  ;;  %3307 = sbr.rel (!%p5481_p6) target bundleno = 1443 (0x5a3), region = 180 }
 0x4d3   : > { %3274 = vst [vmem:[%s7319_s21 + $0x678] sm:$0xff] %v4475_v21  ;;  %v3048_v10 = vpop.f32.mrb[115].mxu0  ;;  %3298 = vst [vmem:[%s7319_s21 + $0x738] sm:$0xff] %v2907_v54  ;;  %v2909_v11 = vpop.f32.mrb[115].mxu1 }
 0x4d4   : > { %3261 = vst [vmem:[%s7319_s21 + $0x610] sm:$0xff] %v3048_v10  ;;  %3299 = vst [vmem:[%s7319_s21 + $0x740] sm:$0xff] %v2909_v11 }
 0x4d6   : > { %v4478_v47 = vpop.f32.mrb[116].mxu0 }
 0x4d7   : > { %3300 = vst [vmem:[%s7319_s21 + $0x748] sm:$0xff] %v4478_v47  ;;  %v3058_v58 = vpop.f32.mrb[117].mxu0 }
 0x4d8   : > { %3287 = vst [vmem:[%s7319_s21 + $0x6e0] sm:$0xff] %v3058_v58 }
 0x4d9   : > { %s8417_s9 = smov (!%p3310_p9, %s3309_s9), 13 }
 0x4da   : > { %s3312_s12 = smul.u32 2304, %s8417_s9  ;;  %s7600_s18 = sshll.u32 %s8417_s9, 3 }
 0x4dc   : > { %p4395_p10 = scmp.eq.s32.totalorder %s3312_s12, 0 }
 0x4dd   : > { %p3322_p11 = scmp.lt.u32.totalorder (!%p4395_p10), %s7600_s18, 8 }
 0x4de   : > { %3321 = sbr.rel (%p4395_p10) target bundleno = 1443 (0x5a3), region = 184 }
 0x4e5   : > { %3325 = sbr.rel (%p3322_p11) target bundleno = 1422 (0x58e), region = 188  ;;  %s7604_s7 = sand.u32 (!%p3322_p11), 7, %s7600_s18  }
 0x4e6   : > { %p3375_p6 = scmp.eq.s32.totalorder (!%p3322_p11), %s7604_s7, 0  ;;  %p4396_p12 = scmp.ne.s32.totalorder (!%p3322_p11), %s7604_s7, 0 }
 0x4ec   : > { %3378 = sbr.rel (%p4396_p12) target bundleno = 1331 (0x533), region = 203  ;;  %s3379_s23 = sshrl.u32 (!%p4396_p12), %s7600_s18, 3 }
 0x4ed   : > { %s7611_s11 = sshrl.u32 (!%p4396_p12), %s3379_s23, 2 }
 0x4ee   : > { %p4397_p13 = scmp.le.s32.totalorder (!%p4396_p12), %s7611_s11, 0 }
 0x4f3   : > { %4139 = sbr.rel (%p4397_p13) target bundleno = 1311 (0x51f), region = 421  ;;  %s8372_s6 = smov (!%p4397_p13), %s7598_s13 }
 0x4f4   : > { %s8373_s17 = smov (!%p4397_p13), %s7319_s21  ;;  %s7620_s29 = smov (!%p4397_p13), 0  }
 0x4f5   : > { %s7622_s14 = smov (!%p4397_p13), 0  }
 0x4fa LB: >> { %v3392_v5 = vld [vmem:[%s5341_s17] sm:$0xff]  ;;  %v3394_v22 = vld [vmem:[%s5341_s17 + $0x8] sm:$0xff]  ;;  %v3396_v0 = vld [vmem:[%s5341_s17 + $0x10] sm:$0xff]  ;;  %s3536_s30 = sadd.s32 1, %s5345_s29  ;;  %s3386_s14 = sadd.s32 1, %s5349_s14   ;;  %s5349_s14 = sphi %s7622_s14, %s3386_s14   ;;  %s5345_s29 = sphi %s7620_s29, %s8376_s29   ;;  %s5341_s17 = sphi %s8373_s17, %s8375_s17   ;;  %s5337_s6 = sphi %s8372_s6, %s8374_s6  }
 0x4fb   : >> { %3393 = vst [vmem:[%s5337_s6] sm:$0xff] %v3392_v5  ;;  %3395 = vst [vmem:[%s5337_s6 + $0x8] sm:$0xff] %v3394_v22  ;;  %v3398_v45 = vld [vmem:[%s5341_s17 + $0x18] sm:$0xff]  ;;  %v3400_v57 = vld [vmem:[%s5341_s17 + $0x68] sm:$0xff]  ;;  %p3537_p0 = scmp.ge.s32.totalorder %s3536_s30, %s7611_s11  ;;  %p3385_p3 = scmp.ge.s32.totalorder %s3386_s14, %s7611_s11 }
 0x4fc   : >> { %3397 = vst [vmem:[%s5337_s6 + $0x10] sm:$0xff] %v3396_v0  ;;  %v3402_v24 = vld [vmem:[%s5341_s17 + $0x70] sm:$0xff]  ;;  %3399 = vst [vmem:[%s5337_s6 + $0x18] sm:$0xff] %v3398_v45  ;;  %v3404_v51 = vld [vmem:[%s5341_s17 + $0x78] sm:$0xff] }
 0x4fd   : >> { %3401 = vst [vmem:[%s5337_s6 + $0xc8] sm:$0xff] %v3400_v57  ;;  %3403 = vst [vmem:[%s5337_s6 + $0xd0] sm:$0xff] %v3402_v24  ;;  %v3406_v9 = vld [vmem:[%s5341_s17 + $0x80] sm:$0xff]  ;;  %v3408_v8 = vld [vmem:[%s5341_s17 + $0xd0] sm:$0xff]  ;;  %s8419_s30 = smov (%p3537_p0, %s3536_s30), 0 }
 0x4fe   : >> { %3405 = vst [vmem:[%s5337_s6 + $0xd8] sm:$0xff] %v3404_v51  ;;  %3407 = vst [vmem:[%s5337_s6 + $0xe0] sm:$0xff] %v3406_v9  ;;  %v3410_v12 = vld [vmem:[%s5341_s17 + $0xd8] sm:$0xff]  ;;  %v3412_v44 = vld [vmem:[%s5341_s17 + $0xe0] sm:$0xff]  ;;  %s4398_s26 = sshll.u32 %s8419_s30, 5  ;;  %s8376_s29 = smov %s8419_s30 }
 0x4ff   : >> { %3409 = vst [vmem:[%s5337_s6 + $0x190] sm:$0xff] %v3408_v8  ;;  %v3414_v32 = vld [vmem:[%s5341_s17 + $0xe8] sm:$0xff]  ;;  %3411 = vst [vmem:[%s5337_s6 + $0x198] sm:$0xff] %v3410_v12  ;;  %v3416_v55 = vld [vmem:[%s5341_s17 + $0x138] sm:$0xff]  ;;  %s7678_s8 = scalar_lea.vmem %s7319_s21, %s4398_s26 [#allocation4]   ;;  %s7681_s20 = scalar_lea.vmem %s7598_s13, %s4398_s26  }
 0x500   : >> { %3413 = vst [vmem:[%s5337_s6 + $0x1a0] sm:$0xff] %v3412_v44  ;;  %3415 = vst [vmem:[%s5337_s6 + $0x1a8] sm:$0xff] %v3414_v32  ;;  %v3418_v52 = vld [vmem:[%s5341_s17 + $0x140] sm:$0xff]  ;;  %v3420_v37 = vld [vmem:[%s5341_s17 + $0x148] sm:$0xff] }
 0x501   : >> { %3417 = vst [vmem:[%s5337_s6 + $0x258] sm:$0xff] %v3416_v55  ;;  %3419 = vst [vmem:[%s5337_s6 + $0x260] sm:$0xff] %v3418_v52  ;;  %v3422_v7 = vld [vmem:[%s5341_s17 + $0x150] sm:$0xff]  ;;  %v3424_v18 = vld [vmem:[%s5341_s17 + $0x1a0] sm:$0xff] }
 0x502   : >> { %3421 = vst [vmem:[%s5337_s6 + $0x268] sm:$0xff] %v3420_v37  ;;  %v3426_v3 = vld [vmem:[%s5341_s17 + $0x1a8] sm:$0xff]  ;;  %3423 = vst [vmem:[%s5337_s6 + $0x270] sm:$0xff] %v3422_v7  ;;  %v3428_v43 = vld [vmem:[%s5341_s17 + $0x1b0] sm:$0xff] }
 0x503   : >> { %3425 = vst [vmem:[%s5337_s6 + $0x320] sm:$0xff] %v3424_v18  ;;  %3427 = vst [vmem:[%s5337_s6 + $0x328] sm:$0xff] %v3426_v3  ;;  %v3430_v4 = vld [vmem:[%s5341_s17 + $0x1b8] sm:$0xff]  ;;  %v3432_v14 = vld [vmem:[%s5341_s17 + $0x208] sm:$0xff] }
 0x504   : >> { %3429 = vst [vmem:[%s5337_s6 + $0x330] sm:$0xff] %v3428_v43  ;;  %3431 = vst [vmem:[%s5337_s6 + $0x338] sm:$0xff] %v3430_v4  ;;  %v3434_v49 = vld [vmem:[%s5341_s17 + $0x210] sm:$0xff]  ;;  %v3436_v34 = vld [vmem:[%s5341_s17 + $0x218] sm:$0xff] }
 0x505   : >> { %3433 = vst [vmem:[%s5337_s6 + $0x3e8] sm:$0xff] %v3432_v14  ;;  %v3438_v33 = vld [vmem:[%s5341_s17 + $0x220] sm:$0xff]  ;;  %3435 = vst [vmem:[%s5337_s6 + $0x3f0] sm:$0xff] %v3434_v49  ;;  %v3440_v26 = vld [vmem:[%s5341_s17 + $0x270] sm:$0xff] }
 0x506   : >> { %3437 = vst [vmem:[%s5337_s6 + $0x3f8] sm:$0xff] %v3436_v34  ;;  %3439 = vst [vmem:[%s5337_s6 + $0x400] sm:$0xff] %v3438_v33  ;;  %v3442_v60 = vld [vmem:[%s5341_s17 + $0x278] sm:$0xff]  ;;  %v3444_v2 = vld [vmem:[%s5341_s17 + $0x280] sm:$0xff] }
 0x507   : >> { %3441 = vst [vmem:[%s5337_s6 + $0x4b0] sm:$0xff] %v3440_v26  ;;  %3443 = vst [vmem:[%s5337_s6 + $0x4b8] sm:$0xff] %v3442_v60  ;;  %v3446_v15 = vld [vmem:[%s5341_s17 + $0x288] sm:$0xff]  ;;  %v3448_v16 = vld [vmem:[%s5341_s17 + $0x2d8] sm:$0xff] }
 0x508   : >> { %3445 = vst [vmem:[%s5337_s6 + $0x4c0] sm:$0xff] %v3444_v2  ;;  %v3450_v29 = vld [vmem:[%s5341_s17 + $0x2e0] sm:$0xff]  ;;  %3447 = vst [vmem:[%s5337_s6 + $0x4c8] sm:$0xff] %v3446_v15  ;;  %v3452_v28 = vld [vmem:[%s5341_s17 + $0x2e8] sm:$0xff] }
 0x509   : >> { %3449 = vst [vmem:[%s5337_s6 + $0x578] sm:$0xff] %v3448_v16  ;;  %3451 = vst [vmem:[%s5337_s6 + $0x580] sm:$0xff] %v3450_v29  ;;  %v3454_v6 = vld [vmem:[%s5341_s17 + $0x2f0] sm:$0xff]  ;;  %v3456_v27 = vld [vmem:[%s5341_s17 + $0x340] sm:$0xff] }
 0x50a   : >> { %3453 = vst [vmem:[%s5337_s6 + $0x588] sm:$0xff] %v3452_v28  ;;  %3455 = vst [vmem:[%s5337_s6 + $0x590] sm:$0xff] %v3454_v6  ;;  %v3458_v1 = vld [vmem:[%s5341_s17 + $0x348] sm:$0xff]  ;;  %v3460_v20 = vld [vmem:[%s5341_s17 + $0x350] sm:$0xff] }
 0x50b   : >> { %3457 = vst [vmem:[%s5337_s6 + $0x640] sm:$0xff] %v3456_v27  ;;  %v3462_v23 = vld [vmem:[%s5341_s17 + $0x358] sm:$0xff]  ;;  %3459 = vst [vmem:[%s5337_s6 + $0x648] sm:$0xff] %v3458_v1  ;;  %v3464_v38 = vld [vmem:[%s5341_s17 + $0x3a8] sm:$0xff] }
 0x50c   : >> { %3461 = vst [vmem:[%s5337_s6 + $0x650] sm:$0xff] %v3460_v20  ;;  %3463 = vst [vmem:[%s5337_s6 + $0x658] sm:$0xff] %v3462_v23  ;;  %v3466_v59 = vld [vmem:[%s5341_s17 + $0x3b0] sm:$0xff]  ;;  %v3468_v56 = vld [vmem:[%s5341_s17 + $0x3b8] sm:$0xff] }
 0x50d   : >> { %3465 = vst [vmem:[%s5337_s6 + $0x708] sm:$0xff] %v3464_v38  ;;  %3467 = vst [vmem:[%s5337_s6 + $0x710] sm:$0xff] %v3466_v59  ;;  %v3470_v19 = vld [vmem:[%s5341_s17 + $0x3c0] sm:$0xff]  ;;  %v3472_v31 = vld [vmem:[%s5341_s17 + $0x410] sm:$0xff] }
 0x50e   : >> { %3469 = vst [vmem:[%s5337_s6 + $0x718] sm:$0xff] %v3468_v56  ;;  %v3474_v50 = vld [vmem:[%s5341_s17 + $0x418] sm:$0xff]  ;;  %3471 = vst [vmem:[%s5337_s6 + $0x720] sm:$0xff] %v3470_v19  ;;  %v3476_v53 = vld [vmem:[%s5341_s17 + $0x420] sm:$0xff] }
 0x50f   : >> { %3473 = vst [vmem:[%s5337_s6 + $0x7d0] sm:$0xff] %v3472_v31  ;;  %3475 = vst [vmem:[%s5337_s6 + $0x7d8] sm:$0xff] %v3474_v50  ;;  %v3478_v17 = vld [vmem:[%s5341_s17 + $0x428] sm:$0xff]  ;;  %v3480_v63 = vld [vmem:[%s5341_s17 + $0x478] sm:$0xff] }
 0x510   : >> { %3477 = vst [vmem:[%s5337_s6 + $0x7e0] sm:$0xff] %v3476_v53  ;;  %3479 = vst [vmem:[%s5337_s6 + $0x7e8] sm:$0xff] %v3478_v17  ;;  %v3482_v40 = vld [vmem:[%s5341_s17 + $0x480] sm:$0xff]  ;;  %v3484_v36 = vld [vmem:[%s5341_s17 + $0x488] sm:$0xff] }
 0x511   : >> { %3481 = vst [vmem:[%s5337_s6 + $0x898] sm:$0xff] %v3480_v63  ;;  %v3486_v30 = vld [vmem:[%s5341_s17 + $0x490] sm:$0xff]  ;;  %3483 = vst [vmem:[%s5337_s6 + $0x8a0] sm:$0xff] %v3482_v40  ;;  %v3488_v61 = vld [vmem:[%s5341_s17 + $0x4e0] sm:$0xff] }
 0x512   : >> { %3485 = vst [vmem:[%s5337_s6 + $0x8a8] sm:$0xff] %v3484_v36  ;;  %3487 = vst [vmem:[%s5337_s6 + $0x8b0] sm:$0xff] %v3486_v30  ;;  %v3490_v13 = vld [vmem:[%s5341_s17 + $0x4e8] sm:$0xff]  ;;  %v3492_v41 = vld [vmem:[%s5341_s17 + $0x4f0] sm:$0xff] }
 0x513   : >> { %3489 = vst [vmem:[%s5337_s6 + $0x960] sm:$0xff] %v3488_v61  ;;  %3491 = vst [vmem:[%s5337_s6 + $0x968] sm:$0xff] %v3490_v13  ;;  %v3494_v42 = vld [vmem:[%s5341_s17 + $0x4f8] sm:$0xff]  ;;  %v3496_v62 = vld [vmem:[%s5341_s17 + $0x548] sm:$0xff] }
 0x514   : >> { %3493 = vst [vmem:[%s5337_s6 + $0x970] sm:$0xff] %v3492_v41  ;;  %v3498_v46 = vld [vmem:[%s5341_s17 + $0x550] sm:$0xff]  ;;  %3495 = vst [vmem:[%s5337_s6 + $0x978] sm:$0xff] %v3494_v42  ;;  %v3500_v48 = vld [vmem:[%s5341_s17 + $0x558] sm:$0xff] }
 0x515   : >> { %3497 = vst [vmem:[%s5337_s6 + $0xa28] sm:$0xff] %v3496_v62  ;;  %3499 = vst [vmem:[%s5337_s6 + $0xa30] sm:$0xff] %v3498_v46  ;;  %v3502_v39 = vld [vmem:[%s5341_s17 + $0x560] sm:$0xff]  ;;  %v3504_v35 = vld [vmem:[%s5341_s17 + $0x5b0] sm:$0xff] }
 0x516   : >> { %3501 = vst [vmem:[%s5337_s6 + $0xa38] sm:$0xff] %v3500_v48  ;;  %3503 = vst [vmem:[%s5337_s6 + $0xa40] sm:$0xff] %v3502_v39  ;;  %v3506_v25 = vld [vmem:[%s5341_s17 + $0x5b8] sm:$0xff]  ;;  %v3508_v21 = vld [vmem:[%s5341_s17 + $0x5c0] sm:$0xff] }
 0x517   : >> { %3505 = vst [vmem:[%s5337_s6 + $0xaf0] sm:$0xff] %v3504_v35  ;;  %v3510_v54 = vld [vmem:[%s5341_s17 + $0x5c8] sm:$0xff]  ;;  %3507 = vst [vmem:[%s5337_s6 + $0xaf8] sm:$0xff] %v3506_v25  ;;  %v3512_v10 = vld [vmem:[%s5341_s17 + $0x618] sm:$0xff] }
 0x518   : >> { %3509 = vst [vmem:[%s5337_s6 + $0xb00] sm:$0xff] %v3508_v21  ;;  %3511 = vst [vmem:[%s5337_s6 + $0xb08] sm:$0xff] %v3510_v54  ;;  %v3514_v11 = vld [vmem:[%s5341_s17 + $0x620] sm:$0xff]  ;;  %v3516_v47 = vld [vmem:[%s5341_s17 + $0x628] sm:$0xff]  ;;  %3388 = sbr.rel (!%p3385_p3) target bundleno = 1274 (0x4fa), region = 427 }
 0x519   : >> { %3513 = vst [vmem:[%s5337_s6 + $0xbb8] sm:$0xff] %v3512_v10  ;;  %3515 = vst [vmem:[%s5337_s6 + $0xbc0] sm:$0xff] %v3514_v11  ;;  %v3518_v58 = vld [vmem:[%s5341_s17 + $0x630] sm:$0xff]  ;;  %v3520_v5 = vld [vmem:[%s5341_s17 + $0x680] sm:$0xff] }
 0x51a   : >> { %3517 = vst [vmem:[%s5337_s6 + $0xbc8] sm:$0xff] %v3516_v47  ;;  %v3522_v22 = vld [vmem:[%s5341_s17 + $0x688] sm:$0xff]  ;;  %3519 = vst [vmem:[%s5337_s6 + $0xbd0] sm:$0xff] %v3518_v58  ;;  %v3524_v0 = vld [vmem:[%s5341_s17 + $0x690] sm:$0xff] }
 0x51b   : >> { %3521 = vst [vmem:[%s5337_s6 + $0xc80] sm:$0xff] %v3520_v5  ;;  %3523 = vst [vmem:[%s5337_s6 + $0xc88] sm:$0xff] %v3522_v22  ;;  %v3526_v45 = vld [vmem:[%s5341_s17 + $0x698] sm:$0xff]  ;;  %v3528_v57 = vld [vmem:[%s5341_s17 + $0x6e8] sm:$0xff] }
 0x51c   : >> { %3525 = vst [vmem:[%s5337_s6 + $0xc90] sm:$0xff] %v3524_v0  ;;  %3527 = vst [vmem:[%s5337_s6 + $0xc98] sm:$0xff] %v3526_v45  ;;  %v3530_v24 = vld [vmem:[%s5341_s17 + $0x6f0] sm:$0xff]  ;;  %v3532_v51 = vld [vmem:[%s5341_s17 + $0x6f8] sm:$0xff] }
 0x51d   : >> { %3529 = vst [vmem:[%s5337_s6 + $0xd48] sm:$0xff] %v3528_v57  ;;  %v3534_v9 = vld [vmem:[%s5341_s17 + $0x700] sm:$0xff]  ;;  %3531 = vst [vmem:[%s5337_s6 + $0xd50] sm:$0xff] %v3530_v24  ;;  %s8375_s17 = smov %s7678_s8 }
 0x51e   : >> { %3533 = vst [vmem:[%s5337_s6 + $0xd58] sm:$0xff] %v3532_v51  ;;  %3535 = vst [vmem:[%s5337_s6 + $0xd60] sm:$0xff] %v3534_v9  ;;  %s8374_s6 = smov %s7681_s20 }
 0x51f PF: > { %s7803_s10 = sand.u32 3, %s3379_s23   ;;  %s4421_s16 = sshll.u32 %s7611_s11, 9 }
 0x520   : > { %s3547_s1 = sshra.s32 %s4421_s16, 4  ;;  %p4403_p1 = scmp.le.s32.totalorder %s7803_s10, 0 }
 0x521   : > { %s7807_s15 = scalar_lea.vmem %s7319_s21, %s3547_s1 [#allocation4]   ;;  %s7810_s9 = scalar_lea.vmem %s7598_s13, %s3547_s1  }
 0x522   : > { %4153 = sbr.rel (%p4403_p1) target bundleno = 1331 (0x533), region = 432  ;;  %s8377_s28 = smov (!%p4403_p1), %s7810_s9 }
 0x523   : > { %s8378_s27 = smov (!%p4403_p1), %s7807_s15  ;;  %s7819_s19 = smov (!%p4403_p1), 0  }
 0x524   : > { %s7821_s12 = smov (!%p4403_p1), 0  }
 0x529 LB: >> { %v3563_v8 = vld [vmem:[%s5357_s27] sm:$0xff]  ;;  %v3565_v12 = vld [vmem:[%s5357_s27 + $0x68] sm:$0xff]  ;;  %v3567_v44 = vld [vmem:[%s5357_s27 + $0xd0] sm:$0xff]  ;;  %s3599_s23 = sadd.s32 1, %s5361_s19  ;;  %s3557_s12 = sadd.s32 1, %s5365_s12   ;;  %s5365_s12 = sphi %s7821_s12, %s3557_s12   ;;  %s5361_s19 = sphi %s7819_s19, %s8379_s19   ;;  %s5357_s27 = sphi %s8378_s27, %s3604_s27   ;;  %s5353_s28 = sphi %s8377_s28, %s3605_s28  }
 0x52a   : >> { %3564 = vst [vmem:[%s5353_s28] sm:$0xff] %v3563_v8  ;;  %3566 = vst [vmem:[%s5353_s28 + $0xc8] sm:$0xff] %v3565_v12  ;;  %v3569_v32 = vld [vmem:[%s5357_s27 + $0x138] sm:$0xff]  ;;  %v3571_v55 = vld [vmem:[%s5357_s27 + $0x1a0] sm:$0xff]  ;;  %p3600_p2 = scmp.ge.s32.totalorder %s3599_s23, %s7803_s10  ;;  %p3556_p4 = scmp.ge.s32.totalorder %s3557_s12, %s7803_s10 }
 0x52b   : >> { %3568 = vst [vmem:[%s5353_s28 + $0x190] sm:$0xff] %v3567_v44  ;;  %v3573_v52 = vld [vmem:[%s5357_s27 + $0x208] sm:$0xff]  ;;  %3570 = vst [vmem:[%s5353_s28 + $0x258] sm:$0xff] %v3569_v32  ;;  %v3575_v37 = vld [vmem:[%s5357_s27 + $0x270] sm:$0xff] }
 0x52c   : >> { %3572 = vst [vmem:[%s5353_s28 + $0x320] sm:$0xff] %v3571_v55  ;;  %3574 = vst [vmem:[%s5353_s28 + $0x3e8] sm:$0xff] %v3573_v52  ;;  %v3577_v7 = vld [vmem:[%s5357_s27 + $0x2d8] sm:$0xff]  ;;  %v3579_v18 = vld [vmem:[%s5357_s27 + $0x340] sm:$0xff]  ;;  %s8421_s23 = smov (%p3600_p2, %s3599_s23), 0  ;;  %3559 = sbr.rel (!%p3556_p4) target bundleno = 1321 (0x529), region = 438 }
 0x52d   : >> { %3576 = vst [vmem:[%s5353_s28 + $0x4b0] sm:$0xff] %v3575_v37  ;;  %3578 = vst [vmem:[%s5353_s28 + $0x578] sm:$0xff] %v3577_v7  ;;  %v3581_v3 = vld [vmem:[%s5357_s27 + $0x3a8] sm:$0xff]  ;;  %v3583_v43 = vld [vmem:[%s5357_s27 + $0x410] sm:$0xff]  ;;  %s4404_s11 = sshll.u32 %s8421_s23, 3  ;;  %s8379_s19 = smov %s8421_s23 }
 0x52e   : >> { %3580 = vst [vmem:[%s5353_s28 + $0x640] sm:$0xff] %v3579_v18  ;;  %v3585_v4 = vld [vmem:[%s5357_s27 + $0x478] sm:$0xff]  ;;  %3582 = vst [vmem:[%s5353_s28 + $0x708] sm:$0xff] %v3581_v3  ;;  %v3587_v14 = vld [vmem:[%s5357_s27 + $0x4e0] sm:$0xff] }
 0x52f   : >> { %3584 = vst [vmem:[%s5353_s28 + $0x7d0] sm:$0xff] %v3583_v43  ;;  %3586 = vst [vmem:[%s5353_s28 + $0x898] sm:$0xff] %v3585_v4  ;;  %v3589_v49 = vld [vmem:[%s5357_s27 + $0x548] sm:$0xff]  ;;  %v3591_v34 = vld [vmem:[%s5357_s27 + $0x5b0] sm:$0xff] }
 0x530   : >> { %3588 = vst [vmem:[%s5353_s28 + $0x960] sm:$0xff] %v3587_v14  ;;  %3590 = vst [vmem:[%s5353_s28 + $0xa28] sm:$0xff] %v3589_v49  ;;  %v3593_v33 = vld [vmem:[%s5357_s27 + $0x618] sm:$0xff]  ;;  %v3595_v26 = vld [vmem:[%s5357_s27 + $0x680] sm:$0xff] }
 0x531   : >> { %3592 = vst [vmem:[%s5353_s28 + $0xaf0] sm:$0xff] %v3591_v34  ;;  %v3597_v60 = vld [vmem:[%s5357_s27 + $0x6e8] sm:$0xff]  ;;  %3594 = vst [vmem:[%s5353_s28 + $0xbb8] sm:$0xff] %v3593_v33  ;;  %s3604_s27 = scalar_lea.vmem %s7807_s15, %s4404_s11 [#allocation4]  }
 0x532   : >> { %3596 = vst [vmem:[%s5353_s28 + $0xc80] sm:$0xff] %v3595_v26  ;;  %3598 = vst [vmem:[%s5353_s28 + $0xd48] sm:$0xff] %v3597_v60  ;;  %s3605_s28 = scalar_lea.vmem %s7810_s9, %s4404_s11  }
 0x533 PF: > { %3608 = sbr.rel (%p3375_p6) target bundleno = 1422 (0x58e), region = 221  ;;  %s3610_s6 = ssub.s32 (!%p3375_p6), %s7600_s18, %s7604_s7 }
 0x534   : > { %s3614_s17 = sshrl.u32 (!%p3375_p6), %s7600_s18, 3  ;;  %s7888_s29 = scalar_lea.vmem (!%p3375_p6), %s7319_s21, %s3610_s6 [#allocation4] }
 0x535   : > { %s7891_s14 = scalar_lea.vmem (!%p3375_p6), %s7598_s13, %s3610_s6  ;;  %s7895_s30 = sshrl.u32 (!%p3375_p6), %s3614_s17, 2 }
 0x536   : > { %p4406_p5 = scmp.le.s32.totalorder (!%p3375_p6), %s7895_s30, 0 }
 0x53a   : > { %4167 = sbr.rel (%p4406_p5) target bundleno = 1382 (0x566), region = 443  ;;  %s8380_s26 = smov (!%p4406_p5), %s7598_s13 }
 0x53b   : > { %s8381_s8 = smov (!%p4406_p5), %s7319_s21  ;;  %s7904_s20 = smov (!%p4406_p5), 0  }
 0x53c   : > { %s7906_s10 = smov (!%p4406_p5), 0  }
 0x541 LB: >> { %v3627_v2 = vld [vmem:[%s5373_s8] sm:$0xff]  ;;  %v3629_v15 = vld [vmem:[%s5373_s8 + $0x8] sm:$0xff]  ;;  %v3631_v16 = vld [vmem:[%s5373_s8 + $0x10] sm:$0xff]  ;;  %s3771_s16 = sadd.s32 1, %s5377_s20  ;;  %s3621_s10 = sadd.s32 1, %s5381_s10   ;;  %s5381_s10 = sphi %s7906_s10, %s3621_s10   ;;  %s5377_s20 = sphi %s7904_s20, %s8384_s20   ;;  %s5373_s8 = sphi %s8381_s8, %s8383_s8   ;;  %s5369_s26 = sphi %s8380_s26, %s8382_s26  }
 0x542   : >> { %3628 = vst [vmem:[%s5369_s26] sm:$0xff] %v3627_v2  ;;  %3630 = vst [vmem:[%s5369_s26 + $0x8] sm:$0xff] %v3629_v15  ;;  %v3633_v29 = vld [vmem:[%s5373_s8 + $0x18] sm:$0xff]  ;;  %v3635_v28 = vld [vmem:[%s5373_s8 + $0x68] sm:$0xff]  ;;  %p3772_p7 = scmp.ge.s32.totalorder %s3771_s16, %s7895_s30  ;;  %p3620_p8 = scmp.ge.s32.totalorder %s3621_s10, %s7895_s30 }
 0x543   : >> { %3632 = vst [vmem:[%s5369_s26 + $0x10] sm:$0xff] %v3631_v16  ;;  %v3637_v6 = vld [vmem:[%s5373_s8 + $0x70] sm:$0xff]  ;;  %3634 = vst [vmem:[%s5369_s26 + $0x18] sm:$0xff] %v3633_v29  ;;  %v3639_v27 = vld [vmem:[%s5373_s8 + $0x78] sm:$0xff] }
 0x544   : >> { %3636 = vst [vmem:[%s5369_s26 + $0xc8] sm:$0xff] %v3635_v28  ;;  %3638 = vst [vmem:[%s5369_s26 + $0xd0] sm:$0xff] %v3637_v6  ;;  %v3641_v1 = vld [vmem:[%s5373_s8 + $0x80] sm:$0xff]  ;;  %v3643_v20 = vld [vmem:[%s5373_s8 + $0xd0] sm:$0xff]  ;;  %s8423_s16 = smov (%p3772_p7, %s3771_s16), 0 }
 0x545   : >> { %3640 = vst [vmem:[%s5369_s26 + $0xd8] sm:$0xff] %v3639_v27  ;;  %3642 = vst [vmem:[%s5369_s26 + $0xe0] sm:$0xff] %v3641_v1  ;;  %v3645_v23 = vld [vmem:[%s5373_s8 + $0xd8] sm:$0xff]  ;;  %v3647_v38 = vld [vmem:[%s5373_s8 + $0xe0] sm:$0xff]  ;;  %s4407_s1 = sshll.u32 %s8423_s16, 5  ;;  %s8384_s20 = smov %s8423_s16 }
 0x546   : >> { %3644 = vst [vmem:[%s5369_s26 + $0x190] sm:$0xff] %v3643_v20  ;;  %v3649_v59 = vld [vmem:[%s5373_s8 + $0xe8] sm:$0xff]  ;;  %3646 = vst [vmem:[%s5369_s26 + $0x198] sm:$0xff] %v3645_v23  ;;  %v3651_v56 = vld [vmem:[%s5373_s8 + $0x138] sm:$0xff]  ;;  %s7962_s15 = scalar_lea.vmem %s7319_s21, %s4407_s1 [#allocation4]   ;;  %s7965_s9 = scalar_lea.vmem %s7598_s13, %s4407_s1  }
 0x547   : >> { %3648 = vst [vmem:[%s5369_s26 + $0x1a0] sm:$0xff] %v3647_v38  ;;  %3650 = vst [vmem:[%s5369_s26 + $0x1a8] sm:$0xff] %v3649_v59  ;;  %v3653_v19 = vld [vmem:[%s5373_s8 + $0x140] sm:$0xff]  ;;  %v3655_v31 = vld [vmem:[%s5373_s8 + $0x148] sm:$0xff] }
 0x548   : >> { %3652 = vst [vmem:[%s5369_s26 + $0x258] sm:$0xff] %v3651_v56  ;;  %3654 = vst [vmem:[%s5369_s26 + $0x260] sm:$0xff] %v3653_v19  ;;  %v3657_v50 = vld [vmem:[%s5373_s8 + $0x150] sm:$0xff]  ;;  %v3659_v53 = vld [vmem:[%s5373_s8 + $0x1a0] sm:$0xff] }
 0x549   : >> { %3656 = vst [vmem:[%s5369_s26 + $0x268] sm:$0xff] %v3655_v31  ;;  %v3661_v17 = vld [vmem:[%s5373_s8 + $0x1a8] sm:$0xff]  ;;  %3658 = vst [vmem:[%s5369_s26 + $0x270] sm:$0xff] %v3657_v50  ;;  %v3663_v63 = vld [vmem:[%s5373_s8 + $0x1b0] sm:$0xff] }
 0x54a   : >> { %3660 = vst [vmem:[%s5369_s26 + $0x320] sm:$0xff] %v3659_v53  ;;  %3662 = vst [vmem:[%s5369_s26 + $0x328] sm:$0xff] %v3661_v17  ;;  %v3665_v40 = vld [vmem:[%s5373_s8 + $0x1b8] sm:$0xff]  ;;  %v3667_v36 = vld [vmem:[%s5373_s8 + $0x208] sm:$0xff] }
 0x54b   : >> { %3664 = vst [vmem:[%s5369_s26 + $0x330] sm:$0xff] %v3663_v63  ;;  %3666 = vst [vmem:[%s5369_s26 + $0x338] sm:$0xff] %v3665_v40  ;;  %v3669_v30 = vld [vmem:[%s5373_s8 + $0x210] sm:$0xff]  ;;  %v3671_v61 = vld [vmem:[%s5373_s8 + $0x218] sm:$0xff] }
 0x54c   : >> { %3668 = vst [vmem:[%s5369_s26 + $0x3e8] sm:$0xff] %v3667_v36  ;;  %v3673_v13 = vld [vmem:[%s5373_s8 + $0x220] sm:$0xff]  ;;  %3670 = vst [vmem:[%s5369_s26 + $0x3f0] sm:$0xff] %v3669_v30  ;;  %v3675_v41 = vld [vmem:[%s5373_s8 + $0x270] sm:$0xff] }
 0x54d   : >> { %3672 = vst [vmem:[%s5369_s26 + $0x3f8] sm:$0xff] %v3671_v61  ;;  %3674 = vst [vmem:[%s5369_s26 + $0x400] sm:$0xff] %v3673_v13  ;;  %v3677_v42 = vld [vmem:[%s5373_s8 + $0x278] sm:$0xff]  ;;  %v3679_v62 = vld [vmem:[%s5373_s8 + $0x280] sm:$0xff] }
 0x54e   : >> { %3676 = vst [vmem:[%s5369_s26 + $0x4b0] sm:$0xff] %v3675_v41  ;;  %3678 = vst [vmem:[%s5369_s26 + $0x4b8] sm:$0xff] %v3677_v42  ;;  %v3681_v46 = vld [vmem:[%s5373_s8 + $0x288] sm:$0xff]  ;;  %v3683_v48 = vld [vmem:[%s5373_s8 + $0x2d8] sm:$0xff] }
 0x54f   : >> { %3680 = vst [vmem:[%s5369_s26 + $0x4c0] sm:$0xff] %v3679_v62  ;;  %v3685_v39 = vld [vmem:[%s5373_s8 + $0x2e0] sm:$0xff]  ;;  %3682 = vst [vmem:[%s5369_s26 + $0x4c8] sm:$0xff] %v3681_v46  ;;  %v3687_v35 = vld [vmem:[%s5373_s8 + $0x2e8] sm:$0xff] }
 0x550   : >> { %3684 = vst [vmem:[%s5369_s26 + $0x578] sm:$0xff] %v3683_v48  ;;  %3686 = vst [vmem:[%s5369_s26 + $0x580] sm:$0xff] %v3685_v39  ;;  %v3689_v25 = vld [vmem:[%s5373_s8 + $0x2f0] sm:$0xff]  ;;  %v3691_v21 = vld [vmem:[%s5373_s8 + $0x340] sm:$0xff] }
 0x551   : >> { %3688 = vst [vmem:[%s5369_s26 + $0x588] sm:$0xff] %v3687_v35  ;;  %3690 = vst [vmem:[%s5369_s26 + $0x590] sm:$0xff] %v3689_v25  ;;  %v3693_v54 = vld [vmem:[%s5373_s8 + $0x348] sm:$0xff]  ;;  %v3695_v10 = vld [vmem:[%s5373_s8 + $0x350] sm:$0xff] }
 0x552   : >> { %3692 = vst [vmem:[%s5369_s26 + $0x640] sm:$0xff] %v3691_v21  ;;  %v3697_v11 = vld [vmem:[%s5373_s8 + $0x358] sm:$0xff]  ;;  %3694 = vst [vmem:[%s5369_s26 + $0x648] sm:$0xff] %v3693_v54  ;;  %v3699_v47 = vld [vmem:[%s5373_s8 + $0x3a8] sm:$0xff] }
 0x553   : >> { %3696 = vst [vmem:[%s5369_s26 + $0x650] sm:$0xff] %v3695_v10  ;;  %3698 = vst [vmem:[%s5369_s26 + $0x658] sm:$0xff] %v3697_v11  ;;  %v3701_v58 = vld [vmem:[%s5373_s8 + $0x3b0] sm:$0xff]  ;;  %v3703_v5 = vld [vmem:[%s5373_s8 + $0x3b8] sm:$0xff] }
 0x554   : >> { %3700 = vst [vmem:[%s5369_s26 + $0x708] sm:$0xff] %v3699_v47  ;;  %3702 = vst [vmem:[%s5369_s26 + $0x710] sm:$0xff] %v3701_v58  ;;  %v3705_v22 = vld [vmem:[%s5373_s8 + $0x3c0] sm:$0xff]  ;;  %v3707_v0 = vld [vmem:[%s5373_s8 + $0x410] sm:$0xff] }
 0x555   : >> { %3704 = vst [vmem:[%s5369_s26 + $0x718] sm:$0xff] %v3703_v5  ;;  %v3709_v45 = vld [vmem:[%s5373_s8 + $0x418] sm:$0xff]  ;;  %3706 = vst [vmem:[%s5369_s26 + $0x720] sm:$0xff] %v3705_v22  ;;  %v3711_v57 = vld [vmem:[%s5373_s8 + $0x420] sm:$0xff] }
 0x556   : >> { %3708 = vst [vmem:[%s5369_s26 + $0x7d0] sm:$0xff] %v3707_v0  ;;  %3710 = vst [vmem:[%s5369_s26 + $0x7d8] sm:$0xff] %v3709_v45  ;;  %v3713_v24 = vld [vmem:[%s5373_s8 + $0x428] sm:$0xff]  ;;  %v3715_v51 = vld [vmem:[%s5373_s8 + $0x478] sm:$0xff] }
 0x557   : >> { %3712 = vst [vmem:[%s5369_s26 + $0x7e0] sm:$0xff] %v3711_v57  ;;  %3714 = vst [vmem:[%s5369_s26 + $0x7e8] sm:$0xff] %v3713_v24  ;;  %v3717_v9 = vld [vmem:[%s5373_s8 + $0x480] sm:$0xff]  ;;  %v3719_v8 = vld [vmem:[%s5373_s8 + $0x488] sm:$0xff] }
 0x558   : >> { %3716 = vst [vmem:[%s5369_s26 + $0x898] sm:$0xff] %v3715_v51  ;;  %v3721_v12 = vld [vmem:[%s5373_s8 + $0x490] sm:$0xff]  ;;  %3718 = vst [vmem:[%s5369_s26 + $0x8a0] sm:$0xff] %v3717_v9  ;;  %v3723_v44 = vld [vmem:[%s5373_s8 + $0x4e0] sm:$0xff] }
 0x559   : >> { %3720 = vst [vmem:[%s5369_s26 + $0x8a8] sm:$0xff] %v3719_v8  ;;  %3722 = vst [vmem:[%s5369_s26 + $0x8b0] sm:$0xff] %v3721_v12  ;;  %v3725_v32 = vld [vmem:[%s5373_s8 + $0x4e8] sm:$0xff]  ;;  %v3727_v55 = vld [vmem:[%s5373_s8 + $0x4f0] sm:$0xff] }
 0x55a   : >> { %3724 = vst [vmem:[%s5369_s26 + $0x960] sm:$0xff] %v3723_v44  ;;  %3726 = vst [vmem:[%s5369_s26 + $0x968] sm:$0xff] %v3725_v32  ;;  %v3729_v52 = vld [vmem:[%s5373_s8 + $0x4f8] sm:$0xff]  ;;  %v3731_v37 = vld [vmem:[%s5373_s8 + $0x548] sm:$0xff] }
 0x55b   : >> { %3728 = vst [vmem:[%s5369_s26 + $0x970] sm:$0xff] %v3727_v55  ;;  %v3733_v7 = vld [vmem:[%s5373_s8 + $0x550] sm:$0xff]  ;;  %3730 = vst [vmem:[%s5369_s26 + $0x978] sm:$0xff] %v3729_v52  ;;  %v3735_v18 = vld [vmem:[%s5373_s8 + $0x558] sm:$0xff] }
 0x55c   : >> { %3732 = vst [vmem:[%s5369_s26 + $0xa28] sm:$0xff] %v3731_v37  ;;  %3734 = vst [vmem:[%s5369_s26 + $0xa30] sm:$0xff] %v3733_v7  ;;  %v3737_v3 = vld [vmem:[%s5373_s8 + $0x560] sm:$0xff]  ;;  %v3739_v43 = vld [vmem:[%s5373_s8 + $0x5b0] sm:$0xff] }
 0x55d   : >> { %3736 = vst [vmem:[%s5369_s26 + $0xa38] sm:$0xff] %v3735_v18  ;;  %3738 = vst [vmem:[%s5369_s26 + $0xa40] sm:$0xff] %v3737_v3  ;;  %v3741_v4 = vld [vmem:[%s5373_s8 + $0x5b8] sm:$0xff]  ;;  %v3743_v14 = vld [vmem:[%s5373_s8 + $0x5c0] sm:$0xff] }
 0x55e   : >> { %3740 = vst [vmem:[%s5369_s26 + $0xaf0] sm:$0xff] %v3739_v43  ;;  %v3745_v49 = vld [vmem:[%s5373_s8 + $0x5c8] sm:$0xff]  ;;  %3742 = vst [vmem:[%s5369_s26 + $0xaf8] sm:$0xff] %v3741_v4  ;;  %v3747_v34 = vld [vmem:[%s5373_s8 + $0x618] sm:$0xff] }
 0x55f   : >> { %3744 = vst [vmem:[%s5369_s26 + $0xb00] sm:$0xff] %v3743_v14  ;;  %3746 = vst [vmem:[%s5369_s26 + $0xb08] sm:$0xff] %v3745_v49  ;;  %v3749_v33 = vld [vmem:[%s5373_s8 + $0x620] sm:$0xff]  ;;  %v3751_v26 = vld [vmem:[%s5373_s8 + $0x628] sm:$0xff]  ;;  %3623 = sbr.rel (!%p3620_p8) target bundleno = 1345 (0x541), region = 449 }
 0x560   : >> { %3748 = vst [vmem:[%s5369_s26 + $0xbb8] sm:$0xff] %v3747_v34  ;;  %3750 = vst [vmem:[%s5369_s26 + $0xbc0] sm:$0xff] %v3749_v33  ;;  %v3753_v60 = vld [vmem:[%s5373_s8 + $0x630] sm:$0xff]  ;;  %v3755_v2 = vld [vmem:[%s5373_s8 + $0x680] sm:$0xff] }
 0x561   : >> { %3752 = vst [vmem:[%s5369_s26 + $0xbc8] sm:$0xff] %v3751_v26  ;;  %v3757_v15 = vld [vmem:[%s5373_s8 + $0x688] sm:$0xff]  ;;  %3754 = vst [vmem:[%s5369_s26 + $0xbd0] sm:$0xff] %v3753_v60  ;;  %v3759_v16 = vld [vmem:[%s5373_s8 + $0x690] sm:$0xff] }
 0x562   : >> { %3756 = vst [vmem:[%s5369_s26 + $0xc80] sm:$0xff] %v3755_v2  ;;  %3758 = vst [vmem:[%s5369_s26 + $0xc88] sm:$0xff] %v3757_v15  ;;  %v3761_v29 = vld [vmem:[%s5373_s8 + $0x698] sm:$0xff]  ;;  %v3763_v28 = vld [vmem:[%s5373_s8 + $0x6e8] sm:$0xff] }
 0x563   : >> { %3760 = vst [vmem:[%s5369_s26 + $0xc90] sm:$0xff] %v3759_v16  ;;  %3762 = vst [vmem:[%s5369_s26 + $0xc98] sm:$0xff] %v3761_v29  ;;  %v3765_v6 = vld [vmem:[%s5373_s8 + $0x6f0] sm:$0xff]  ;;  %v3767_v27 = vld [vmem:[%s5373_s8 + $0x6f8] sm:$0xff] }
 0x564   : >> { %3764 = vst [vmem:[%s5369_s26 + $0xd48] sm:$0xff] %v3763_v28  ;;  %v3769_v1 = vld [vmem:[%s5373_s8 + $0x700] sm:$0xff]  ;;  %3766 = vst [vmem:[%s5369_s26 + $0xd50] sm:$0xff] %v3765_v6  ;;  %s8383_s8 = smov %s7962_s15 }
 0x565   : >> { %3768 = vst [vmem:[%s5369_s26 + $0xd58] sm:$0xff] %v3767_v27  ;;  %3770 = vst [vmem:[%s5369_s26 + $0xd60] sm:$0xff] %v3769_v1  ;;  %s8382_s26 = smov %s7965_s9 }
 0x566 PF: > { %s8087_s28 = sand.u32 3, %s3614_s17   ;;  %s4423_s27 = sshll.u32 %s7895_s30, 9 }
 0x567   : > { %s3782_s19 = sshra.s32 %s4423_s27, 4  ;;  %p4412_p9 = scmp.le.s32.totalorder %s8087_s28, 0 }
 0x568   : > { %s8091_s12 = scalar_lea.vmem %s7319_s21, %s3782_s19 [#allocation4]   ;;  %s8094_s23 = scalar_lea.vmem %s7598_s13, %s3782_s19  }
 0x569   : > { %4181 = sbr.rel (%p4412_p9) target bundleno = 1402 (0x57a), region = 454  ;;  %s8385_s11 = smov (!%p4412_p9), %s8094_s23 }
 0x56a   : > { %s8386_s6 = smov (!%p4412_p9), %s8091_s12  ;;  %s8103_s26 = smov (!%p4412_p9), 0  }
 0x56b   : > { %s8105_s8 = smov (!%p4412_p9), 0  }
 0x570 LB: >> { %v3798_v20 = vld [vmem:[%s5389_s6] sm:$0xff]  ;;  %v3800_v23 = vld [vmem:[%s5389_s6 + $0x68] sm:$0xff]  ;;  %v3802_v38 = vld [vmem:[%s5389_s6 + $0xd0] sm:$0xff]  ;;  %s3834_s17 = sadd.s32 1, %s5393_s26  ;;  %s3792_s8 = sadd.s32 1, %s5397_s8   ;;  %s5397_s8 = sphi %s8105_s8, %s3792_s8   ;;  %s5393_s26 = sphi %s8103_s26, %s8387_s26   ;;  %s5389_s6 = sphi %s8386_s6, %s3839_s6   ;;  %s5385_s11 = sphi %s8385_s11, %s3840_s11  }
 0x571   : >> { %3799 = vst [vmem:[%s5385_s11] sm:$0xff] %v3798_v20  ;;  %3801 = vst [vmem:[%s5385_s11 + $0xc8] sm:$0xff] %v3800_v23  ;;  %v3804_v59 = vld [vmem:[%s5389_s6 + $0x138] sm:$0xff]  ;;  %v3806_v56 = vld [vmem:[%s5389_s6 + $0x1a0] sm:$0xff]  ;;  %p3835_p10 = scmp.ge.s32.totalorder %s3834_s17, %s8087_s28  ;;  %p3791_p11 = scmp.ge.s32.totalorder %s3792_s8, %s8087_s28 }
 0x572   : >> { %3803 = vst [vmem:[%s5385_s11 + $0x190] sm:$0xff] %v3802_v38  ;;  %v3808_v19 = vld [vmem:[%s5389_s6 + $0x208] sm:$0xff]  ;;  %3805 = vst [vmem:[%s5385_s11 + $0x258] sm:$0xff] %v3804_v59  ;;  %v3810_v31 = vld [vmem:[%s5389_s6 + $0x270] sm:$0xff] }
 0x573   : >> { %3807 = vst [vmem:[%s5385_s11 + $0x320] sm:$0xff] %v3806_v56  ;;  %3809 = vst [vmem:[%s5385_s11 + $0x3e8] sm:$0xff] %v3808_v19  ;;  %v3812_v50 = vld [vmem:[%s5389_s6 + $0x2d8] sm:$0xff]  ;;  %v3814_v53 = vld [vmem:[%s5389_s6 + $0x340] sm:$0xff]  ;;  %s8425_s17 = smov (%p3835_p10, %s3834_s17), 0  ;;  %3794 = sbr.rel (!%p3791_p11) target bundleno = 1392 (0x570), region = 460 }
 0x574   : >> { %3811 = vst [vmem:[%s5385_s11 + $0x4b0] sm:$0xff] %v3810_v31  ;;  %3813 = vst [vmem:[%s5385_s11 + $0x578] sm:$0xff] %v3812_v50  ;;  %v3816_v17 = vld [vmem:[%s5389_s6 + $0x3a8] sm:$0xff]  ;;  %v3818_v63 = vld [vmem:[%s5389_s6 + $0x410] sm:$0xff]  ;;  %s4413_s30 = sshll.u32 %s8425_s17, 3  ;;  %s8387_s26 = smov %s8425_s17 }
 0x575   : >> { %3815 = vst [vmem:[%s5385_s11 + $0x640] sm:$0xff] %v3814_v53  ;;  %v3820_v40 = vld [vmem:[%s5389_s6 + $0x478] sm:$0xff]  ;;  %3817 = vst [vmem:[%s5385_s11 + $0x708] sm:$0xff] %v3816_v17  ;;  %v3822_v36 = vld [vmem:[%s5389_s6 + $0x4e0] sm:$0xff] }
 0x576   : >> { %3819 = vst [vmem:[%s5385_s11 + $0x7d0] sm:$0xff] %v3818_v63  ;;  %3821 = vst [vmem:[%s5385_s11 + $0x898] sm:$0xff] %v3820_v40  ;;  %v3824_v30 = vld [vmem:[%s5389_s6 + $0x548] sm:$0xff]  ;;  %v3826_v61 = vld [vmem:[%s5389_s6 + $0x5b0] sm:$0xff] }
 0x577   : >> { %3823 = vst [vmem:[%s5385_s11 + $0x960] sm:$0xff] %v3822_v36  ;;  %3825 = vst [vmem:[%s5385_s11 + $0xa28] sm:$0xff] %v3824_v30  ;;  %v3828_v13 = vld [vmem:[%s5389_s6 + $0x618] sm:$0xff]  ;;  %v3830_v41 = vld [vmem:[%s5389_s6 + $0x680] sm:$0xff] }
 0x578   : >> { %3827 = vst [vmem:[%s5385_s11 + $0xaf0] sm:$0xff] %v3826_v61  ;;  %v3832_v42 = vld [vmem:[%s5389_s6 + $0x6e8] sm:$0xff]  ;;  %3829 = vst [vmem:[%s5385_s11 + $0xbb8] sm:$0xff] %v3828_v13  ;;  %s3839_s6 = scalar_lea.vmem %s8091_s12, %s4413_s30 [#allocation4]  }
 0x579   : >> { %3831 = vst [vmem:[%s5385_s11 + $0xc80] sm:$0xff] %v3830_v41  ;;  %3833 = vst [vmem:[%s5385_s11 + $0xd48] sm:$0xff] %v3832_v42  ;;  %s3840_s11 = scalar_lea.vmem %s8094_s23, %s4413_s30  }
 0x57a PF: > { %s5405_s20 = smov 0  }
 0x57b   : > { %s8167_s10 = sshllo.u32 %s5405_s20, %s7604_s7 }
 0x57c   : > { %v3850_v62 = vld [vmem:[%s7888_s29] sm:%s8167_s10]  ;;  %v3852_v46 = vld [vmem:[%s7888_s29 + $0x68] sm:%s8167_s10] }
 0x57d   : > { %3851 = vst [vmem:[%s7891_s14] sm:%s8167_s10] %v3850_v62  ;;  %3853 = vst [vmem:[%s7891_s14 + $0xc8] sm:%s8167_s10] %v3852_v46 }
 0x57e   : > { %v3854_v48 = vld [vmem:[%s7888_s29 + $0xd0] sm:%s8167_s10]  ;;  %v3856_v39 = vld [vmem:[%s7888_s29 + $0x138] sm:%s8167_s10] }
 0x57f   : > { %3855 = vst [vmem:[%s7891_s14 + $0x190] sm:%s8167_s10] %v3854_v48  ;;  %3857 = vst [vmem:[%s7891_s14 + $0x258] sm:%s8167_s10] %v3856_v39 }
 0x580   : > { %v3858_v35 = vld [vmem:[%s7888_s29 + $0x1a0] sm:%s8167_s10]  ;;  %v3860_v25 = vld [vmem:[%s7888_s29 + $0x208] sm:%s8167_s10] }
 0x581   : > { %3859 = vst [vmem:[%s7891_s14 + $0x320] sm:%s8167_s10] %v3858_v35  ;;  %3861 = vst [vmem:[%s7891_s14 + $0x3e8] sm:%s8167_s10] %v3860_v25 }
 0x582   : > { %v3862_v21 = vld [vmem:[%s7888_s29 + $0x270] sm:%s8167_s10]  ;;  %v3864_v54 = vld [vmem:[%s7888_s29 + $0x2d8] sm:%s8167_s10] }
 0x583   : > { %3863 = vst [vmem:[%s7891_s14 + $0x4b0] sm:%s8167_s10] %v3862_v21  ;;  %3865 = vst [vmem:[%s7891_s14 + $0x578] sm:%s8167_s10] %v3864_v54 }
 0x584   : > { %v3866_v10 = vld [vmem:[%s7888_s29 + $0x340] sm:%s8167_s10]  ;;  %v3868_v11 = vld [vmem:[%s7888_s29 + $0x3a8] sm:%s8167_s10] }
 0x585   : > { %3867 = vst [vmem:[%s7891_s14 + $0x640] sm:%s8167_s10] %v3866_v10  ;;  %3869 = vst [vmem:[%s7891_s14 + $0x708] sm:%s8167_s10] %v3868_v11 }
 0x586   : > { %v3870_v47 = vld [vmem:[%s7888_s29 + $0x410] sm:%s8167_s10]  ;;  %v3872_v58 = vld [vmem:[%s7888_s29 + $0x478] sm:%s8167_s10] }
 0x587   : > { %3871 = vst [vmem:[%s7891_s14 + $0x7d0] sm:%s8167_s10] %v3870_v47  ;;  %3873 = vst [vmem:[%s7891_s14 + $0x898] sm:%s8167_s10] %v3872_v58 }
 0x588   : > { %v3874_v5 = vld [vmem:[%s7888_s29 + $0x4e0] sm:%s8167_s10]  ;;  %v3876_v22 = vld [vmem:[%s7888_s29 + $0x548] sm:%s8167_s10] }
 0x589   : > { %3875 = vst [vmem:[%s7891_s14 + $0x960] sm:%s8167_s10] %v3874_v5  ;;  %3877 = vst [vmem:[%s7891_s14 + $0xa28] sm:%s8167_s10] %v3876_v22 }
 0x58a   : > { %v3878_v0 = vld [vmem:[%s7888_s29 + $0x5b0] sm:%s8167_s10]  ;;  %v3880_v45 = vld [vmem:[%s7888_s29 + $0x618] sm:%s8167_s10] }
 0x58b   : > { %3879 = vst [vmem:[%s7891_s14 + $0xaf0] sm:%s8167_s10] %v3878_v0  ;;  %3881 = vst [vmem:[%s7891_s14 + $0xbb8] sm:%s8167_s10] %v3880_v45 }
 0x58c   : > { %v3882_v57 = vld [vmem:[%s7888_s29 + $0x680] sm:%s8167_s10]  ;;  %v3884_v24 = vld [vmem:[%s7888_s29 + $0x6e8] sm:%s8167_s10] }
 0x58d   : > { %3883 = vst [vmem:[%s7891_s14 + $0xc80] sm:%s8167_s10] %v3882_v57  ;;  %3885 = vst [vmem:[%s7891_s14 + $0xd48] sm:%s8167_s10] %v3884_v24 }
 0x58e PF: > { %p4415_p6 = scmp.ge.u32.totalorder %s7600_s18, 8 }
 0x58f   : > { %s5406_s7 = smov (!%p4415_p6), 0  }
 0x590   : > { %3328 = sbr.rel (%p4415_p6) target bundleno = 1443 (0x5a3), region = 192  ;;  %s8243_s29 = sshllo.u32 (!%p4415_p6), %s5406_s7, %s7600_s18 }
 0x591   : > { %v3338_v51 = vld [vmem:[%s7319_s21] sm:%s8243_s29] (!%p4415_p6)  ;;  %v3340_v9 = vld [vmem:[%s7319_s21 + $0x68] sm:%s8243_s29] (!%p4415_p6) }
 0x592   : > { %3339 = vst [vmem:[%s7598_s13] sm:%s8243_s29] (!%p4415_p6), %v3338_v51  ;;  %3341 = vst [vmem:[%s7598_s13 + $0xc8] sm:%s8243_s29] (!%p4415_p6), %v3340_v9 }
 0x593   : > { %v3342_v8 = vld [vmem:[%s7319_s21 + $0xd0] sm:%s8243_s29] (!%p4415_p6)  ;;  %v3344_v12 = vld [vmem:[%s7319_s21 + $0x138] sm:%s8243_s29] (!%p4415_p6) }
 0x594   : > { %3343 = vst [vmem:[%s7598_s13 + $0x190] sm:%s8243_s29] (!%p4415_p6), %v3342_v8  ;;  %3345 = vst [vmem:[%s7598_s13 + $0x258] sm:%s8243_s29] (!%p4415_p6), %v3344_v12 }
 0x595   : > { %v3346_v44 = vld [vmem:[%s7319_s21 + $0x1a0] sm:%s8243_s29] (!%p4415_p6)  ;;  %v3348_v32 = vld [vmem:[%s7319_s21 + $0x208] sm:%s8243_s29] (!%p4415_p6) }
 0x596   : > { %3347 = vst [vmem:[%s7598_s13 + $0x320] sm:%s8243_s29] (!%p4415_p6), %v3346_v44  ;;  %3349 = vst [vmem:[%s7598_s13 + $0x3e8] sm:%s8243_s29] (!%p4415_p6), %v3348_v32 }
 0x597   : > { %v3350_v55 = vld [vmem:[%s7319_s21 + $0x270] sm:%s8243_s29]  ;;  %v3352_v52 = vld [vmem:[%s7319_s21 + $0x2d8] sm:%s8243_s29] }
 0x598   : > { %3351 = vst [vmem:[%s7598_s13 + $0x4b0] sm:%s8243_s29] %v3350_v55  ;;  %3353 = vst [vmem:[%s7598_s13 + $0x578] sm:%s8243_s29] %v3352_v52 }
 0x599   : > { %v3354_v37 = vld [vmem:[%s7319_s21 + $0x340] sm:%s8243_s29]  ;;  %v3356_v7 = vld [vmem:[%s7319_s21 + $0x3a8] sm:%s8243_s29] }
 0x59a   : > { %3355 = vst [vmem:[%s7598_s13 + $0x640] sm:%s8243_s29] %v3354_v37  ;;  %3357 = vst [vmem:[%s7598_s13 + $0x708] sm:%s8243_s29] %v3356_v7 }
 0x59b   : > { %v3358_v18 = vld [vmem:[%s7319_s21 + $0x410] sm:%s8243_s29]  ;;  %v3360_v3 = vld [vmem:[%s7319_s21 + $0x478] sm:%s8243_s29] }
 0x59c   : > { %3359 = vst [vmem:[%s7598_s13 + $0x7d0] sm:%s8243_s29] %v3358_v18  ;;  %3361 = vst [vmem:[%s7598_s13 + $0x898] sm:%s8243_s29] %v3360_v3 }
 0x59d   : > { %v3362_v43 = vld [vmem:[%s7319_s21 + $0x4e0] sm:%s8243_s29]  ;;  %v3364_v4 = vld [vmem:[%s7319_s21 + $0x548] sm:%s8243_s29] }
 0x59e   : > { %3363 = vst [vmem:[%s7598_s13 + $0x960] sm:%s8243_s29] %v3362_v43  ;;  %3365 = vst [vmem:[%s7598_s13 + $0xa28] sm:%s8243_s29] %v3364_v4 }
 0x59f   : > { %v3366_v14 = vld [vmem:[%s7319_s21 + $0x5b0] sm:%s8243_s29]  ;;  %v3368_v49 = vld [vmem:[%s7319_s21 + $0x618] sm:%s8243_s29] }
 0x5a0   : > { %3367 = vst [vmem:[%s7598_s13 + $0xaf0] sm:%s8243_s29] %v3366_v14  ;;  %3369 = vst [vmem:[%s7598_s13 + $0xbb8] sm:%s8243_s29] %v3368_v49 }
 0x5a1   : > { %v3370_v34 = vld [vmem:[%s7319_s21 + $0x680] sm:%s8243_s29]  ;;  %v3372_v33 = vld [vmem:[%s7319_s21 + $0x6e8] sm:%s8243_s29] }
 0x5a2   : > { %3371 = vst [vmem:[%s7598_s13 + $0xc80] sm:%s8243_s29] %v3370_v34  ;;  %3373 = vst [vmem:[%s7598_s13 + $0xd48] sm:%s8243_s29] %v3372_v33 }
 0x5a3 PF: > { %s16_s25 = sadd.s32 1, %s5205_s25   ;;  %s8388_s18 = sld [smem:[#allocation6_spill]] }
 0x5a4   : > { %p13_p12 = scmp.ge.s32.totalorder %s16_s25, 4   ;;  %s8389_s14 = sld [smem:[#allocation5_spill]] }
 0x5a5   : > { %s8390_s21 = smov %s5193_s22  ;;  %s8392_s23 = smov %s5201_s24 }
 0x5a6   :  { %15 = sbr.rel (!%p13_p12) target bundleno = 6 (0x6), region = 471 }
 0x5a9   : > { %s8391_s22 = smov %s8388_s18 }
 0x5aa   : > { %s8393_s24 = smov %s8389_s14 }

</bundles_post_ra>
